<compile_context>
chip_gen: v7x
topology: tpu7x:2x2x1
jax: 0.10.0
libtpu: 0.0.40
codegen_flags: <defaults>
</compile_context>

<pallas_src>
import jax
import jax.numpy as jnp
from jax import lax
from jax.experimental import pallas as pl
from jax.experimental.pallas import tpu as pltpu

# ----- configuration (mirrors LSTM.__init__ arguments) -----------------------
ROOMS = [0, 1]                      # 2 rooms -> output dim 2
INPUTS_D = [0, 1, 2, 3, 4, 5]       # feature columns feeding D
TEMPERATURE_COLUMN = [0, 1]
POWER_COLUMN = [2, 3]
CASE_COLUMN = 6                     # TODO(synk): self.case_column is referenced in
                                    # forward() but never set in __init__ of the
                                    # reference module; column 6 chosen here.
N_FEATURES = 8
FEED_INPUT_THROUGH_NN = True
INPUT_NN_HIDDEN = [32, 32]
LSTM_HIDDEN = 32
LSTM_LAYERS = 2
LAYER_NORM = True
OUTPUT_NN_HIDDEN = [32]
DIVISION_FACTOR = jnp.array([10.0, 10.0], dtype=jnp.float32)

B, T = 2, 8
BPAD = 8                            # batch rows padded to one full sublane group
LANE = 128                          # lane width; also equals 4*LSTM_HIDDEN here


# ----- host-side packing into lane-dense slabs --------------------------------
def _pad_block(mat, k_pad):
    """Zero-pad a 2D matrix to (k_pad, 128)."""
    k, n = mat.shape
    return jnp.zeros((k_pad, LANE), jnp.float32).at[:k, :n].set(mat)


def pack_params(params):
    """Pack every weight/bias/constant into one (rows, 128) f32 slab.

    Returns (slab, offsets dict name -> (row_offset, padded_rows), total_rows).
    All row offsets are multiples of 8 (sublane aligned)."""
    H = LSTM_HIDDEN
    L = LSTM_LAYERS
    blocks, offsets = [], {}
    cur = 0

    def add(name, mat, k_pad):
        nonlocal cur
        blocks.append(_pad_block(mat, k_pad))
        offsets[name] = (cur, k_pad)
        cur += k_pad

    # input NN: keep the embedding 128 lanes wide throughout -> pad K to 128
    for i, (w, b) in enumerate(params["input_nn"]):
        add(f"w_in{i}", w, LANE)
        add(f"b_in{i}", b.reshape(1, -1), 8)

    wih, whh, bb = params["lstm"]              # (L,H,4H), (L,H,4H), (L,1,4H)
    add("wih0", wih[0], LANE)                  # LHS is the 128-wide embedding
    add("whh0", whh[0], H)                     # LHS is h (BPAD, H)
    for l in range(1, L):
        add(f"wih{l}", wih[l], H)
        add(f"whh{l}", whh[l], H)
    for l in range(L):
        add(f"b_lstm{l}", bb[l].reshape(1, -1), 8)

    gamma, beta = params["norm"]
    add("gamma", gamma.reshape(1, -1), 8)
    add("beta", beta.reshape(1, -1), 8)

    for i, (w, b) in enumerate(params["output_nn"]):
        kp = H if i == 0 else LANE             # first layer's LHS is (BPAD, H)
        add(f"w_out{i}", w, kp)
        add(f"b_out{i}", b.reshape(1, -1), 8)

    add("inv_div", (1.0 / DIVISION_FACTOR).reshape(1, -1), 8)

    return jnp.concatenate(blocks, axis=0), offsets, cur


def pack_data(x):
    """Pack the embedding input (time-major, batch padded to 8 sublanes) and the
    case scalars into one (T*8 + 8, 128) lane-dense slab."""
    Bn, Tn, _ = x.shape
    temp_cols = jnp.array(TEMPERATURE_COLUMN)
    d_cols = jnp.array(INPUTS_D)

    # states=None path: self.last = zeros; x[:, -1, temperature_column] = self.last
    x = x.at[:, -1, temp_cols].set(0.0)

    emb = jnp.transpose(x[:, :, d_cols], (1, 0, 2))        # (T, B, F)
    emb_pad = jnp.zeros((Tn, BPAD, len(INPUTS_D)), jnp.float32).at[:, :Bn, :].set(emb)

    data = jnp.zeros((Tn * BPAD + 8, LANE), jnp.float32)
    data = data.at[:Tn * BPAD, :len(INPUTS_D)].set(emb_pad.reshape(Tn * BPAD, -1))
    case = x[:, -1, CASE_COLUMN]                           # (B,)
    data = data.at[Tn * BPAD:Tn * BPAD + Bn, 0].set(case)
    return data


# ----- fused Pallas kernel ----------------------------------------------------
def _make_kernel(off, n_in, n_out, L, Tn, H, layer_norm):
    """Build the single fused forward kernel (all shapes/offsets are static)."""
    f32 = jnp.float32
    hi = lax.Precision.HIGHEST   # tiny per-step matmuls: full f32 is ~free and
                                 # keeps cell-state error from compounding.

    def kernel(p_ref, d_ref, o_ref):
        def blk(name):
            r, k = off[name]
            return p_ref[r:r + k, :]

        def row(name, ncols=LANE):
            r, _ = off[name]
            return p_ref[r:r + 1, 0:ncols]

        # ---- 1) input NN on all timesteps at once (stays 128 lanes wide;
        #         padding columns remain exactly 0 through ReLU).
        e = d_ref[0:Tn * BPAD, :]                                   # (T*8, 128)
        for i in range(n_in):
            e = jax.nn.relu(jnp.dot(e, blk(f"w_in{i}"),
                                    preferred_element_type=f32) + row(f"b_in{i}"))

        # ---- 2) layer-0 input-gate contribution for every timestep: one matmul.
        xg0 = jnp.dot(e, blk("wih0"), preferred_element_type=f32) + row("b_lstm0")

        whh = [blk(f"whh{l}") for l in range(L)]
        wih = [None] + [blk(f"wih{l}") for l in range(1, L)]
        b_l = [row(f"b_lstm{l}") for l in range(L)]

        def gate_update(gates, c_prev):
            # full-gate-width activations (2 EUP pushes instead of 4), then slice.
            sg = jax.nn.sigmoid(gates)
            tg = jnp.tanh(gates)
            i = sg[:, 0:H]
            f = sg[:, H:2 * H]
            g = tg[:, 2 * H:3 * H]
            o = sg[:, 3 * H:4 * H]
            c_new = f * c_prev + i * g
            h_new = o * jnp.tanh(c_new)
            return h_new, c_new

        h = [jnp.zeros((BPAD, H), f32) for _ in range(L)]   # initial_h/c are zeros
        c = [jnp.zeros((BPAD, H), f32) for _ in range(L)]

        # ---- 3) statically unrolled recurrence over T timesteps.
        # TODO(synk): the recurrent RHS weights could be held resident in MXU
        # staging registers via pltpu.matmul_push_rhs / matmul_acc_lhs; kept on
        # jnp.dot for portability across v5e/v6e/v7x.
        for t in range(Tn):
            # Recurrent contributions depend only on the previous step's state:
            # hoist them so they can overlap the lower layers' gate math.
            rec = [jnp.dot(h[l], whh[l], preferred_element_type=f32, precision=hi)
                   for l in range(L)]
            # layer 0: input part precomputed; slice is 8-row aligned (free view).
            g0 = xg0[t * BPAD:(t + 1) * BPAD, :] + rec[0]
            h[0], c[0] = gate_update(g0, c[0])
            # layers >= 1: two matmuls (no per-step concat relayout).
            for l in range(1, L):
                gl = (jnp.dot(h[l - 1], wih[l], preferred_element_type=f32,
                              precision=hi) + rec[l] + b_l[l])
                h[l], c[l] = gate_update(gl, c[l])

        # ---- 4) LayerNorm on the last top-layer hidden state (per-row).
        y = h[L - 1]
        if layer_norm:
            gamma = row("gamma", H)
            beta = row("beta", H)
            mean = jnp.mean(y, axis=-1, keepdims=True)
            var = jnp.mean((y - mean) ** 2, axis=-1, keepdims=True)
            y = (y - mean) * lax.rsqrt(var + 1e-5) * gamma + beta

        # ---- 5) output NN (Linear + Tanh); padding columns stay 0 through tanh.
        for i in range(n_out):
            y = jnp.tanh(jnp.dot(y, blk(f"w_out{i}"),
                                 preferred_element_type=f32) + row(f"b_out{i}"))

        # `+ last_temp` dropped: provably zero on the states=None / warm_start=False path.
        out = y * row("inv_div")
        case = d_ref[Tn * BPAD:Tn * BPAD + BPAD, 0:1]                # (8, 1)
        out = jnp.where(case < 1e-6, 0.0, out)                       # (8, 128)

        # ---- 6) single lane-dense writeback: [out; h_0..h_{L-1}; c_0..c_{L-1}].
        padc = jnp.zeros((BPAD, LANE - H), f32)
        slab = jnp.concatenate(
            [out]
            + [jnp.concatenate([h[l], padc], axis=1) for l in range(L)]
            + [jnp.concatenate([c[l], padc], axis=1) for l in range(L)],
            axis=0)
        o_ref[...] = slab

    return kernel


# ----- parameter initialization (deterministic, matches module init scheme) ---
def xavier_normal(key, fan_in, fan_out, shape):
    std = (2.0 / (fan_in + fan_out)) ** 0.5
    return std * jax.random.normal(key, shape, dtype=jnp.float32)


def init_params(key):
    keys = list(jax.random.split(key, 16))
    ki = iter(keys)
    params = {}

    # input preprocessing NN: Linear + ReLU blocks, biases zero
    sizes = [len(INPUTS_D)] + INPUT_NN_HIDDEN
    params["input_nn"] = []
    for i in range(len(sizes) - 1):
        w = xavier_normal(next(ki), sizes[i], sizes[i + 1], (sizes[i], sizes[i + 1]))
        params["input_nn"].append((w, jnp.zeros((sizes[i + 1],), jnp.float32)))

    # LSTM weights (xavier), biases zero.  Layer-0 input size equals
    # INPUT_NN_HIDDEN[-1] == LSTM_HIDDEN so stacking is uniform.
    H = LSTM_HIDDEN
    wih, whh, bb = [], [], []
    for l in range(LSTM_LAYERS):
        in_size = INPUT_NN_HIDDEN[-1] if l == 0 else H
        wih.append(xavier_normal(next(ki), in_size, 4 * H, (in_size, 4 * H)))
        whh.append(xavier_normal(next(ki), H, 4 * H, (H, 4 * H)))
        bb.append(jnp.zeros((1, 4 * H), jnp.float32))       # b_ih + b_hh = 0
    params["lstm"] = (jnp.stack(wih), jnp.stack(whh), jnp.stack(bb))

    # LayerNorm (default affine init, untouched by the module's init loop)
    params["norm"] = (jnp.ones((H,), jnp.float32), jnp.zeros((H,), jnp.float32))

    # output NN: Linear + Tanh blocks, biases zero
    osizes = [H] + OUTPUT_NN_HIDDEN + [len(ROOMS)]
    params["output_nn"] = []
    for i in range(len(osizes) - 1):
        w = xavier_normal(next(ki), osizes[i], osizes[i + 1], (osizes[i], osizes[i + 1]))
        params["output_nn"].append((w, jnp.zeros((osizes[i + 1],), jnp.float32)))
    return params


# ----- module forward (single fused pallas_call, 2 input slabs, 1 output slab) -
def lstm_module_forward(params, x):
    """x: (B, T, N_FEATURES). Reproduces LSTM.forward(x, states=None, warm_start=False)."""
    Bn, Tn, _ = x.shape
    H = LSTM_HIDDEN
    L = LSTM_LAYERS
    n_rooms = len(ROOMS)

    p_slab, off, prows = pack_params(params)        # (prows, 128) lane-dense
    d_slab = pack_data(x)                           # (T*8 + 8, 128) lane-dense
    drows = Tn * BPAD + 8
    out_rows = BPAD * (1 + 2 * L)                   # [out; h_l...; c_l...]

    kernel = _make_kernel(off, len(params["input_nn"]), len(params["output_nn"]),
                          L, Tn, H, LAYER_NORM)

    out_slab = pl.pallas_call(
        kernel,
        out_shape=jax.ShapeDtypeStruct((out_rows, LANE), jnp.float32),
        grid=(1,),
        in_specs=[pl.BlockSpec((prows, LANE), lambda i: (0, 0)),
                  pl.BlockSpec((drows, LANE), lambda i: (0, 0))],
        out_specs=pl.BlockSpec((out_rows, LANE), lambda i: (0, 0)),
        compiler_params=pltpu.CompilerParams(dimension_semantics=("arbitrary",)),
    )(p_slab, d_slab)

    out = out_slab[:Bn, :n_rooms]
    hT = jnp.stack([out_slab[BPAD * (1 + l): BPAD * (1 + l) + Bn, :H]
                    for l in range(L)])
    cT = jnp.stack([out_slab[BPAD * (1 + L + l): BPAD * (1 + L + l) + Bn, :H]
                    for l in range(L)])
    return out, (hT, cT)


# ----- pure-JAX reference for verification -------------------------------------
def reference_forward(params, x):
    Bn, Tn, _ = x.shape
    H = LSTM_HIDDEN
    temp_cols = jnp.array(TEMPERATURE_COLUMN)
    x = x.at[:, -1, temp_cols].set(0.0)
    emb = x[:, :, jnp.array(INPUTS_D)]
    for (w, b) in params["input_nn"]:
        emb = jax.nn.relu(jnp.einsum("btf,fo->bto", emb, w) + b)
    wih, whh, bb = params["lstm"]
    h = jnp.zeros((LSTM_LAYERS, Bn, H), jnp.float32)
    c = jnp.zeros_like(h)
    ys = []
    for t in range(Tn):
        inp = emb[:, t, :]
        nh, nc = [], []
        for l in range(LSTM_LAYERS):
            gates = jnp.dot(inp, wih[l]) + jnp.dot(h[l], whh[l]) + bb[l]
            i = jax.nn.sigmoid(gates[:, :H])
            f = jax.nn.sigmoid(gates[:, H:2 * H])
            g = jnp.tanh(gates[:, 2 * H:3 * H])
            o = jax.nn.sigmoid(gates[:, 3 * H:])
            cn = f * c[l] + i * g
            hn = o * jnp.tanh(cn)
            nh.append(hn); nc.append(cn)
            inp = hn
        h, c = jnp.stack(nh), jnp.stack(nc)
        ys.append(inp)
    last_h = ys[-1]
    gamma, beta = params["norm"]
    mean = last_h.mean(-1, keepdims=True)
    var = ((last_h - mean) ** 2).mean(-1, keepdims=True)
    last_h = (last_h - mean) / jnp.sqrt(var + 1e-5) * gamma + beta
    out = last_h
    for (w, b) in params["output_nn"]:
        out = jnp.tanh(jnp.dot(out, w) + b)
    out = out / DIVISION_FACTOR + x[:, -1, temp_cols]
    case = x[:, -1, CASE_COLUMN]
    out = jnp.where(case[:, None] < 1e-6, 0.0, out)
    return out, (h, c)


if __name__ == "__main__":
    key = jax.random.PRNGKey(0)
    pkey, xkey = jax.random.split(key)
    params = init_params(pkey)
    x = jax.random.uniform(xkey, (B, T, N_FEATURES), dtype=jnp.float32)

    forward = jax.jit(lstm_module_forward)
    out, (h, c) = forward(params, x)
    jax.block_until_ready(out)

    ref_out, (ref_h, ref_c) = reference_forward(params, x)
    # Batched matmuls run at default MXU precision (per perf review); the tiny
    # per-step recurrent matmuls use HIGHEST, so 1e-2 tolerance is conservative.
    assert jnp.allclose(out, ref_out, atol=1e-2, rtol=1e-2)
    assert jnp.allclose(h, ref_h, atol=1e-2, rtol=1e-2)
    assert jnp.allclose(c, ref_c, atol=1e-2, rtol=1e-2)
    print("KERNEL_OK")
</pallas_src>

<mosaic_0001>
module attributes {stable_mosaic.version = 11 : i64} {
  func.func @kernel(%arg0: i32, %arg1: memref<712x128xf32, #tpu.memory_space<vmem>>, %arg2: memref<72x128xf32, #tpu.memory_space<vmem>>, %arg3: memref<40x128xf32, #tpu.memory_space<vmem>>) attributes {dimension_semantics = [#tpu.dimension_semantics<arbitrary>], iteration_bounds = array<i64: 1>, scalar_prefetch = 0 : i64, scratch_operands = 0 : i64, tpu.core_type = #tpu.core_type<tc>, window_params = [{pipeline_mode = #tpu.pipeline_mode<synchronous>, transform_indices = @transform_0, window_bounds = array<i64: 712, 128>}, {pipeline_mode = #tpu.pipeline_mode<synchronous>, transform_indices = @transform_1, window_bounds = array<i64: 72, 128>}, {pipeline_mode = #tpu.pipeline_mode<synchronous>, transform_indices = @transform_2, window_bounds = array<i64: 40, 128>}]} {
    %c0 = arith.constant 0 : index
    %c0_0 = arith.constant 0 : index
    %0 = vector.load %arg2[%c0, %c0_0] : memref<72x128xf32, #tpu.memory_space<vmem>>, vector<64x128xf32>
    %c0_1 = arith.constant 0 : index
    %c0_2 = arith.constant 0 : index
    %1 = vector.load %arg1[%c0_1, %c0_2] : memref<712x128xf32, #tpu.memory_space<vmem>>, vector<128x128xf32>
    %cst = arith.constant dense<0.000000e+00> : vector<64x128xf32>
    %2 = tpu.matmul %0, %1, %cst {dimension_numbers = #tpu.dot_dimension_numbers<[1], [0], [0], [1], [0, 0, 1, 1], [], []>} : vector<64x128xf32>, vector<128x128xf32>, vector<64x128xf32> -> vector<64x128xf32>
    %c128 = arith.constant 128 : index
    %c0_3 = arith.constant 0 : index
    %3 = vector.load %arg1[%c128, %c0_3] : memref<712x128xf32, #tpu.memory_space<vmem>>, vector<1x128xf32>
    %4 = vector.broadcast %3 : vector<1x128xf32> to vector<64x128xf32>
    %5 = arith.addf %2, %4 : vector<64x128xf32>
    %cst_4 = arith.constant 0.000000e+00 : f32
    %6 = vector.broadcast %cst_4 : f32 to vector<64x128xf32>
    %7 = arith.maximumf %5, %6 : vector<64x128xf32>
    %c136 = arith.constant 136 : index
    %c0_5 = arith.constant 0 : index
    %8 = vector.load %arg1[%c136, %c0_5] : memref<712x128xf32, #tpu.memory_space<vmem>>, vector<128x128xf32>
    %cst_6 = arith.constant dense<0.000000e+00> : vector<64x128xf32>
    %9 = tpu.matmul %7, %8, %cst_6 {dimension_numbers = #tpu.dot_dimension_numbers<[1], [0], [0], [1], [0, 0, 1, 1], [], []>} : vector<64x128xf32>, vector<128x128xf32>, vector<64x128xf32> -> vector<64x128xf32>
    %c264 = arith.constant 264 : index
    %c0_7 = arith.constant 0 : index
    %10 = vector.load %arg1[%c264, %c0_7] : memref<712x128xf32, #tpu.memory_space<vmem>>, vector<1x128xf32>
    %11 = vector.broadcast %10 : vector<1x128xf32> to vector<64x128xf32>
    %12 = arith.addf %9, %11 : vector<64x128xf32>
    %cst_8 = arith.constant 0.000000e+00 : f32
    %13 = vector.broadcast %cst_8 : f32 to vector<64x128xf32>
    %14 = arith.maximumf %12, %13 : vector<64x128xf32>
    %c272 = arith.constant 272 : index
    %c0_9 = arith.constant 0 : index
    %15 = vector.load %arg1[%c272, %c0_9] : memref<712x128xf32, #tpu.memory_space<vmem>>, vector<128x128xf32>
    %cst_10 = arith.constant dense<0.000000e+00> : vector<64x128xf32>
    %16 = tpu.matmul %14, %15, %cst_10 {dimension_numbers = #tpu.dot_dimension_numbers<[1], [0], [0], [1], [0, 0, 1, 1], [], []>} : vector<64x128xf32>, vector<128x128xf32>, vector<64x128xf32> -> vector<64x128xf32>
    %c496 = arith.constant 496 : index
    %c0_11 = arith.constant 0 : index
    %17 = vector.load %arg1[%c496, %c0_11] : memref<712x128xf32, #tpu.memory_space<vmem>>, vector<1x128xf32>
    %18 = vector.broadcast %17 : vector<1x128xf32> to vector<64x128xf32>
    %19 = arith.addf %16, %18 : vector<64x128xf32>
    %c400 = arith.constant 400 : index
    %c0_12 = arith.constant 0 : index
    %20 = vector.load %arg1[%c400, %c0_12] : memref<712x128xf32, #tpu.memory_space<vmem>>, vector<32x128xf32>
    %c464 = arith.constant 464 : index
    %c0_13 = arith.constant 0 : index
    %21 = vector.load %arg1[%c464, %c0_13] : memref<712x128xf32, #tpu.memory_space<vmem>>, vector<32x128xf32>
    %c432 = arith.constant 432 : index
    %c0_14 = arith.constant 0 : index
    %22 = vector.load %arg1[%c432, %c0_14] : memref<712x128xf32, #tpu.memory_space<vmem>>, vector<32x128xf32>
    %c504 = arith.constant 504 : index
    %c0_15 = arith.constant 0 : index
    %23 = vector.load %arg1[%c504, %c0_15] : memref<712x128xf32, #tpu.memory_space<vmem>>, vector<1x128xf32>
    %cst_16 = arith.constant 0.000000e+00 : f32
    %24 = vector.broadcast %cst_16 : f32 to vector<8x32xf32>
    %cst_17 = arith.constant 0.000000e+00 : f32
    %25 = vector.broadcast %cst_17 : f32 to vector<8x32xf32>
    %cst_18 = arith.constant 0.000000e+00 : f32
    %26 = vector.broadcast %cst_18 : f32 to vector<8x32xf32>
    %cst_19 = arith.constant 0.000000e+00 : f32
    %27 = vector.broadcast %cst_19 : f32 to vector<8x32xf32>
    %cst_20 = arith.constant dense<0.000000e+00> : vector<8x128xf32>
    %28 = tpu.matmul %24, %20, %cst_20 {dimension_numbers = #tpu.dot_dimension_numbers<[1], [0], [0], [1], [0, 0, 1, 1], [], []>, precision = #tpu.contract_precision<fp32>} : vector<8x32xf32>, vector<32x128xf32>, vector<8x128xf32> -> vector<8x128xf32>
    %cst_21 = arith.constant dense<0.000000e+00> : vector<8x128xf32>
    %29 = tpu.matmul %25, %21, %cst_21 {dimension_numbers = #tpu.dot_dimension_numbers<[1], [0], [0], [1], [0, 0, 1, 1], [], []>, precision = #tpu.contract_precision<fp32>} : vector<8x32xf32>, vector<32x128xf32>, vector<8x128xf32> -> vector<8x128xf32>
    %30 = vector.extract_strided_slice %19 {offsets = [0, 0], sizes = [8, 128], strides = [1, 1]} : vector<64x128xf32> to vector<8x128xf32>
    %31 = arith.addf %30, %28 : vector<8x128xf32>
    %32 = arith.negf %31 : vector<8x128xf32>
    %33 = math.exp %32 : vector<8x128xf32>
    %cst_22 = arith.constant 1.000000e+00 : f32
    %34 = vector.broadcast %cst_22 : f32 to vector<8x128xf32>
    %35 = arith.addf %34, %33 : vector<8x128xf32>
    %36 = arith.divf %34, %35 : vector<8x128xf32>
    %37 = math.tanh %31 : vector<8x128xf32>
    %38 = vector.extract_strided_slice %36 {offsets = [0, 0], sizes = [8, 32], strides = [1, 1]} : vector<8x128xf32> to vector<8x32xf32>
    %39 = vector.extract_strided_slice %36 {offsets = [0, 32], sizes = [8, 32], strides = [1, 1]} : vector<8x128xf32> to vector<8x32xf32>
    %40 = vector.extract_strided_slice %37 {offsets = [0, 64], sizes = [8, 32], strides = [1, 1]} : vector<8x128xf32> to vector<8x32xf32>
    %41 = vector.extract_strided_slice %36 {offsets = [0, 96], sizes = [8, 32], strides = [1, 1]} : vector<8x128xf32> to vector<8x32xf32>
    %42 = arith.mulf %39, %26 : vector<8x32xf32>
    %43 = arith.mulf %38, %40 : vector<8x32xf32>
    %44 = arith.addf %42, %43 : vector<8x32xf32>
    %45 = math.tanh %44 : vector<8x32xf32>
    %46 = arith.mulf %41, %45 : vector<8x32xf32>
    %cst_23 = arith.constant dense<0.000000e+00> : vector<8x128xf32>
    %47 = tpu.matmul %46, %22, %cst_23 {dimension_numbers = #tpu.dot_dimension_numbers<[1], [0], [0], [1], [0, 0, 1, 1], [], []>, precision = #tpu.contract_precision<fp32>} : vector<8x32xf32>, vector<32x128xf32>, vector<8x128xf32> -> vector<8x128xf32>
    %48 = arith.addf %47, %29 : vector<8x128xf32>
    %49 = vector.broadcast %23 : vector<1x128xf32> to vector<8x128xf32>
    %50 = arith.addf %48, %49 : vector<8x128xf32>
    %51 = arith.negf %50 : vector<8x128xf32>
    %52 = math.exp %51 : vector<8x128xf32>
    %cst_24 = arith.constant 1.000000e+00 : f32
    %53 = vector.broadcast %cst_24 : f32 to vector<8x128xf32>
    %54 = arith.addf %53, %52 : vector<8x128xf32>
    %55 = arith.divf %53, %54 : vector<8x128xf32>
    %56 = math.tanh %50 : vector<8x128xf32>
    %57 = vector.extract_strided_slice %55 {offsets = [0, 0], sizes = [8, 32], strides = [1, 1]} : vector<8x128xf32> to vector<8x32xf32>
    %58 = vector.extract_strided_slice %55 {offsets = [0, 32], sizes = [8, 32], strides = [1, 1]} : vector<8x128xf32> to vector<8x32xf32>
    %59 = vector.extract_strided_slice %56 {offsets = [0, 64], sizes = [8, 32], strides = [1, 1]} : vector<8x128xf32> to vector<8x32xf32>
    %60 = vector.extract_strided_slice %55 {offsets = [0, 96], sizes = [8, 32], strides = [1, 1]} : vector<8x128xf32> to vector<8x32xf32>
    %61 = arith.mulf %58, %27 : vector<8x32xf32>
    %62 = arith.mulf %57, %59 : vector<8x32xf32>
    %63 = arith.addf %61, %62 : vector<8x32xf32>
    %64 = math.tanh %63 : vector<8x32xf32>
    %65 = arith.mulf %60, %64 : vector<8x32xf32>
    %cst_25 = arith.constant dense<0.000000e+00> : vector<8x128xf32>
    %66 = tpu.matmul %46, %20, %cst_25 {dimension_numbers = #tpu.dot_dimension_numbers<[1], [0], [0], [1], [0, 0, 1, 1], [], []>, precision = #tpu.contract_precision<fp32>} : vector<8x32xf32>, vector<32x128xf32>, vector<8x128xf32> -> vector<8x128xf32>
    %cst_26 = arith.constant dense<0.000000e+00> : vector<8x128xf32>
    %67 = tpu.matmul %65, %21, %cst_26 {dimension_numbers = #tpu.dot_dimension_numbers<[1], [0], [0], [1], [0, 0, 1, 1], [], []>, precision = #tpu.contract_precision<fp32>} : vector<8x32xf32>, vector<32x128xf32>, vector<8x128xf32> -> vector<8x128xf32>
    %68 = vector.extract_strided_slice %19 {offsets = [8, 0], sizes = [8, 128], strides = [1, 1]} : vector<64x128xf32> to vector<8x128xf32>
    %69 = arith.addf %68, %66 : vector<8x128xf32>
    %70 = arith.negf %69 : vector<8x128xf32>
    %71 = math.exp %70 : vector<8x128xf32>
    %cst_27 = arith.constant 1.000000e+00 : f32
    %72 = vector.broadcast %cst_27 : f32 to vector<8x128xf32>
    %73 = arith.addf %72, %71 : vector<8x128xf32>
    %74 = arith.divf %72, %73 : vector<8x128xf32>
    %75 = math.tanh %69 : vector<8x128xf32>
    %76 = vector.extract_strided_slice %74 {offsets = [0, 0], sizes = [8, 32], strides = [1, 1]} : vector<8x128xf32> to vector<8x32xf32>
    %77 = vector.extract_strided_slice %74 {offsets = [0, 32], sizes = [8, 32], strides = [1, 1]} : vector<8x128xf32> to vector<8x32xf32>
    %78 = vector.extract_strided_slice %75 {offsets = [0, 64], sizes = [8, 32], strides = [1, 1]} : vector<8x128xf32> to vector<8x32xf32>
    %79 = vector.extract_strided_slice %74 {offsets = [0, 96], sizes = [8, 32], strides = [1, 1]} : vector<8x128xf32> to vector<8x32xf32>
    %80 = arith.mulf %77, %44 : vector<8x32xf32>
    %81 = arith.mulf %76, %78 : vector<8x32xf32>
    %82 = arith.addf %80, %81 : vector<8x32xf32>
    %83 = math.tanh %82 : vector<8x32xf32>
    %84 = arith.mulf %79, %83 : vector<8x32xf32>
    %cst_28 = arith.constant dense<0.000000e+00> : vector<8x128xf32>
    %85 = tpu.matmul %84, %22, %cst_28 {dimension_numbers = #tpu.dot_dimension_numbers<[1], [0], [0], [1], [0, 0, 1, 1], [], []>, precision = #tpu.contract_precision<fp32>} : vector<8x32xf32>, vector<32x128xf32>, vector<8x128xf32> -> vector<8x128xf32>
    %86 = arith.addf %85, %67 : vector<8x128xf32>
    %87 = vector.broadcast %23 : vector<1x128xf32> to vector<8x128xf32>
    %88 = arith.addf %86, %87 : vector<8x128xf32>
    %89 = arith.negf %88 : vector<8x128xf32>
    %90 = math.exp %89 : vector<8x128xf32>
    %cst_29 = arith.constant 1.000000e+00 : f32
    %91 = vector.broadcast %cst_29 : f32 to vector<8x128xf32>
    %92 = arith.addf %91, %90 : vector<8x128xf32>
    %93 = arith.divf %91, %92 : vector<8x128xf32>
    %94 = math.tanh %88 : vector<8x128xf32>
    %95 = vector.extract_strided_slice %93 {offsets = [0, 0], sizes = [8, 32], strides = [1, 1]} : vector<8x128xf32> to vector<8x32xf32>
    %96 = vector.extract_strided_slice %93 {offsets = [0, 32], sizes = [8, 32], strides = [1, 1]} : vector<8x128xf32> to vector<8x32xf32>
    %97 = vector.extract_strided_slice %94 {offsets = [0, 64], sizes = [8, 32], strides = [1, 1]} : vector<8x128xf32> to vector<8x32xf32>
    %98 = vector.extract_strided_slice %93 {offsets = [0, 96], sizes = [8, 32], strides = [1, 1]} : vector<8x128xf32> to vector<8x32xf32>
    %99 = arith.mulf %96, %63 : vector<8x32xf32>
    %100 = arith.mulf %95, %97 : vector<8x32xf32>
    %101 = arith.addf %99, %100 : vector<8x32xf32>
    %102 = math.tanh %101 : vector<8x32xf32>
    %103 = arith.mulf %98, %102 : vector<8x32xf32>
    %cst_30 = arith.constant dense<0.000000e+00> : vector<8x128xf32>
    %104 = tpu.matmul %84, %20, %cst_30 {dimension_numbers = #tpu.dot_dimension_numbers<[1], [0], [0], [1], [0, 0, 1, 1], [], []>, precision = #tpu.contract_precision<fp32>} : vector<8x32xf32>, vector<32x128xf32>, vector<8x128xf32> -> vector<8x128xf32>
    %cst_31 = arith.constant dense<0.000000e+00> : vector<8x128xf32>
    %105 = tpu.matmul %103, %21, %cst_31 {dimension_numbers = #tpu.dot_dimension_numbers<[1], [0], [0], [1], [0, 0, 1, 1], [], []>, precision = #tpu.contract_precision<fp32>} : vector<8x32xf32>, vector<32x128xf32>, vector<8x128xf32> -> vector<8x128xf32>
    %106 = vector.extract_strided_slice %19 {offsets = [16, 0], sizes = [8, 128], strides = [1, 1]} : vector<64x128xf32> to vector<8x128xf32>
    %107 = arith.addf %106, %104 : vector<8x128xf32>
    %108 = arith.negf %107 : vector<8x128xf32>
    %109 = math.exp %108 : vector<8x128xf32>
    %cst_32 = arith.constant 1.000000e+00 : f32
    %110 = vector.broadcast %cst_32 : f32 to vector<8x128xf32>
    %111 = arith.addf %110, %109 : vector<8x128xf32>
    %112 = arith.divf %110, %111 : vector<8x128xf32>
    %113 = math.tanh %107 : vector<8x128xf32>
    %114 = vector.extract_strided_slice %112 {offsets = [0, 0], sizes = [8, 32], strides = [1, 1]} : vector<8x128xf32> to vector<8x32xf32>
    %115 = vector.extract_strided_slice %112 {offsets = [0, 32], sizes = [8, 32], strides = [1, 1]} : vector<8x128xf32> to vector<8x32xf32>
    %116 = vector.extract_strided_slice %113 {offsets = [0, 64], sizes = [8, 32], strides = [1, 1]} : vector<8x128xf32> to vector<8x32xf32>
    %117 = vector.extract_strided_slice %112 {offsets = [0, 96], sizes = [8, 32], strides = [1, 1]} : vector<8x128xf32> to vector<8x32xf32>
    %118 = arith.mulf %115, %82 : vector<8x32xf32>
    %119 = arith.mulf %114, %116 : vector<8x32xf32>
    %120 = arith.addf %118, %119 : vector<8x32xf32>
    %121 = math.tanh %120 : vector<8x32xf32>
    %122 = arith.mulf %117, %121 : vector<8x32xf32>
    %cst_33 = arith.constant dense<0.000000e+00> : vector<8x128xf32>
    %123 = tpu.matmul %122, %22, %cst_33 {dimension_numbers = #tpu.dot_dimension_numbers<[1], [0], [0], [1], [0, 0, 1, 1], [], []>, precision = #tpu.contract_precision<fp32>} : vector<8x32xf32>, vector<32x128xf32>, vector<8x128xf32> -> vector<8x128xf32>
    %124 = arith.addf %123, %105 : vector<8x128xf32>
    %125 = vector.broadcast %23 : vector<1x128xf32> to vector<8x128xf32>
    %126 = arith.addf %124, %125 : vector<8x128xf32>
    %127 = arith.negf %126 : vector<8x128xf32>
    %128 = math.exp %127 : vector<8x128xf32>
    %cst_34 = arith.constant 1.000000e+00 : f32
    %129 = vector.broadcast %cst_34 : f32 to vector<8x128xf32>
    %130 = arith.addf %129, %128 : vector<8x128xf32>
    %131 = arith.divf %129, %130 : vector<8x128xf32>
    %132 = math.tanh %126 : vector<8x128xf32>
    %133 = vector.extract_strided_slice %131 {offsets = [0, 0], sizes = [8, 32], strides = [1, 1]} : vector<8x128xf32> to vector<8x32xf32>
    %134 = vector.extract_strided_slice %131 {offsets = [0, 32], sizes = [8, 32], strides = [1, 1]} : vector<8x128xf32> to vector<8x32xf32>
    %135 = vector.extract_strided_slice %132 {offsets = [0, 64], sizes = [8, 32], strides = [1, 1]} : vector<8x128xf32> to vector<8x32xf32>
    %136 = vector.extract_strided_slice %131 {offsets = [0, 96], sizes = [8, 32], strides = [1, 1]} : vector<8x128xf32> to vector<8x32xf32>
    %137 = arith.mulf %134, %101 : vector<8x32xf32>
    %138 = arith.mulf %133, %135 : vector<8x32xf32>
    %139 = arith.addf %137, %138 : vector<8x32xf32>
    %140 = math.tanh %139 : vector<8x32xf32>
    %141 = arith.mulf %136, %140 : vector<8x32xf32>
    %cst_35 = arith.constant dense<0.000000e+00> : vector<8x128xf32>
    %142 = tpu.matmul %122, %20, %cst_35 {dimension_numbers = #tpu.dot_dimension_numbers<[1], [0], [0], [1], [0, 0, 1, 1], [], []>, precision = #tpu.contract_precision<fp32>} : vector<8x32xf32>, vector<32x128xf32>, vector<8x128xf32> -> vector<8x128xf32>
    %cst_36 = arith.constant dense<0.000000e+00> : vector<8x128xf32>
    %143 = tpu.matmul %141, %21, %cst_36 {dimension_numbers = #tpu.dot_dimension_numbers<[1], [0], [0], [1], [0, 0, 1, 1], [], []>, precision = #tpu.contract_precision<fp32>} : vector<8x32xf32>, vector<32x128xf32>, vector<8x128xf32> -> vector<8x128xf32>
    %144 = vector.extract_strided_slice %19 {offsets = [24, 0], sizes = [8, 128], strides = [1, 1]} : vector<64x128xf32> to vector<8x128xf32>
    %145 = arith.addf %144, %142 : vector<8x128xf32>
    %146 = arith.negf %145 : vector<8x128xf32>
    %147 = math.exp %146 : vector<8x128xf32>
    %cst_37 = arith.constant 1.000000e+00 : f32
    %148 = vector.broadcast %cst_37 : f32 to vector<8x128xf32>
    %149 = arith.addf %148, %147 : vector<8x128xf32>
    %150 = arith.divf %148, %149 : vector<8x128xf32>
    %151 = math.tanh %145 : vector<8x128xf32>
    %152 = vector.extract_strided_slice %150 {offsets = [0, 0], sizes = [8, 32], strides = [1, 1]} : vector<8x128xf32> to vector<8x32xf32>
    %153 = vector.extract_strided_slice %150 {offsets = [0, 32], sizes = [8, 32], strides = [1, 1]} : vector<8x128xf32> to vector<8x32xf32>
    %154 = vector.extract_strided_slice %151 {offsets = [0, 64], sizes = [8, 32], strides = [1, 1]} : vector<8x128xf32> to vector<8x32xf32>
    %155 = vector.extract_strided_slice %150 {offsets = [0, 96], sizes = [8, 32], strides = [1, 1]} : vector<8x128xf32> to vector<8x32xf32>
    %156 = arith.mulf %153, %120 : vector<8x32xf32>
    %157 = arith.mulf %152, %154 : vector<8x32xf32>
    %158 = arith.addf %156, %157 : vector<8x32xf32>
    %159 = math.tanh %158 : vector<8x32xf32>
    %160 = arith.mulf %155, %159 : vector<8x32xf32>
    %cst_38 = arith.constant dense<0.000000e+00> : vector<8x128xf32>
    %161 = tpu.matmul %160, %22, %cst_38 {dimension_numbers = #tpu.dot_dimension_numbers<[1], [0], [0], [1], [0, 0, 1, 1], [], []>, precision = #tpu.contract_precision<fp32>} : vector<8x32xf32>, vector<32x128xf32>, vector<8x128xf32> -> vector<8x128xf32>
    %162 = arith.addf %161, %143 : vector<8x128xf32>
    %163 = vector.broadcast %23 : vector<1x128xf32> to vector<8x128xf32>
    %164 = arith.addf %162, %163 : vector<8x128xf32>
    %165 = arith.negf %164 : vector<8x128xf32>
    %166 = math.exp %165 : vector<8x128xf32>
    %cst_39 = arith.constant 1.000000e+00 : f32
    %167 = vector.broadcast %cst_39 : f32 to vector<8x128xf32>
    %168 = arith.addf %167, %166 : vector<8x128xf32>
    %169 = arith.divf %167, %168 : vector<8x128xf32>
    %170 = math.tanh %164 : vector<8x128xf32>
    %171 = vector.extract_strided_slice %169 {offsets = [0, 0], sizes = [8, 32], strides = [1, 1]} : vector<8x128xf32> to vector<8x32xf32>
    %172 = vector.extract_strided_slice %169 {offsets = [0, 32], sizes = [8, 32], strides = [1, 1]} : vector<8x128xf32> to vector<8x32xf32>
    %173 = vector.extract_strided_slice %170 {offsets = [0, 64], sizes = [8, 32], strides = [1, 1]} : vector<8x128xf32> to vector<8x32xf32>
    %174 = vector.extract_strided_slice %169 {offsets = [0, 96], sizes = [8, 32], strides = [1, 1]} : vector<8x128xf32> to vector<8x32xf32>
    %175 = arith.mulf %172, %139 : vector<8x32xf32>
    %176 = arith.mulf %171, %173 : vector<8x32xf32>
    %177 = arith.addf %175, %176 : vector<8x32xf32>
    %178 = math.tanh %177 : vector<8x32xf32>
    %179 = arith.mulf %174, %178 : vector<8x32xf32>
    %cst_40 = arith.constant dense<0.000000e+00> : vector<8x128xf32>
    %180 = tpu.matmul %160, %20, %cst_40 {dimension_numbers = #tpu.dot_dimension_numbers<[1], [0], [0], [1], [0, 0, 1, 1], [], []>, precision = #tpu.contract_precision<fp32>} : vector<8x32xf32>, vector<32x128xf32>, vector<8x128xf32> -> vector<8x128xf32>
    %cst_41 = arith.constant dense<0.000000e+00> : vector<8x128xf32>
    %181 = tpu.matmul %179, %21, %cst_41 {dimension_numbers = #tpu.dot_dimension_numbers<[1], [0], [0], [1], [0, 0, 1, 1], [], []>, precision = #tpu.contract_precision<fp32>} : vector<8x32xf32>, vector<32x128xf32>, vector<8x128xf32> -> vector<8x128xf32>
    %182 = vector.extract_strided_slice %19 {offsets = [32, 0], sizes = [8, 128], strides = [1, 1]} : vector<64x128xf32> to vector<8x128xf32>
    %183 = arith.addf %182, %180 : vector<8x128xf32>
    %184 = arith.negf %183 : vector<8x128xf32>
    %185 = math.exp %184 : vector<8x128xf32>
    %cst_42 = arith.constant 1.000000e+00 : f32
    %186 = vector.broadcast %cst_42 : f32 to vector<8x128xf32>
    %187 = arith.addf %186, %185 : vector<8x128xf32>
    %188 = arith.divf %186, %187 : vector<8x128xf32>
    %189 = math.tanh %183 : vector<8x128xf32>
    %190 = vector.extract_strided_slice %188 {offsets = [0, 0], sizes = [8, 32], strides = [1, 1]} : vector<8x128xf32> to vector<8x32xf32>
    %191 = vector.extract_strided_slice %188 {offsets = [0, 32], sizes = [8, 32], strides = [1, 1]} : vector<8x128xf32> to vector<8x32xf32>
    %192 = vector.extract_strided_slice %189 {offsets = [0, 64], sizes = [8, 32], strides = [1, 1]} : vector<8x128xf32> to vector<8x32xf32>
    %193 = vector.extract_strided_slice %188 {offsets = [0, 96], sizes = [8, 32], strides = [1, 1]} : vector<8x128xf32> to vector<8x32xf32>
    %194 = arith.mulf %191, %158 : vector<8x32xf32>
    %195 = arith.mulf %190, %192 : vector<8x32xf32>
    %196 = arith.addf %194, %195 : vector<8x32xf32>
    %197 = math.tanh %196 : vector<8x32xf32>
    %198 = arith.mulf %193, %197 : vector<8x32xf32>
    %cst_43 = arith.constant dense<0.000000e+00> : vector<8x128xf32>
    %199 = tpu.matmul %198, %22, %cst_43 {dimension_numbers = #tpu.dot_dimension_numbers<[1], [0], [0], [1], [0, 0, 1, 1], [], []>, precision = #tpu.contract_precision<fp32>} : vector<8x32xf32>, vector<32x128xf32>, vector<8x128xf32> -> vector<8x128xf32>
    %200 = arith.addf %199, %181 : vector<8x128xf32>
    %201 = vector.broadcast %23 : vector<1x128xf32> to vector<8x128xf32>
    %202 = arith.addf %200, %201 : vector<8x128xf32>
    %203 = arith.negf %202 : vector<8x128xf32>
    %204 = math.exp %203 : vector<8x128xf32>
    %cst_44 = arith.constant 1.000000e+00 : f32
    %205 = vector.broadcast %cst_44 : f32 to vector<8x128xf32>
    %206 = arith.addf %205, %204 : vector<8x128xf32>
    %207 = arith.divf %205, %206 : vector<8x128xf32>
    %208 = math.tanh %202 : vector<8x128xf32>
    %209 = vector.extract_strided_slice %207 {offsets = [0, 0], sizes = [8, 32], strides = [1, 1]} : vector<8x128xf32> to vector<8x32xf32>
    %210 = vector.extract_strided_slice %207 {offsets = [0, 32], sizes = [8, 32], strides = [1, 1]} : vector<8x128xf32> to vector<8x32xf32>
    %211 = vector.extract_strided_slice %208 {offsets = [0, 64], sizes = [8, 32], strides = [1, 1]} : vector<8x128xf32> to vector<8x32xf32>
    %212 = vector.extract_strided_slice %207 {offsets = [0, 96], sizes = [8, 32], strides = [1, 1]} : vector<8x128xf32> to vector<8x32xf32>
    %213 = arith.mulf %210, %177 : vector<8x32xf32>
    %214 = arith.mulf %209, %211 : vector<8x32xf32>
    %215 = arith.addf %213, %214 : vector<8x32xf32>
    %216 = math.tanh %215 : vector<8x32xf32>
    %217 = arith.mulf %212, %216 : vector<8x32xf32>
    %cst_45 = arith.constant dense<0.000000e+00> : vector<8x128xf32>
    %218 = tpu.matmul %198, %20, %cst_45 {dimension_numbers = #tpu.dot_dimension_numbers<[1], [0], [0], [1], [0, 0, 1, 1], [], []>, precision = #tpu.contract_precision<fp32>} : vector<8x32xf32>, vector<32x128xf32>, vector<8x128xf32> -> vector<8x128xf32>
    %cst_46 = arith.constant dense<0.000000e+00> : vector<8x128xf32>
    %219 = tpu.matmul %217, %21, %cst_46 {dimension_numbers = #tpu.dot_dimension_numbers<[1], [0], [0], [1], [0, 0, 1, 1], [], []>, precision = #tpu.contract_precision<fp32>} : vector<8x32xf32>, vector<32x128xf32>, vector<8x128xf32> -> vector<8x128xf32>
    %220 = vector.extract_strided_slice %19 {offsets = [40, 0], sizes = [8, 128], strides = [1, 1]} : vector<64x128xf32> to vector<8x128xf32>
    %221 = arith.addf %220, %218 : vector<8x128xf32>
    %222 = arith.negf %221 : vector<8x128xf32>
    %223 = math.exp %222 : vector<8x128xf32>
    %cst_47 = arith.constant 1.000000e+00 : f32
    %224 = vector.broadcast %cst_47 : f32 to vector<8x128xf32>
    %225 = arith.addf %224, %223 : vector<8x128xf32>
    %226 = arith.divf %224, %225 : vector<8x128xf32>
    %227 = math.tanh %221 : vector<8x128xf32>
    %228 = vector.extract_strided_slice %226 {offsets = [0, 0], sizes = [8, 32], strides = [1, 1]} : vector<8x128xf32> to vector<8x32xf32>
    %229 = vector.extract_strided_slice %226 {offsets = [0, 32], sizes = [8, 32], strides = [1, 1]} : vector<8x128xf32> to vector<8x32xf32>
    %230 = vector.extract_strided_slice %227 {offsets = [0, 64], sizes = [8, 32], strides = [1, 1]} : vector<8x128xf32> to vector<8x32xf32>
    %231 = vector.extract_strided_slice %226 {offsets = [0, 96], sizes = [8, 32], strides = [1, 1]} : vector<8x128xf32> to vector<8x32xf32>
    %232 = arith.mulf %229, %196 : vector<8x32xf32>
    %233 = arith.mulf %228, %230 : vector<8x32xf32>
    %234 = arith.addf %232, %233 : vector<8x32xf32>
    %235 = math.tanh %234 : vector<8x32xf32>
    %236 = arith.mulf %231, %235 : vector<8x32xf32>
    %cst_48 = arith.constant dense<0.000000e+00> : vector<8x128xf32>
    %237 = tpu.matmul %236, %22, %cst_48 {dimension_numbers = #tpu.dot_dimension_numbers<[1], [0], [0], [1], [0, 0, 1, 1], [], []>, precision = #tpu.contract_precision<fp32>} : vector<8x32xf32>, vector<32x128xf32>, vector<8x128xf32> -> vector<8x128xf32>
    %238 = arith.addf %237, %219 : vector<8x128xf32>
    %239 = vector.broadcast %23 : vector<1x128xf32> to vector<8x128xf32>
    %240 = arith.addf %238, %239 : vector<8x128xf32>
    %241 = arith.negf %240 : vector<8x128xf32>
    %242 = math.exp %241 : vector<8x128xf32>
    %cst_49 = arith.constant 1.000000e+00 : f32
    %243 = vector.broadcast %cst_49 : f32 to vector<8x128xf32>
    %244 = arith.addf %243, %242 : vector<8x128xf32>
    %245 = arith.divf %243, %244 : vector<8x128xf32>
    %246 = math.tanh %240 : vector<8x128xf32>
    %247 = vector.extract_strided_slice %245 {offsets = [0, 0], sizes = [8, 32], strides = [1, 1]} : vector<8x128xf32> to vector<8x32xf32>
    %248 = vector.extract_strided_slice %245 {offsets = [0, 32], sizes = [8, 32], strides = [1, 1]} : vector<8x128xf32> to vector<8x32xf32>
    %249 = vector.extract_strided_slice %246 {offsets = [0, 64], sizes = [8, 32], strides = [1, 1]} : vector<8x128xf32> to vector<8x32xf32>
    %250 = vector.extract_strided_slice %245 {offsets = [0, 96], sizes = [8, 32], strides = [1, 1]} : vector<8x128xf32> to vector<8x32xf32>
    %251 = arith.mulf %248, %215 : vector<8x32xf32>
    %252 = arith.mulf %247, %249 : vector<8x32xf32>
    %253 = arith.addf %251, %252 : vector<8x32xf32>
    %254 = math.tanh %253 : vector<8x32xf32>
    %255 = arith.mulf %250, %254 : vector<8x32xf32>
    %cst_50 = arith.constant dense<0.000000e+00> : vector<8x128xf32>
    %256 = tpu.matmul %236, %20, %cst_50 {dimension_numbers = #tpu.dot_dimension_numbers<[1], [0], [0], [1], [0, 0, 1, 1], [], []>, precision = #tpu.contract_precision<fp32>} : vector<8x32xf32>, vector<32x128xf32>, vector<8x128xf32> -> vector<8x128xf32>
    %cst_51 = arith.constant dense<0.000000e+00> : vector<8x128xf32>
    %257 = tpu.matmul %255, %21, %cst_51 {dimension_numbers = #tpu.dot_dimension_numbers<[1], [0], [0], [1], [0, 0, 1, 1], [], []>, precision = #tpu.contract_precision<fp32>} : vector<8x32xf32>, vector<32x128xf32>, vector<8x128xf32> -> vector<8x128xf32>
    %258 = vector.extract_strided_slice %19 {offsets = [48, 0], sizes = [8, 128], strides = [1, 1]} : vector<64x128xf32> to vector<8x128xf32>
    %259 = arith.addf %258, %256 : vector<8x128xf32>
    %260 = arith.negf %259 : vector<8x128xf32>
    %261 = math.exp %260 : vector<8x128xf32>
    %cst_52 = arith.constant 1.000000e+00 : f32
    %262 = vector.broadcast %cst_52 : f32 to vector<8x128xf32>
    %263 = arith.addf %262, %261 : vector<8x128xf32>
    %264 = arith.divf %262, %263 : vector<8x128xf32>
    %265 = math.tanh %259 : vector<8x128xf32>
    %266 = vector.extract_strided_slice %264 {offsets = [0, 0], sizes = [8, 32], strides = [1, 1]} : vector<8x128xf32> to vector<8x32xf32>
    %267 = vector.extract_strided_slice %264 {offsets = [0, 32], sizes = [8, 32], strides = [1, 1]} : vector<8x128xf32> to vector<8x32xf32>
    %268 = vector.extract_strided_slice %265 {offsets = [0, 64], sizes = [8, 32], strides = [1, 1]} : vector<8x128xf32> to vector<8x32xf32>
    %269 = vector.extract_strided_slice %264 {offsets = [0, 96], sizes = [8, 32], strides = [1, 1]} : vector<8x128xf32> to vector<8x32xf32>
    %270 = arith.mulf %267, %234 : vector<8x32xf32>
    %271 = arith.mulf %266, %268 : vector<8x32xf32>
    %272 = arith.addf %270, %271 : vector<8x32xf32>
    %273 = math.tanh %272 : vector<8x32xf32>
    %274 = arith.mulf %269, %273 : vector<8x32xf32>
    %cst_53 = arith.constant dense<0.000000e+00> : vector<8x128xf32>
    %275 = tpu.matmul %274, %22, %cst_53 {dimension_numbers = #tpu.dot_dimension_numbers<[1], [0], [0], [1], [0, 0, 1, 1], [], []>, precision = #tpu.contract_precision<fp32>} : vector<8x32xf32>, vector<32x128xf32>, vector<8x128xf32> -> vector<8x128xf32>
    %276 = arith.addf %275, %257 : vector<8x128xf32>
    %277 = vector.broadcast %23 : vector<1x128xf32> to vector<8x128xf32>
    %278 = arith.addf %276, %277 : vector<8x128xf32>
    %279 = arith.negf %278 : vector<8x128xf32>
    %280 = math.exp %279 : vector<8x128xf32>
    %cst_54 = arith.constant 1.000000e+00 : f32
    %281 = vector.broadcast %cst_54 : f32 to vector<8x128xf32>
    %282 = arith.addf %281, %280 : vector<8x128xf32>
    %283 = arith.divf %281, %282 : vector<8x128xf32>
    %284 = math.tanh %278 : vector<8x128xf32>
    %285 = vector.extract_strided_slice %283 {offsets = [0, 0], sizes = [8, 32], strides = [1, 1]} : vector<8x128xf32> to vector<8x32xf32>
    %286 = vector.extract_strided_slice %283 {offsets = [0, 32], sizes = [8, 32], strides = [1, 1]} : vector<8x128xf32> to vector<8x32xf32>
    %287 = vector.extract_strided_slice %284 {offsets = [0, 64], sizes = [8, 32], strides = [1, 1]} : vector<8x128xf32> to vector<8x32xf32>
    %288 = vector.extract_strided_slice %283 {offsets = [0, 96], sizes = [8, 32], strides = [1, 1]} : vector<8x128xf32> to vector<8x32xf32>
    %289 = arith.mulf %286, %253 : vector<8x32xf32>
    %290 = arith.mulf %285, %287 : vector<8x32xf32>
    %291 = arith.addf %289, %290 : vector<8x32xf32>
    %292 = math.tanh %291 : vector<8x32xf32>
    %293 = arith.mulf %288, %292 : vector<8x32xf32>
    %cst_55 = arith.constant dense<0.000000e+00> : vector<8x128xf32>
    %294 = tpu.matmul %274, %20, %cst_55 {dimension_numbers = #tpu.dot_dimension_numbers<[1], [0], [0], [1], [0, 0, 1, 1], [], []>, precision = #tpu.contract_precision<fp32>} : vector<8x32xf32>, vector<32x128xf32>, vector<8x128xf32> -> vector<8x128xf32>
    %cst_56 = arith.constant dense<0.000000e+00> : vector<8x128xf32>
    %295 = tpu.matmul %293, %21, %cst_56 {dimension_numbers = #tpu.dot_dimension_numbers<[1], [0], [0], [1], [0, 0, 1, 1], [], []>, precision = #tpu.contract_precision<fp32>} : vector<8x32xf32>, vector<32x128xf32>, vector<8x128xf32> -> vector<8x128xf32>
    %296 = vector.extract_strided_slice %19 {offsets = [56, 0], sizes = [8, 128], strides = [1, 1]} : vector<64x128xf32> to vector<8x128xf32>
    %297 = arith.addf %296, %294 : vector<8x128xf32>
    %298 = arith.negf %297 : vector<8x128xf32>
    %299 = math.exp %298 : vector<8x128xf32>
    %cst_57 = arith.constant 1.000000e+00 : f32
    %300 = vector.broadcast %cst_57 : f32 to vector<8x128xf32>
    %301 = arith.addf %300, %299 : vector<8x128xf32>
    %302 = arith.divf %300, %301 : vector<8x128xf32>
    %303 = math.tanh %297 : vector<8x128xf32>
    %304 = vector.extract_strided_slice %302 {offsets = [0, 0], sizes = [8, 32], strides = [1, 1]} : vector<8x128xf32> to vector<8x32xf32>
    %305 = vector.extract_strided_slice %302 {offsets = [0, 32], sizes = [8, 32], strides = [1, 1]} : vector<8x128xf32> to vector<8x32xf32>
    %306 = vector.extract_strided_slice %303 {offsets = [0, 64], sizes = [8, 32], strides = [1, 1]} : vector<8x128xf32> to vector<8x32xf32>
    %307 = vector.extract_strided_slice %302 {offsets = [0, 96], sizes = [8, 32], strides = [1, 1]} : vector<8x128xf32> to vector<8x32xf32>
    %308 = arith.mulf %305, %272 : vector<8x32xf32>
    %309 = arith.mulf %304, %306 : vector<8x32xf32>
    %310 = arith.addf %308, %309 : vector<8x32xf32>
    %311 = math.tanh %310 : vector<8x32xf32>
    %312 = arith.mulf %307, %311 : vector<8x32xf32>
    %cst_58 = arith.constant dense<0.000000e+00> : vector<8x128xf32>
    %313 = tpu.matmul %312, %22, %cst_58 {dimension_numbers = #tpu.dot_dimension_numbers<[1], [0], [0], [1], [0, 0, 1, 1], [], []>, precision = #tpu.contract_precision<fp32>} : vector<8x32xf32>, vector<32x128xf32>, vector<8x128xf32> -> vector<8x128xf32>
    %314 = arith.addf %313, %295 : vector<8x128xf32>
    %315 = vector.broadcast %23 : vector<1x128xf32> to vector<8x128xf32>
    %316 = arith.addf %314, %315 : vector<8x128xf32>
    %317 = arith.negf %316 : vector<8x128xf32>
    %318 = math.exp %317 : vector<8x128xf32>
    %cst_59 = arith.constant 1.000000e+00 : f32
    %319 = vector.broadcast %cst_59 : f32 to vector<8x128xf32>
    %320 = arith.addf %319, %318 : vector<8x128xf32>
    %321 = arith.divf %319, %320 : vector<8x128xf32>
    %322 = math.tanh %316 : vector<8x128xf32>
    %323 = vector.extract_strided_slice %321 {offsets = [0, 0], sizes = [8, 32], strides = [1, 1]} : vector<8x128xf32> to vector<8x32xf32>
    %324 = vector.extract_strided_slice %321 {offsets = [0, 32], sizes = [8, 32], strides = [1, 1]} : vector<8x128xf32> to vector<8x32xf32>
    %325 = vector.extract_strided_slice %322 {offsets = [0, 64], sizes = [8, 32], strides = [1, 1]} : vector<8x128xf32> to vector<8x32xf32>
    %326 = vector.extract_strided_slice %321 {offsets = [0, 96], sizes = [8, 32], strides = [1, 1]} : vector<8x128xf32> to vector<8x32xf32>
    %327 = arith.mulf %324, %291 : vector<8x32xf32>
    %328 = arith.mulf %323, %325 : vector<8x32xf32>
    %329 = arith.addf %327, %328 : vector<8x32xf32>
    %330 = math.tanh %329 : vector<8x32xf32>
    %331 = arith.mulf %326, %330 : vector<8x32xf32>
    %c512 = arith.constant 512 : index
    %c0_60 = arith.constant 0 : index
    %332 = vector.load %arg1[%c512, %c0_60] : memref<712x128xf32, #tpu.memory_space<vmem>>, vector<1x32xf32>
    %c520 = arith.constant 520 : index
    %c0_61 = arith.constant 0 : index
    %333 = vector.load %arg1[%c520, %c0_61] : memref<712x128xf32, #tpu.memory_space<vmem>>, vector<1x32xf32>
    %cst_62 = arith.constant dense<0.000000e+00> : vector<8xf32>
    %334 = vector.multi_reduction <add>, %331, %cst_62 [1] : vector<8x32xf32> to vector<8xf32>
    %335 = vector.shape_cast %334 : vector<8xf32> to vector<8x1xf32>
    %cst_63 = arith.constant 3.200000e+01 : f32
    %336 = vector.broadcast %cst_63 : f32 to vector<8x1xf32>
    %337 = arith.divf %335, %336 : vector<8x1xf32>
    %338 = vector.broadcast %337 : vector<8x1xf32> to vector<8x32xf32>
    %339 = arith.subf %331, %338 : vector<8x32xf32>
    %340 = arith.mulf %339, %339 : vector<8x32xf32>
    %cst_64 = arith.constant dense<0.000000e+00> : vector<8xf32>
    %341 = vector.multi_reduction <add>, %340, %cst_64 [1] : vector<8x32xf32> to vector<8xf32>
    %342 = vector.shape_cast %341 : vector<8xf32> to vector<8x1xf32>
    %cst_65 = arith.constant 3.200000e+01 : f32
    %343 = vector.broadcast %cst_65 : f32 to vector<8x1xf32>
    %344 = arith.divf %342, %343 : vector<8x1xf32>
    %345 = vector.broadcast %337 : vector<8x1xf32> to vector<8x32xf32>
    %346 = arith.subf %331, %345 : vector<8x32xf32>
    %cst_66 = arith.constant 9.99999974E-6 : f32
    %347 = vector.broadcast %cst_66 : f32 to vector<8x1xf32>
    %348 = arith.addf %344, %347 : vector<8x1xf32>
    %349 = math.rsqrt %348 : vector<8x1xf32>
    %350 = vector.broadcast %349 : vector<8x1xf32> to vector<8x32xf32>
    %351 = arith.mulf %346, %350 : vector<8x32xf32>
    %352 = vector.broadcast %332 : vector<1x32xf32> to vector<8x32xf32>
    %353 = arith.mulf %351, %352 : vector<8x32xf32>
    %354 = vector.broadcast %333 : vector<1x32xf32> to vector<8x32xf32>
    %355 = arith.addf %353, %354 : vector<8x32xf32>
    %c528 = arith.constant 528 : index
    %c0_67 = arith.constant 0 : index
    %356 = vector.load %arg1[%c528, %c0_67] : memref<712x128xf32, #tpu.memory_space<vmem>>, vector<32x128xf32>
    %cst_68 = arith.constant dense<0.000000e+00> : vector<8x128xf32>
    %357 = tpu.matmul %355, %356, %cst_68 {dimension_numbers = #tpu.dot_dimension_numbers<[1], [0], [0], [1], [0, 0, 1, 1], [], []>} : vector<8x32xf32>, vector<32x128xf32>, vector<8x128xf32> -> vector<8x128xf32>
    %c560 = arith.constant 560 : index
    %c0_69 = arith.constant 0 : index
    %358 = vector.load %arg1[%c560, %c0_69] : memref<712x128xf32, #tpu.memory_space<vmem>>, vector<1x128xf32>
    %359 = vector.broadcast %358 : vector<1x128xf32> to vector<8x128xf32>
    %360 = arith.addf %357, %359 : vector<8x128xf32>
    %361 = math.tanh %360 : vector<8x128xf32>
    %c568 = arith.constant 568 : index
    %c0_70 = arith.constant 0 : index
    %362 = vector.load %arg1[%c568, %c0_70] : memref<712x128xf32, #tpu.memory_space<vmem>>, vector<128x128xf32>
    %cst_71 = arith.constant dense<0.000000e+00> : vector<8x128xf32>
    %363 = tpu.matmul %361, %362, %cst_71 {dimension_numbers = #tpu.dot_dimension_numbers<[1], [0], [0], [1], [0, 0, 1, 1], [], []>} : vector<8x128xf32>, vector<128x128xf32>, vector<8x128xf32> -> vector<8x128xf32>
    %c696 = arith.constant 696 : index
    %c0_72 = arith.constant 0 : index
    %364 = vector.load %arg1[%c696, %c0_72] : memref<712x128xf32, #tpu.memory_space<vmem>>, vector<1x128xf32>
    %365 = vector.broadcast %364 : vector<1x128xf32> to vector<8x128xf32>
    %366 = arith.addf %363, %365 : vector<8x128xf32>
    %367 = math.tanh %366 : vector<8x128xf32>
    %c704 = arith.constant 704 : index
    %c0_73 = arith.constant 0 : index
    %368 = vector.load %arg1[%c704, %c0_73] : memref<712x128xf32, #tpu.memory_space<vmem>>, vector<1x128xf32>
    %369 = vector.broadcast %368 : vector<1x128xf32> to vector<8x128xf32>
    %370 = arith.mulf %367, %369 : vector<8x128xf32>
    %c64 = arith.constant 64 : index
    %c0_74 = arith.constant 0 : index
    %371 = vector.load %arg2[%c64, %c0_74] : memref<72x128xf32, #tpu.memory_space<vmem>>, vector<8x1xf32>
    %cst_75 = arith.constant 9.99999997E-7 : f32
    %372 = vector.broadcast %cst_75 : f32 to vector<8x1xf32>
    %373 = arith.cmpf olt, %371, %372 : vector<8x1xf32>
    %cst_76 = arith.constant 0.000000e+00 : f32
    %374 = vector.shape_cast %373 : vector<8x1xi1> to vector<8x1xi1>
    %375 = vector.broadcast %374 : vector<8x1xi1> to vector<8x128xi1>
    %376 = vector.broadcast %cst_76 : f32 to vector<8x128xf32>
    %377 = arith.select %375, %376, %370 : vector<8x128xi1>, vector<8x128xf32>
    %cst_77 = arith.constant 0.000000e+00 : f32
    %378 = vector.broadcast %cst_77 : f32 to vector<8x96xf32>
    %379 = tpu.concatenate %312, %378 in 1 : vector<8x32xf32>, vector<8x96xf32> -> vector<8x128xf32>
    %380 = tpu.concatenate %331, %378 in 1 : vector<8x32xf32>, vector<8x96xf32> -> vector<8x128xf32>
    %381 = tpu.concatenate %310, %378 in 1 : vector<8x32xf32>, vector<8x96xf32> -> vector<8x128xf32>
    %382 = tpu.concatenate %329, %378 in 1 : vector<8x32xf32>, vector<8x96xf32> -> vector<8x128xf32>
    %383 = tpu.concatenate %377, %379, %380, %381, %382 in 0 : vector<8x128xf32>, vector<8x128xf32>, vector<8x128xf32>, vector<8x128xf32>, vector<8x128xf32> -> vector<40x128xf32>
    %c0_78 = arith.constant 0 : index
    %c0_79 = arith.constant 0 : index
    %384 = vector.load %arg3[%c0_78, %c0_79] : memref<40x128xf32, #tpu.memory_space<vmem>>, vector<40x128xf32>
    tpu.vector_store %arg3[%c0_78, %c0_79], %383 {strides = array<i32>} : memref<40x128xf32, #tpu.memory_space<vmem>>, vector<40x128xf32>,
    return
  }
  func.func @transform_0(%arg0: i32) -> (i32, i32) {
    %c0_i32 = arith.constant 0 : i32
    %c0_i32_0 = arith.constant 0 : i32
    %c0_i32_1 = arith.constant 0 : i32
    return %c0_i32, %c0_i32_0 : i32, i32
  }
  func.func @transform_1(%arg0: i32) -> (i32, i32) {
    %c0_i32 = arith.constant 0 : i32
    %c0_i32_0 = arith.constant 0 : i32
    %c0_i32_1 = arith.constant 0 : i32
    return %c0_i32, %c0_i32_0 : i32, i32
  }
  func.func @transform_2(%arg0: i32) -> (i32, i32) {
    %c0_i32 = arith.constant 0 : i32
    %c0_i32_0 = arith.constant 0 : i32
    %c0_i32_1 = arith.constant 0 : i32
    return %c0_i32, %c0_i32_0 : i32, i32
  }
}

</mosaic_0001>

<bundles_post_ra>
// kernel: lstm_module_forward.1
= control target key start
LH: loop header
LB: loop body
LE: loop exit
PB: predicated region body
PF: predicated region fallthrough
CT: control target
= control target key end

     0   :  { %v16618_v56 = vmov 0.0|0.0   ;;  %vm16619_vm0 = vmmov 0   ;;  %s16621_s23 = smov 64   ;;  %s16622_s24 = smov 32   ;;  %vm426_vm1 = vcmask 261120   ;;  %s18364_s0 = inlined_call_operand.vmem [shape: f32[712,128], index: 0, kind: input, shape index: {}]   ;;  %s18365_s1 = inlined_call_operand.vmem [shape: f32[72,128], index: 1, kind: input, shape index: {}]   ;;  %s18366_s2 = inlined_call_operand.vmem [shape: f32[40,128], index: 2, kind: output, shape index: {}]  }
   0x1   :  { %v19_v0 = vld [vmem:[%s18364_s0] sm:$0xff]  ;;  %v20_v1 = vld [vmem:[%s18364_s0 + $0x8] sm:$0xff]  ;;  %v21_v2 = vld [vmem:[%s18364_s0 + $0x10] sm:$0xff]  ;;  %s16623_s26 = smov 96  }
   0x2   :  { %v15405_v3 = vpack.c.bf16 %v20_v1, %v19_v0  ;;  %v22_v4 = vld [vmem:[%s18364_s0 + $0x18] sm:$0xff]  ;;  %v23_v6 = vld [vmem:[%s18364_s0 + $0x20] sm:$0xff]  ;;  %v24_v7 = vld [vmem:[%s18364_s0 + $0x28] sm:$0xff] }
   0x3   :  { %v15409_v5 = vpack.c.bf16 %v22_v4, %v21_v2  ;;  %v15413_v8 = vpack.c.bf16 %v24_v7, %v23_v6  ;;  %v11_v9 = vld [vmem:[%s18365_s1] sm:$0xff]  ;;  %v25_v10 = vld [vmem:[%s18364_s0 + $0x30] sm:$0xff]  ;;  %v26_v11 = vld [vmem:[%s18364_s0 + $0x38] sm:$0xff] }
   0x4   :  { %15406 = vmatprep.subr.bf16.mxu0 %v15405_v3  ;;  %13675 = vmatprep.mubr.f32.mxu0 %v11_v9  ;;  %v153_v12 = vld [vmem:[%s18364_s0 + $0x88] sm:$0xff]  ;;  %v154_v13 = vld [vmem:[%s18364_s0 + $0x90] sm:$0xff]  ;;  %v155_v14 = vld [vmem:[%s18364_s0 + $0x98] sm:$0xff]  ;;  %v15417_v15 = vpack.c.bf16 %v26_v11, %v25_v10 }
   0x5   :  { %15408 = vmatpush3.bf16.msra.mxu0 %v15405_v3  ;;  %v27_v16 = vld [vmem:[%s18364_s0 + $0x40] sm:$0xff]  ;;  %v15437_v17 = vpack.c.bf16 %v154_v13, %v153_v12  ;;  %v28_v19 = vld [vmem:[%s18364_s0 + $0x48] sm:$0xff]  ;;  %v158_v22 = vld [vmem:[%s18364_s0 + $0xb0] sm:$0xff] }
   0x6   :  { %15410 = vmatprep.subr.bf16.mxu0 %v15409_v5  ;;  %v156_v18 = vld [vmem:[%s18364_s0 + $0xa0] sm:$0xff]  ;;  %v157_v21 = vld [vmem:[%s18364_s0 + $0xa8] sm:$0xff]  ;;  %v15421_v23 = vpack.c.bf16 %v28_v19, %v27_v16  ;;  %v29_v24 = vld [vmem:[%s18364_s0 + $0x50] sm:$0xff] }
   0x7   :  { %v15441_v20 = vpack.c.bf16 %v156_v18, %v155_v14  ;;  %15438 = vmatprep.subr.bf16.mxu1 %v15437_v17  ;;  %v15445_v25 = vpack.c.bf16 %v158_v22, %v157_v21  ;;  %v30_v26 = vld [vmem:[%s18364_s0 + $0x58] sm:$0xff]  ;;  %v160_v28 = vld [vmem:[%s18364_s0 + $0xc0] sm:$0xff]  ;;  %v32_v32 = vld [vmem:[%s18364_s0 + $0x68] sm:$0xff] }
   0x8   :  { %15440 = vmatpush3.bf16.msra.mxu1 %v15437_v17  ;;  %v159_v27 = vld [vmem:[%s18364_s0 + $0xb8] sm:$0xff]  ;;  %v15425_v29 = vpack.c.bf16 %v30_v26, %v29_v24  ;;  %v31_v30 = vld [vmem:[%s18364_s0 + $0x60] sm:$0xff]  ;;  %v161_v33 = vld [vmem:[%s18364_s0 + $0xc8] sm:$0xff] }
   0x9   :  { %15412 = vmatpush3.bf16.msra.mxu0 %v15409_v5  ;;  %15442 = vmatprep.subr.bf16.mxu1 %v15441_v20  ;;  %v15449_v31 = vpack.c.bf16 %v160_v28, %v159_v27  ;;  %v162_v34 = vld [vmem:[%s18364_s0 + $0xd0] sm:$0xff]  ;;  %v15429_v35 = vpack.c.bf16 %v32_v32, %v31_v30  ;;  %v34_v38 = vld [vmem:[%s18364_s0 + $0x78] sm:$0xff]  ;;  %v164_v40 = vld [vmem:[%s18364_s0 + $0xe0] sm:$0xff] }
   0xa   :  { %15414 = vmatprep.subr.bf16.mxu0 %v15413_v8  ;;  %v33_v36 = vld [vmem:[%s18364_s0 + $0x70] sm:$0xff]  ;;  %v15453_v37 = vpack.c.bf16 %v162_v34, %v161_v33  ;;  %v163_v39 = vld [vmem:[%s18364_s0 + $0xd8] sm:$0xff]  ;;  %v165_v43 = vld [vmem:[%s18364_s0 + $0xe8] sm:$0xff] }
   0xb   :  { %v15433_v41 = vpack.c.bf16 %v34_v38, %v33_v36  ;;  %v15457_v42 = vpack.c.bf16 %v164_v40, %v163_v39  ;;  %v166_v44 = vld [vmem:[%s18364_s0 + $0xf0] sm:$0xff]  ;;  %v12_v46 = vld [vmem:[%s18365_s1 + $0x8] sm:$0xff]  ;;  %v14_v48 = vld [vmem:[%s18365_s1 + $0x18] sm:$0xff] }
   0xc   :  { %15444 = vmatpush3.bf16.msra.mxu1 %v15441_v20  ;;  %v15461_v45 = vpack.c.bf16 %v166_v44, %v165_v43  ;;  %v13_v47 = vld [vmem:[%s18365_s1 + $0x10] sm:$0xff]  ;;  %v15_v49 = vld [vmem:[%s18365_s1 + $0x20] sm:$0xff]  ;;  %v16_v50 = vld [vmem:[%s18365_s1 + $0x28] sm:$0xff] }
   0xd   :  { %15416 = vmatpush3.bf16.msra.mxu0 %v15413_v8  ;;  %15446 = vmatprep.subr.bf16.mxu1 %v15445_v25  ;;  %v17_v51 = vld [vmem:[%s18365_s1 + $0x30] sm:$0xff]  ;;  %v18_v52 = vld [vmem:[%s18365_s1 + $0x38] sm:$0xff]  ;;  %v168_v54 = vld [vmem:[%s18364_s0 + $0x100] sm:$0xff] }
   0xe   :  { %15418 = vmatprep.subr.bf16.mxu0 %v15417_v15  ;;  %v167_v53 = vld [vmem:[%s18364_s0 + $0xf8] sm:$0xff]  ;;  %v287_v57 = vld [vmem:[%s18364_s0 + $0x110] sm:$0xff]  ;;  %v289_v60 = vld [vmem:[%s18364_s0 + $0x120] sm:$0xff] }
   0xf   :  { %v15465_v55 = vpack.c.bf16 %v168_v54, %v167_v53  ;;  %v288_v58 = vld [vmem:[%s18364_s0 + $0x118] sm:$0xff]  ;;  %v290_v61 = vld [vmem:[%s18364_s0 + $0x128] sm:$0xff]  ;;  %v291_v63 = vld [vmem:[%s18364_s0 + $0x130] sm:$0xff] }
  0x10   :  { %15448 = vmatpush3.bf16.msra.mxu1 %v15445_v25  ;;  %v15469_v59 = vpack.c.bf16 %v288_v58, %v287_v57  ;;  %v15473_v62 = vpack.c.bf16 %v290_v61, %v289_v60  ;;  %v292_v0 = vld [vmem:[%s18364_s0 + $0x138] sm:$0xff]  ;;  %v293_v2 = vld [vmem:[%s18364_s0 + $0x140] sm:$0xff]  ;;  %v294_v3 = vld [vmem:[%s18364_s0 + $0x148] sm:$0xff] }
  0x11   :  { %15420 = vmatpush3.bf16.msra.mxu0 %v15417_v15  ;;  %15450 = vmatprep.subr.bf16.mxu1 %v15449_v31  ;;  %v15477_v1 = vpack.c.bf16 %v292_v0, %v291_v63  ;;  %v15481_v4 = vpack.c.bf16 %v294_v3, %v293_v2  ;;  %v295_v5 = vld [vmem:[%s18364_s0 + $0x150] sm:$0xff]  ;;  %v296_v6 = vld [vmem:[%s18364_s0 + $0x158] sm:$0xff]  ;;  %v297_v8 = vld [vmem:[%s18364_s0 + $0x160] sm:$0xff]  ;;  %v16620_v2 = vmov 0.0  }
  0x12   :  { %15422 = vmatprep.subr.bf16.mxu0 %v15421_v23  ;;  %v15485_v7 = vpack.c.bf16 %v296_v6, %v295_v5  ;;  %v298_v9 = vld [vmem:[%s18364_s0 + $0x168] sm:$0xff]  ;;  %v299_v10 = vld [vmem:[%s18364_s0 + $0x170] sm:$0xff]  ;;  %v300_v12 = vld [vmem:[%s18364_s0 + $0x178] sm:$0xff] }
  0x13   :  { %v15489_v11 = vpack.c.bf16 %v298_v9, %v297_v8  ;;  %v15493_v13 = vpack.c.bf16 %v300_v12, %v299_v10  ;;  %v16806_v14 = vld [vmem:[%s18364_s0 + $0x190] sm:$0xff]  ;;  %v16811_v15 = vld [vmem:[%s18364_s0 + $0x198] sm:$0xff]  ;;  %v16818_v18 = vld [vmem:[%s18364_s0 + $0x1a0] sm:$0xff] }
  0x14   :  { %15452 = vmatpush3.bf16.msra.mxu1 %v15449_v31  ;;  %v431_v16 = vand.u32 4294901760, %v16806_v14  ;;  %v434_v17 = vand.u32 4294901760, %v16811_v15  ;;  %v16823_v19 = vld [vmem:[%s18364_s0 + $0x1a8] sm:$0xff]  ;;  %v437_v22 = vand.u32 4294901760, %v16818_v18  ;;  %v12803_v32 = vld [vmem:[%s18364_s0 + $0x80] ss:$0 sm:$0xff] }
  0x15   :  { %15424 = vmatpush3.bf16.msra.mxu0 %v15421_v23  ;;  %15454 = vmatprep.subr.bf16.mxu1 %v15453_v37  ;;  %v440_v23 = vand.u32 4294901760, %v16823_v19  ;;  %v301_v9 = vld [vmem:[%s18364_s0 + $0x180] sm:$0xff]  ;;  %v302_v10 = vld [vmem:[%s18364_s0 + $0x188] sm:$0xff] }
  0x16   :  { %15426 = vmatprep.subr.bf16.mxu0 %v15425_v29  ;;  %v16828_v20 = vsub.f32 %v16806_v14, %v431_v16  ;;  %v16833_v21 = vsub.f32 %v16811_v15, %v434_v17  ;;  %v16842_v26 = vsub.f32 %v16818_v18, %v437_v22  ;;  %v16893_v5 = vpack.c.bf16 %v434_v17, %v431_v16  ;;  %v12804_v12 = vld [vmem:[%s18364_s0 + $0x108] ss:$0 sm:$0xff] }
  0x17   :  { %v16847_v27 = vsub.f32 %v16823_v19, %v440_v23  ;;  %v16902_v6 = vpack.c.bf16 %v440_v23, %v437_v22 }
  0x18   :  { %15456 = vmatpush3.bf16.msra.mxu1 %v15453_v37  ;;  %v512_v24 = vand.u32 4294901760, %v16828_v20  ;;  %v519_v25 = vand.u32 4294901760, %v16833_v21  ;;  %v526_v30 = vand.u32 4294901760, %v16842_v26  ;;  %v16878_v3 = vpack.c.bf16 %v16833_v21, %v16828_v20 }
  0x19   :  { %15428 = vmatpush3.bf16.msra.mxu0 %v15425_v29  ;;  %15458 = vmatprep.subr.bf16.mxu1 %v15457_v42  ;;  %v533_v31 = vand.u32 4294901760, %v16847_v27 }
  0x1a   :  { %15430 = vmatprep.subr.bf16.mxu0 %v15429_v35  ;;  %v513_v28 = vsub.f32 %v16828_v20, %v512_v24  ;;  %v520_v29 = vsub.f32 %v16833_v21, %v519_v25  ;;  %v527_v36 = vsub.f32 %v16842_v26, %v526_v30 }
  0x1b   :  { %v534_v37 = vsub.f32 %v16847_v27, %v533_v31  ;;  %v16922_v8 = vpack.c.bf16 %v533_v31, %v526_v30 }
  0x1c   :  { %15460 = vmatpush3.bf16.msra.mxu1 %v15457_v42  ;;  %v514_v34 = vand.u32 4294901760, %v513_v28  ;;  %v528_v44 = vand.u32 4294901760, %v527_v36 }
  0x1d   :  { %15432 = vmatpush3.bf16.msra.mxu0 %v15429_v35  ;;  %15462 = vmatprep.subr.bf16.mxu1 %v15461_v45  ;;  %v521_v35 = vand.u32 4294901760, %v520_v29 }
  0x1e   :  { %15434 = vmatprep.subr.bf16.mxu0 %v15433_v41 }
  0x1f   :  { %v16866_v43 = vpack.c.bf16 %v521_v35, %v514_v34 }
  0x20   :  { %15464 = vmatpush3.bf16.msra.mxu1 %v15461_v45  ;;  %v535_v45 = vand.u32 4294901760, %v534_v37 }
  0x21   :  { %15436 = vmatpush3.bf16.msra.mxu0 %v15433_v41  ;;  %15466 = vmatprep.subr.bf16.mxu1 %v15465_v55 }
  0x22   :  { %15470 = vmatprep.subr.bf16.mxu0 %v15469_v59 }
  0x24   :  { %13676 = vmatmul.mubr.f32.vlgmr.msra.gmra.mrb[0].mxu0 %v12_v46  ;;  %15468 = vmatpush3.bf16.msra.mxu1 %v15465_v55 }
  0x25   :  { %13678 = vmatprep.mubr.f32.mxu0 %v13_v47  ;;  %15507 = vmatprep.subr.bf16.mxu1 %v16618_v56 }
  0x26   :  { %15472 = vmatpush3.bf16.msra.mxu0 %v15469_v59 }
  0x27   :  { %15474 = vmatprep.subr.bf16.mxu0 %v15473_v62 }
  0x28   :  { %13679 = vmatmul.mubr.f32.gmra.mrb[2].mxu0 %v14_v48 }
  0x29   :  { %13681 = vmatprep.mubr.f32.mxu0 %v15_v49 }
  0x2a   :  { %15476 = vmatpush3.bf16.msra.mxu0 %v15473_v62 }
  0x2b   :  { %15478 = vmatprep.subr.bf16.mxu0 %v15477_v1 }
  0x2c   :  { %13682 = vmatmul.mubr.f32.gmra.mrb[4].mxu0 %v16_v50 }
  0x2d   :  { %13684 = vmatprep.mubr.f32.mxu0 %v17_v51 }
  0x2e   :  { %15480 = vmatpush3.bf16.msra.mxu0 %v15477_v1 }
  0x2f   :  { %15482 = vmatprep.subr.bf16.mxu0 %v15481_v4 }
  0x30   :  { %13685 = vmatmul.mubr.f32.gmra.mrb[6].mxu0 %v18_v52  ;;  %v16869_v52 = vpack.c.bf16 %v535_v45, %v528_v44 }
  0x32   :  { %15484 = vmatpush3.bf16.msra.mxu0 %v15481_v4  ;;  %v16884_v4 = vpack.c.bf16 %v16847_v27, %v16842_v26 }
  0x33   :  { %15486 = vmatprep.subr.bf16.mxu0 %v15485_v7 }
  0x36   :  { %15488 = vmatpush3.bf16.msra.mxu0 %v15485_v7  ;;  %v16913_v7 = vpack.c.bf16 %v519_v25, %v512_v24 }
  0x37   :  { %15490 = vmatprep.subr.bf16.mxu0 %v15489_v11 }
  0x3a   :  { %15492 = vmatpush3.bf16.msra.mxu0 %v15489_v11  ;;  %v15497_v11 = vpack.c.bf16 %v302_v10, %v301_v9 }
  0x3b   :  { %15494 = vmatprep.subr.bf16.mxu0 %v15493_v13 }
  0x3e   :  { %15496 = vmatpush3.bf16.msra.mxu0 %v15493_v13 }
  0x3f   :  { %15498 = vmatprep.subr.bf16.mxu0 %v15497_v11 }
  0x42   :  { %15500 = vmatpush3.bf16.msra.mxu0 %v15497_v11 }
  0x43   :  { %15501 = vmatprep.subr.bf16.mxu0 %v16618_v56 }
  0xf7   :  { %v13677_v33 = vpop.f32.mrb[0].mxu0 }
  0xf8   :  { %v112_v38 = vadd.f32 %v13677_v33, %v12803_v32  ;;  %v106_v39 = vpop.f32.mrb[1].mxu0 }
  0xf9   :  { %v107_v40 = vadd.f32 %v12803_v32, %v106_v39  ;;  %v12805_v39 = vld [vmem:[%s18364_s0 + $0x1f0] ss:$0 sm:$0xff] }
  0xfa   :  { %v146_v46 = vmax.f32 %v112_v38, 0.0 }
  0xfb   :  { %v13680_v41 = vpop.f32.mrb[2].mxu0  ;;  %v145_v42 = vmax.f32 %v107_v40, 0.0 }
  0xfc   :  { %v122_v47 = vadd.f32 %v13680_v41, %v12803_v32  ;;  %v116_v48 = vpop.f32.mrb[3].mxu0 }
  0xfd   :  { %v117_v49 = vadd.f32 %v12803_v32, %v116_v48  ;;  %13719 = vmatprep.mubr.f32.mxu1 %v145_v42 }
  0xfe   :  { %13720 = vmatmul.mubr.f32.vlgmr.msra.gmra.mrb[0].mxu1 %v146_v46  ;;  %v148_v53 = vmax.f32 %v122_v47, 0.0 }
  0xff   :  { %v147_v50 = vmax.f32 %v117_v49, 0.0  ;;  %v13683_v51 = vpop.f32.mrb[4].mxu0  ;;  %15509 = vmatpush3.bf16.msra.mxu1 %v16866_v43 }
 0x100   :  { %v132_v54 = vadd.f32 %v13683_v51, %v12803_v32  ;;  %v126_v55 = vpop.f32.mrb[5].mxu0  ;;  %15510 = vmatprep.subr.bf16.mxu1 %v16618_v56 }
 0x101   :  { %v127_v57 = vadd.f32 %v12803_v32, %v126_v55  ;;  %13722 = vmatprep.mubr.f32.mxu1 %v147_v50 }
 0x102   :  { %13723 = vmatmul.mubr.f32.gmra.mrb[2].mxu1 %v148_v53  ;;  %v150_v60 = vmax.f32 %v132_v54, 0.0 }
 0x103   :  { %v149_v58 = vmax.f32 %v127_v57, 0.0  ;;  %v13686_v59 = vpop.f32.mrb[6].mxu0  ;;  %15512 = vmatpush3.bf16.msra.mxu1 %v16869_v52 }
 0x104   :  { %v142_v61 = vadd.f32 %v13686_v59, %v12803_v32  ;;  %v136_v62 = vpop.f32.mrb[7].mxu0  ;;  %15513 = vmatprep.subr.bf16.mxu1 %v16618_v56 }
 0x105   :  { %v137_v63 = vadd.f32 %v12803_v32, %v136_v62  ;;  %13725 = vmatprep.mubr.f32.mxu1 %v149_v58 }
 0x106   :  { %13726 = vmatmul.mubr.f32.gmra.mrb[4].mxu1 %v150_v60  ;;  %v152_v1 = vmax.f32 %v142_v61, 0.0 }
 0x107   :  { %v151_v0 = vmax.f32 %v137_v63, 0.0 }
 0x109   :  { %13728 = vmatprep.mubr.f32.mxu1 %v151_v0 }
 0x10a   :  { %13729 = vmatmul.mubr.f32.gmra.mrb[6].mxu1 %v152_v1 }
 0x10b   :  { %13794 = vmatprep.mubr.msk.f32.mxu1 %vm16619_vm0, %v16620_v2 }
 0x10e   :  { %13795 = vmatmul.mubr.f32.vlgmr.msra.gmra.mrb[8].mxu1 %v16620_v2 }
 0x10f   :  { %15515 = vmatpush3.bf16.msra.mxu1 %v16878_v3  ;;  %13805 = vmatprep.mubr.msk.f32.mxu1 %vm16619_vm0, %v16620_v2 }
 0x110   :  { %15516 = vmatprep.subr.bf16.mxu1 %v16618_v56 }
 0x113   :  { %15518 = vmatpush3.bf16.msra.mxu1 %v16884_v4 }
 0x114   :  { %15519 = vmatprep.subr.bf16.mxu1 %v16618_v56 }
 0x116   :  { %13806 = vmatmul.mubr.f32.vlgmr.msra.gmra.mrb[8].mxu1 %v16620_v2 }
 0x117   :  { %15521 = vmatpush3.bf16.msra.mxu1 %v16893_v5  ;;  %13816 = vmatprep.mubr.msk.f32.mxu1 %vm16619_vm0, %v16620_v2 }
 0x118   :  { %15522 = vmatprep.subr.bf16.mxu1 %v16618_v56 }
 0x11b   :  { %15524 = vmatpush3.bf16.msra.mxu1 %v16902_v6 }
 0x11c   :  { %15525 = vmatprep.subr.bf16.mxu1 %v16618_v56 }
 0x11e   :  { %13817 = vmatmul.mubr.f32.vlgmr.msra.gmra.mrb[8].mxu1 %v16620_v2 }
 0x11f   :  { %15527 = vmatpush3.bf16.msra.mxu1 %v16913_v7  ;;  %13827 = vmatprep.mubr.msk.f32.mxu1 %vm16619_vm0, %v16620_v2 }
 0x120   :  { %15528 = vmatprep.subr.bf16.mxu1 %v16618_v56 }
 0x123   :  { %15530 = vmatpush3.bf16.msra.mxu1 %v16922_v8 }
 0x124   :  { %15531 = vmatprep.subr.bf16.mxu1 %v16618_v56 }
 0x126   :  { %13828 = vmatmul.mubr.f32.vlgmr.msra.gmra.mrb[8].mxu1 %v16620_v2 }
 0x127   :  { %15533 = vmatpush3.bf16.msra.mxu1 %v16893_v5  ;;  %13838 = vmatprep.mubr.msk.f32.mxu1 %vm16619_vm0, %v16620_v2 }
 0x128   :  { %15534 = vmatprep.subr.bf16.mxu1 %v16618_v56 }
 0x12b   :  { %15536 = vmatpush3.bf16.msra.mxu1 %v16902_v6 }
 0x12c   :  { %15555 = vmatprep.subr.bf16.mxu1 %v16618_v56 }
 0x12e   :  { %13839 = vmatmul.mubr.f32.vlgmr.msra.gmra.mrb[8].mxu1 %v16620_v2 }
 0x12f   :  { %13882 = vmatprep.mubr.msk.f32.mxu1 %vm16619_vm0, %v16620_v2 }
 0x1d1   :  { %v13721_v13 = vpop.f32.mrb[0].mxu1 }
 0x1d2   :  { %v246_v14 = vadd.f32 %v13721_v13, %v12804_v12  ;;  %v240_v15 = vpop.f32.mrb[1].mxu1 }
 0x1d3   :  { %v241_v16 = vadd.f32 %v12804_v12, %v240_v15 }
 0x1d4   :  { %v280_v19 = vmax.f32 %v246_v14, 0.0 }
 0x1d5   :  { %v279_v17 = vmax.f32 %v241_v16, 0.0  ;;  %v13724_v18 = vpop.f32.mrb[2].mxu1  ;;  %v417_v16 = vld [vmem:[%s18364_s0 + $0x1d0] sm:$0xff] }
 0x1d6   :  { %v256_v20 = vadd.f32 %v13724_v18, %v12804_v12  ;;  %v250_v21 = vpop.f32.mrb[3].mxu1  ;;  %v419_v18 = vld [vmem:[%s18364_s0 + $0x1e0] sm:$0xff] }
 0x1d7   :  { %v251_v22 = vadd.f32 %v12804_v12, %v250_v21  ;;  %13763 = vmatprep.mubr.f32.mxu0 %v279_v17  ;;  %v418_v17 = vld [vmem:[%s18364_s0 + $0x1d8] sm:$0xff]  ;;  %v420_v21 = vld [vmem:[%s18364_s0 + $0x1e8] sm:$0xff] }
 0x1d8   :  { %13764 = vmatmul.mubr.f32.vlgmr.msra.gmra.mrb[8].mxu0 %v280_v19  ;;  %v282_v25 = vmax.f32 %v256_v20, 0.0  ;;  %v916_v19 = vand.u32 4294901760, %v417_v16  ;;  %v919_v20 = vand.u32 4294901760, %v418_v17 }
 0x1d9   :  { %v281_v23 = vmax.f32 %v251_v22, 0.0  ;;  %15503 = vmatpush3.bf16.msra.mxu0 %v16893_v5  ;;  %v13727_v24 = vpop.f32.mrb[4].mxu1  ;;  %v922_v22 = vand.u32 4294901760, %v419_v18 }
 0x1da   :  { %v266_v26 = vadd.f32 %v13727_v24, %v12804_v12  ;;  %v260_v27 = vpop.f32.mrb[5].mxu1  ;;  %15504 = vmatprep.subr.bf16.mxu0 %v16618_v56  ;;  %v17004_v24 = vld [vmem:[%s18364_s0 + $0x1b8] sm:$0xff] }
 0x1db   :  { %v261_v28 = vadd.f32 %v12804_v12, %v260_v27  ;;  %13766 = vmatprep.mubr.f32.mxu0 %v281_v23  ;;  %v16999_v23 = vld [vmem:[%s18364_s0 + $0x1b0] sm:$0xff]  ;;  %v1434_v27 = vand.u32 4294901760, %v17004_v24 }
 0x1dc   :  { %13767 = vmatmul.mubr.f32.gmra.mrb[10].mxu0 %v282_v25  ;;  %v284_v31 = vmax.f32 %v266_v26, 0.0  ;;  %v925_v25 = vand.u32 4294901760, %v420_v21  ;;  %v1431_v26 = vand.u32 4294901760, %v16999_v23 }
 0x1dd   :  { %v283_v29 = vmax.f32 %v261_v28, 0.0  ;;  %v13730_v30 = vpop.f32.mrb[6].mxu1  ;;  %15506 = vmatpush3.bf16.msra.mxu0 %v16902_v6  ;;  %v17008_v28 = vpack.c.bf16 %v919_v20, %v916_v19 }
 0x1de   :  { %v276_v32 = vadd.f32 %v13730_v30, %v12804_v12  ;;  %v270_v33 = vpop.f32.mrb[7].mxu1  ;;  %15537 = vmatprep.subr.bf16.mxu0 %v16618_v56  ;;  %v17012_v30 = vsub.f32 %v418_v17, %v919_v20 }
 0x1df   :  { %v271_v34 = vadd.f32 %v12804_v12, %v270_v33  ;;  %13769 = vmatprep.mubr.f32.mxu0 %v283_v29  ;;  %v17010_v29 = vsub.f32 %v417_v16, %v916_v19  ;;  %v17021_v33 = vsub.f32 %v16999_v23, %v1431_v26  ;;  %15557 = vmatpush3.bf16.msra.mxu1 %v17008_v28 }
 0x1e0   :  { %13770 = vmatmul.mubr.f32.gmra.mrb[12].mxu0 %v284_v31  ;;  %v286_v36 = vmax.f32 %v276_v32, 0.0  ;;  %v17014_v31 = vsub.f32 %v419_v18, %v922_v22  ;;  %v17016_v32 = vsub.f32 %v420_v21, %v925_v25  ;;  %15558 = vmatprep.subr.bf16.mxu1 %v16618_v56 }
 0x1e1   :  { %v285_v35 = vmax.f32 %v271_v34, 0.0  ;;  %v17024_v34 = vpack.c.bf16 %v925_v25, %v922_v22  ;;  %v17106_v22 = vpack.c.bf16 %v17012_v30, %v17010_v29 }
 0x1e3   :  { %13772 = vmatprep.mubr.f32.mxu0 %v285_v35  ;;  %v997_v35 = vand.u32 4294901760, %v17010_v29  ;;  %15560 = vmatpush3.bf16.msra.mxu1 %v17024_v34 }
 0x1e4   :  { %13773 = vmatmul.mubr.f32.gmra.mrb[14].mxu0 %v286_v36  ;;  %v1004_v36 = vand.u32 4294901760, %v17012_v30  ;;  %15567 = vmatprep.subr.bf16.mxu1 %v16618_v56 }
 0x1e5   :  { %13783 = vmatprep.mubr.msk.f32.mxu0 %vm16619_vm0, %v16620_v2 }
 0x1e6   :  { %13883 = vmatmul.mubr.f32.vlgmr.msra.gmra.mrb[10].mxu1 %v16620_v2 }
 0x1e7   :  { %15569 = vmatpush3.bf16.msra.mxu1 %v17008_v28  ;;  %13904 = vmatprep.mubr.msk.f32.mxu1 %vm16619_vm0, %v16620_v2 }
 0x1e8   :  { %13784 = vmatmul.mubr.f32.vlgmr.msra.gmra.mrb[16].mxu0 %v16620_v2  ;;  %15570 = vmatprep.subr.bf16.mxu1 %v16618_v56 }
 0x1e9   :  { %13849 = vmatprep.mubr.msk.f32.mxu0 %vm16619_vm0, %v16620_v2  ;;  %15539 = vmatpush3.bf16.msra.mxu0 %v17008_v28 }
 0x1ea   :  { %15540 = vmatprep.subr.bf16.mxu0 %v16618_v56 }
 0x1eb   :  { %15572 = vmatpush3.bf16.msra.mxu1 %v17024_v34 }
 0x1ec   :  { %15579 = vmatprep.subr.bf16.mxu1 %v16618_v56 }
 0x1ed   :  { %15542 = vmatpush3.bf16.msra.mxu0 %v17024_v34 }
 0x1ee   :  { %15543 = vmatprep.subr.bf16.mxu0 %v16618_v56  ;;  %13905 = vmatmul.mubr.f32.vlgmr.msra.gmra.mrb[12].mxu1 %v16620_v2 }
 0x1ef   :  { %13926 = vmatprep.mubr.msk.f32.mxu1 %vm16619_vm0, %v16620_v2 }
 0x1f0   :  { %13850 = vmatmul.mubr.f32.vlgmr.msra.gmra.mrb[18].mxu0 %v16620_v2 }
 0x1f1   :  { %13860 = vmatprep.mubr.msk.f32.mxu0 %vm16619_vm0, %v16620_v2 }
 0x201   :  { %v911_v37 = vpop.f32.mrb[8].mxu1 }
 0x202   :  { %v13840_v38 = vpop.f32.mrb[9].mxu1 }
 0x203   :  { %v1018_v38 = vand.u32 4294901760, %v17016_v32 }
 0x2ab   :  { %v13765_v40 = vpop.f32.mrb[8].mxu0 }
 0x2ac   :  { %v16961_v41 = vadd.f32 %v13765_v40, %v12805_v39  ;;  %v374_v42 = vpop.f32.mrb[9].mxu0  ;;  %v17041_v40 = vld [vmem:[%s18364_s0 + $0x1c0] sm:$0xff] }
 0x2ad   :  { %v375_v59 = vadd.f32 %v12805_v39, %v374_v42  ;;  %v998_v42 = vsub.f32 %v17010_v29, %v997_v35  ;;  %v17155_v29 = vpack.c.bf16 %v1434_v27, %v1431_v26 }
 0x2af   :  { %v13768_v44 = vpop.f32.mrb[10].mxu0 }
 0x2b0   :  { %v16963_v45 = vadd.f32 %v13768_v44, %v12805_v39  ;;  %v384_v46 = vpop.f32.mrb[11].mxu0  ;;  %v1005_v44 = vsub.f32 %v17012_v30, %v1004_v36 }
 0x2b1   :  { %v16965_v47 = vadd.f32 %v12805_v39, %v384_v46 }
 0x2b3   :  { %v13771_v48 = vpop.f32.mrb[12].mxu0 }
 0x2b4   :  { %v16967_v49 = vadd.f32 %v13771_v48, %v12805_v39  ;;  %v394_v50 = vpop.f32.mrb[13].mxu0  ;;  %v1512_v48 = vand.u32 4294901760, %v17021_v33 }
 0x2b5   :  { %v16969_v51 = vadd.f32 %v12805_v39, %v394_v50  ;;  %v17056_v50 = vld [vmem:[%s18364_s0 + $0x1c8] sm:$0xff] }
 0x2b7   :  { %v13774_v53 = vpop.f32.mrb[14].mxu0 }
 0x2b8   :  { %v16971_v54 = vadd.f32 %v13774_v53, %v12805_v39  ;;  %v404_v55 = vpop.f32.mrb[15].mxu0  ;;  %v1019_v53 = vsub.f32 %v17016_v32, %v1018_v38 }
 0x2b9   :  { %v16973_v57 = vadd.f32 %v12805_v39, %v404_v55  ;;  %v17036_v39 = vsub.f32 %v17004_v24, %v1434_v27  ;;  %v1238_v27 = vpop.f32.mrb[10].mxu1 }
 0x2bb   :  { %v505_v58 = vpop.f32.mrb[16].mxu0  ;;  %v1519_v55 = vand.u32 4294901760, %v17036_v39 }
 0x2bc   :  { %v16395_v60 = vadd.f32 %v911_v37, %v505_v58  ;;  %v13785_v61 = vpop.f32.mrb[17].mxu0  ;;  %v1011_v37 = vand.u32 4294901760, %v17014_v31  ;;  %v999_v58 = vand.u32 4294901760, %v998_v42 }
 0x2bd   :  { %v1437_v61 = vand.u32 4294901760, %v17041_v40 }
 0x2be   :  { %v1400_v62 = vadd.f32 %v16395_v60, %v375_v59  ;;  %v1012_v46 = vsub.f32 %v17014_v31, %v1011_v37  ;;  %v1006_v59 = vand.u32 4294901760, %v1005_v44  ;;  %v17117_v44 = vpack.c.bf16 %v17016_v32, %v17014_v31  ;;  %v13884_v32 = vpop.f32.mrb[11].mxu1 }
 0x2c0   :  { %16482 = vtanh.f32 %v1400_v62  ;;  %v12806_v0 = vmul.f32 -1.442695, %v1400_v62  ;;  %v1013_v60 = vand.u32 4294901760, %v1012_v46 }
 0x2c2   :  { %16484 = vpow2.f32 %v12806_v0  ;;  %v1440_v0 = vand.u32 4294901760, %v17056_v50 }
 0x2c3   :  { %v990_v26 = vpop.f32.mrb[18].mxu0 }
 0x2c4   :  { %v17159_v30 = vpack.c.bf16 %v1440_v0, %v1437_v61  ;;  %v13851_v31 = vpop.f32.mrb[19].mxu0 }
 0x2ca   :  { %v16483_v63 = vpop.eup %16482 }
 0x2cb   :  { %1410 = vrot.lane.b32.xlu0 %v16483_v63, %s16621_s23  ;;  %v1020_v63 = vand.u32 4294901760, %v1019_v53  ;;  %v17145_v53 = vpack.c.bf16 %v1018_v38, %v1011_v37  ;;  %v1396_v38 = vpop.f32.mrb[12].mxu1 }
 0x2cc   :  { %v16485_v1 = vpop.eup %16484 }
 0x2cd   :  { %v1404_v9 = vadd.f32 1.0, %v16485_v1  ;;  %v17069_v1 = vpack.c.bf16 %v1006_v59, %v999_v58  ;;  %v13906_v58 = vpop.f32.mrb[13].mxu1 }
 0x2cf   :  { %16486 = vrcp.f32 %v1404_v9  ;;  %v1513_v9 = vsub.f32 %v17021_v33, %v1512_v48  ;;  %15545 = vmatpush3.bf16.msra.mxu0 %v17069_v1 }
 0x2d0   :  { %15546 = vmatprep.subr.bf16.mxu0 %v16618_v56 }
 0x2d1   :  { %v1514_v18 = vand.u32 4294901760, %v1513_v9 }
 0x2d9   :  { %v16976_v10 = vpop.eup %16486 }
 0x2da   :  { %v1408_v13 = vmul.f32 0.0, %v16976_v10 }
 0x33d   :  { %v1411_v11 = vpop.permute.xlu0 %1410 }
 0x33e   :  { %v1413_v12 = vmul.f32 %v16976_v10, %v1411_v11  ;;  %v1520_v11 = vsub.f32 %v17036_v39, %v1519_v55 }
 0x340   :  { %1415 = vrot.lane.b32.xlu0 %v1413_v12, %s16622_s24  ;;  %v17078_v12 = vsub.f32 %v17041_v40, %v1437_v61  ;;  %v1521_v19 = vand.u32 4294901760, %v1520_v11 }
 0x342   :  { %v1526_v16 = vand.u32 4294901760, %v17078_v12  ;;  %v17111_v25 = vpack.c.bf16 %v1521_v19, %v1514_v18 }
 0x344   :  { %v1527_v20 = vsub.f32 %v17078_v12, %v1526_v16  ;;  %15581 = vmatpush3.bf16.msra.mxu1 %v17111_v25 }
 0x345   :  { %15582 = vmatprep.subr.bf16.mxu1 %v16618_v56 }
 0x346   :  { %v1528_v40 = vand.u32 4294901760, %v1527_v20 }
 0x3b2   :  { %v1416_v14 = vpop.permute.xlu0 %1415 }
 0x3b3   :  { %v16981_v15 = vadd.f32 %v1416_v14, %v1408_v13  ;;  %v17083_v13 = vsub.f32 %v17056_v50, %v1440_v0  ;;  %v17086_v14 = vpack.c.bf16 %v1020_v63, %v1013_v60  ;;  %v17134_v50 = vpack.c.bf16 %v1004_v36, %v997_v35 }
 0x3b5   :  { %16488 = vtanh.f32 %v16981_v15  ;;  %v1533_v17 = vand.u32 4294901760, %v17083_v13  ;;  %15548 = vmatpush3.bf16.msra.mxu0 %v17086_v14 }
 0x3b6   :  { %15549 = vmatprep.subr.bf16.mxu0 %v16618_v56 }
 0x3b7   :  { %v1534_v21 = vsub.f32 %v17083_v13, %v1533_v17 }
 0x3b8   :  { %13861 = vmatmul.mubr.f32.vlgmr.msra.gmra.mrb[20].mxu0 %v16620_v2 }
 0x3b9   :  { %v1535_v42 = vand.u32 4294901760, %v1534_v21  ;;  %15551 = vmatpush3.bf16.msra.mxu0 %v17106_v22  ;;  %13871 = vmatprep.mubr.msk.f32.mxu0 %vm16619_vm0, %v16620_v2 }
 0x3ba   :  { %15552 = vmatprep.subr.bf16.mxu0 %v16618_v56 }
 0x3bb   :  { %v17124_v46 = vpack.c.bf16 %v1535_v42, %v1528_v40  ;;  %v17183_v42 = vpack.c.bf16 %v17036_v39, %v17021_v33 }
 0x3bd   :  { %15554 = vmatpush3.bf16.msra.mxu0 %v17117_v44  ;;  %15584 = vmatpush3.bf16.msra.mxu1 %v17124_v46 }
 0x3be   :  { %15561 = vmatprep.subr.bf16.mxu0 %v16618_v56  ;;  %15591 = vmatprep.subr.bf16.mxu1 %v16618_v56 }
 0x3bf   :  { %v16489_v62 = vpop.eup %16488 }
 0x3c0   :  { %1421 = vrot.lane.b32.xlu1 %v16489_v62, %s16621_s23  ;;  %13872 = vmatmul.mubr.f32.vlgmr.msra.gmra.mrb[22].mxu0 %v16620_v2 }
 0x3c1   :  { %15563 = vmatpush3.bf16.msra.mxu0 %v17134_v50  ;;  %13893 = vmatprep.mubr.msk.f32.mxu0 %vm16619_vm0, %v16620_v2 }
 0x3c2   :  { %15564 = vmatprep.subr.bf16.mxu0 %v16618_v56 }
 0x3c5   :  { %15566 = vmatpush3.bf16.msra.mxu0 %v17145_v53 }
 0x3c6   :  { %15573 = vmatprep.subr.bf16.mxu0 %v16618_v56 }
 0x3c8   :  { %13894 = vmatmul.mubr.f32.vlgmr.msra.gmra.mrb[24].mxu0 %v16620_v2 }
 0x3c9   :  { %15575 = vmatpush3.bf16.msra.mxu0 %v17155_v29  ;;  %13915 = vmatprep.mubr.msk.f32.mxu0 %vm16619_vm0, %v16620_v2 }
 0x3ca   :  { %15576 = vmatprep.subr.bf16.mxu0 %v16618_v56 }
 0x3cd   :  { %15578 = vmatpush3.bf16.msra.mxu0 %v17159_v30 }
 0x3ce   :  { %15585 = vmatprep.subr.bf16.mxu0 %v16618_v56 }
 0x432   :  { %v1422_v23 = vpop.permute.xlu1 %1421 }
 0x433   :  { %v1424_v24 = vmul.f32 %v16976_v10, %v1422_v23 }
 0x435   :  { %1426 = vrot.lane.b32.xlu1 %v1424_v24, %s16622_s24  ;;  %v17190_v24 = vpack.c.bf16 %v17083_v13, %v17078_v12 }
 0x48b   :  { %v1081_v35 = vpop.f32.mrb[20].mxu0 }
 0x48c   :  { %v1082_v36 = vadd.f32 %v1081_v35, %v990_v26  ;;  %v13862_v37 = vpop.f32.mrb[21].mxu0  ;;  %v17204_v26 = vpack.c.bf16 %v1519_v55, %v1512_v48 }
 0x493   :  { %v1161_v59 = vpop.f32.mrb[22].mxu0 }
 0x494   :  { %v1162_v60 = vadd.f32 %v1161_v59, %v1082_v36  ;;  %v13873_v61 = vpop.f32.mrb[23].mxu0 }
 0x495   :  { %v17277_v61 = vld [vmem:[%s18364_s0 + $0x1f8] ss:$0 sm:$0xff] }
 0x496   :  { %v1239_v63 = vadd.f32 %v1238_v27, %v1162_v60  ;;  %v17214_v27 = vpack.c.bf16 %v1533_v17, %v1526_v16 }
 0x49b   :  { %v1321_v11 = vpop.f32.mrb[24].mxu0 }
 0x49c   :  { %v1322_v19 = vadd.f32 %v1321_v11, %v1239_v63  ;;  %v13895_v20 = vpop.f32.mrb[25].mxu0 }
 0x49e   :  { %v17178_v40 = vadd.f32 %v1396_v38, %v1322_v19 }
 0x4a7   :  { %v1427_v62 = vpop.permute.xlu1 %1426 }
 0x4a8   :  { %v1428_v0 = vsel %vm426_vm1, %v1427_v62, 0 }
 0x4a9   :  { %v17170_v10 = vand.u32 4294901760, %v1428_v0 }
 0x4ab   :  { %v1500_v9 = vsub.f32 %v1428_v0, %v17170_v10  ;;  %13927 = vmatmul.mubr.f32.vlgmr.msra.gmra.mrb[14].mxu1 %v17170_v10 }
 0x4ac   :  { %15593 = vmatpush3.bf16.msra.mxu1 %v17155_v29  ;;  %13948 = vmatprep.mubr.msk.f32.mxu1 %vm16619_vm0, %v16620_v2 }
 0x4ad   :  { %15594 = vmatprep.subr.bf16.mxu1 %v16618_v56  ;;  %v1501_v18 = vand.u32 4294901760, %v1500_v9 }
 0x4af   :  { %v1502_v21 = vsub.f32 %v1500_v9, %v1501_v18 }
 0x4b0   :  { %15596 = vmatpush3.bf16.msra.mxu1 %v17159_v30 }
 0x4b1   :  { %15603 = vmatprep.subr.bf16.mxu1 %v16618_v56  ;;  %v1503_v23 = vand.u32 4294901760, %v1502_v21 }
 0x4b3   :  { %13949 = vmatmul.mubr.f32.vlgmr.msra.gmra.mrb[16].mxu1 %v1501_v18  ;;  %13916 = vmatmul.mubr.f32.vlgmr.msra.gmra.mrb[26].mxu0 %v1503_v23 }
 0x4b4   :  { %15587 = vmatpush3.bf16.msra.mxu0 %v17183_v42  ;;  %15605 = vmatpush3.bf16.msra.mxu1 %v17155_v29 }
 0x4b5   :  { %15588 = vmatprep.subr.bf16.mxu0 %v16618_v56  ;;  %15606 = vmatprep.subr.bf16.mxu1 %v16618_v56 }
 0x4b6   :  { %13937 = vmatprep.mubr.msk.f32.mxu0 %vm16619_vm0, %v16620_v2  ;;  %13970 = vmatprep.mubr.msk.f32.mxu1 %vm16619_vm0, %v16620_v2 }
 0x4b8   :  { %15590 = vmatpush3.bf16.msra.mxu0 %v17190_v24  ;;  %15608 = vmatpush3.bf16.msra.mxu1 %v17159_v30 }
 0x4b9   :  { %15597 = vmatprep.subr.bf16.mxu0 %v16618_v56  ;;  %15645 = vmatprep.subr.bf16.mxu1 %v16618_v56 }
 0x4bb   :  { %13938 = vmatmul.mubr.f32.vlgmr.msra.gmra.mrb[28].mxu0 %v1500_v9  ;;  %13971 = vmatmul.mubr.f32.vlgmr.msra.gmra.mrb[18].mxu1 %v17170_v10 }
 0x4bc   :  { %15599 = vmatpush3.bf16.msra.mxu0 %v17204_v26  ;;  %13959 = vmatprep.mubr.msk.f32.mxu0 %vm16619_vm0, %v16620_v2 }
 0x4bd   :  { %15600 = vmatprep.subr.bf16.mxu0 %v16618_v56  ;;  %15647 = vmatpush3.bf16.msra.mxu1 %v17008_v28 }
 0x4be   :  { %15648 = vmatprep.subr.bf16.mxu1 %v16618_v56  ;;  %14047 = vmatprep.mubr.msk.f32.mxu1 %vm16619_vm0, %v16620_v2 }
 0x4c0   :  { %15602 = vmatpush3.bf16.msra.mxu0 %v17214_v27 }
 0x4c1   :  { %15609 = vmatprep.subr.bf16.mxu0 %v16618_v56  ;;  %15650 = vmatpush3.bf16.msra.mxu1 %v17024_v34 }
 0x4c2   :  { %15651 = vmatprep.subr.bf16.mxu1 %v16618_v56 }
 0x4c3   :  { %13960 = vmatmul.mubr.f32.vlgmr.msra.gmra.mrb[30].mxu0 %v17170_v10 }
 0x4c4   :  { %15611 = vmatpush3.bf16.msra.mxu0 %v16893_v5  ;;  %13981 = vmatprep.mubr.msk.f32.mxu0 %vm16619_vm0, %v16620_v2 }
 0x4c5   :  { %15612 = vmatprep.subr.bf16.mxu0 %v16618_v56 }
 0x4c8   :  { %15614 = vmatpush3.bf16.msra.mxu0 %v16902_v6 }
 0x4c9   :  { %15615 = vmatprep.subr.bf16.mxu0 %v16618_v56 }
 0x4cb   :  { %13982 = vmatmul.mubr.f32.vlgmr.msra.gmra.mrb[32].mxu0 %v1503_v23 }
 0x4cc   :  { %15617 = vmatpush3.bf16.msra.mxu0 %v16866_v43  ;;  %13992 = vmatprep.mubr.msk.f32.mxu0 %vm16619_vm0, %v16620_v2 }
 0x4cd   :  { %15618 = vmatprep.subr.bf16.mxu0 %v16618_v56 }
 0x4d0   :  { %15620 = vmatpush3.bf16.msra.mxu0 %v16869_v52 }
 0x4d1   :  { %15621 = vmatprep.subr.bf16.mxu0 %v16618_v56 }
 0x4d3   :  { %13993 = vmatmul.mubr.f32.vlgmr.msra.gmra.mrb[32].mxu0 %v17170_v10 }
 0x4d4   :  { %15623 = vmatpush3.bf16.msra.mxu0 %v16878_v3  ;;  %14003 = vmatprep.mubr.msk.f32.mxu0 %vm16619_vm0, %v16620_v2 }
 0x4d5   :  { %15624 = vmatprep.subr.bf16.mxu0 %v16618_v56 }
 0x4d8   :  { %15626 = vmatpush3.bf16.msra.mxu0 %v16884_v4 }
 0x4d9   :  { %15627 = vmatprep.subr.bf16.mxu0 %v16618_v56 }
 0x4db   :  { %14004 = vmatmul.mubr.f32.vlgmr.msra.gmra.mrb[32].mxu0 %v1500_v9 }
 0x4dc   :  { %15629 = vmatpush3.bf16.msra.mxu0 %v16893_v5  ;;  %14014 = vmatprep.mubr.msk.f32.mxu0 %vm16619_vm0, %v16620_v2 }
 0x4dd   :  { %15630 = vmatprep.subr.bf16.mxu0 %v16618_v56 }
 0x4e0   :  { %15632 = vmatpush3.bf16.msra.mxu0 %v16902_v6 }
 0x4e1   :  { %15633 = vmatprep.subr.bf16.mxu0 %v16618_v56 }
 0x4e3   :  { %14015 = vmatmul.mubr.f32.vlgmr.msra.gmra.mrb[32].mxu0 %v1501_v18 }
 0x4e4   :  { %15635 = vmatpush3.bf16.msra.mxu0 %v16913_v7  ;;  %14025 = vmatprep.mubr.msk.f32.mxu0 %vm16619_vm0, %v16620_v2 }
 0x4e5   :  { %15636 = vmatprep.subr.bf16.mxu0 %v16618_v56 }
 0x4e8   :  { %15638 = vmatpush3.bf16.msra.mxu0 %v16922_v8 }
 0x4e9   :  { %15639 = vmatprep.subr.bf16.mxu0 %v16618_v56 }
 0x4eb   :  { %14026 = vmatmul.mubr.f32.vlgmr.msra.gmra.mrb[32].mxu0 %v17170_v10 }
 0x4ec   :  { %15641 = vmatpush3.bf16.msra.mxu0 %v16893_v5  ;;  %14036 = vmatprep.mubr.msk.f32.mxu0 %vm16619_vm0, %v16620_v2 }
 0x4ed   :  { %15642 = vmatprep.subr.bf16.mxu0 %v16618_v56 }
 0x4f0   :  { %15644 = vmatpush3.bf16.msra.mxu0 %v16902_v6 }
 0x4f1   :  { %15681 = vmatprep.subr.bf16.mxu0 %v16618_v56 }
 0x4f3   :  { %14037 = vmatmul.mubr.f32.vlgmr.msra.gmra.mrb[32].mxu0 %v17170_v10 }
 0x4f4   :  { %15683 = vmatpush3.bf16.msra.mxu0 %v17155_v29  ;;  %14113 = vmatprep.mubr.msk.f32.mxu0 %vm16619_vm0, %v16620_v2 }
 0x4f5   :  { %15684 = vmatprep.subr.bf16.mxu0 %v16618_v56 }
 0x4f8   :  { %15686 = vmatpush3.bf16.msra.mxu0 %v17159_v30 }
 0x4f9   :  { %15693 = vmatprep.subr.bf16.mxu0 %v16618_v56 }
 0x57e   :  { %v1596_v33 = vpop.f32.mrb[14].mxu1 }
 0x57f   :  { %v13928_v39 = vpop.f32.mrb[15].mxu1 }
 0x586   :  { %v1753_v48 = vpop.f32.mrb[16].mxu1  ;;  %v1505_v55 = vpop.f32.mrb[26].mxu0 }
 0x587   :  { %v1506_v12 = vadd.f32 %v1505_v55, %v17178_v40  ;;  %v13950_v13 = vpop.f32.mrb[17].mxu1  ;;  %v13917_v16 = vpop.f32.mrb[27].mxu0 }
 0x589   :  { %v1597_v17 = vadd.f32 %v1596_v33, %v1506_v12 }
 0x58e   :  { %v1676_v31 = vpop.f32.mrb[28].mxu0  ;;  %v1911_v32 = vpop.f32.mrb[18].mxu1 }
 0x58f   :  { %v1677_v35 = vadd.f32 %v1676_v31, %v1597_v17  ;;  %v13939_v36 = vpop.f32.mrb[29].mxu0  ;;  %v13972_v37 = vpop.f32.mrb[19].mxu1 }
 0x591   :  { %v1754_v38 = vadd.f32 %v1753_v48, %v1677_v35 }
 0x596   :  { %v1836_v58 = vpop.f32.mrb[30].mxu0 }
 0x597   :  { %v1837_v59 = vadd.f32 %v1836_v58, %v1754_v38  ;;  %v13961_v60 = vpop.f32.mrb[31].mxu0 }
 0x599   :  { %v1912_v62 = vadd.f32 %v1911_v32, %v1837_v59 }
 0x59b   :  { %v1919_v63 = vadd.f32 %v17277_v61, %v1912_v62 }
 0x59d   :  { %16490 = vtanh.f32 %v1919_v63  ;;  %v12808_v19 = vmul.f32 -1.442695, %v1919_v63 }
 0x5a7   :  { %v16491_v0 = vpop.eup %16490 }
 0x5a8   :  { %1929 = vrot.lane.b32.xlu0 %v16491_v0, %s16621_s23 }
 0x5c6   :  { %v2425_v10 = vpop.f32.mrb[32].mxu0 }
 0x5c7   :  { %v2919_v9 = vadd.f32 %v2425_v10, %v16961_v41  ;;  %v14038_v11 = vpop.f32.mrb[33].mxu0 }
 0x5c9   :  { %16492 = vtanh.f32 %v2919_v9  ;;  %v12809_v39 = vmul.f32 -1.442695, %v2919_v9 }
 0x5ca   :  { %16494 = vpow2.f32 %v12808_v19 }
 0x5d3   :  { %v16493_v18 = vpop.eup %16492 }
 0x5d4   :  { %2929 = vrot.lane.b32.xlu1 %v16493_v18, %s16621_s23  ;;  %v16495_v20 = vpop.eup %16494 }
 0x5d5   :  { %v1923_v21 = vadd.f32 1.0, %v16495_v20 }
 0x5d7   :  { %16496 = vrcp.f32 %v1923_v21 }
 0x5d8   :  { %16498 = vpow2.f32 %v12809_v39 }
 0x5e1   :  { %v16497_v40 = vpop.eup %16496 }
 0x5e2   :  { %v16499_v48 = vpop.eup %16498  ;;  %v1927_v16 = vmul.f32 0.0, %v16497_v40 }
 0x5e3   :  { %v2923_v55 = vadd.f32 1.0, %v16499_v48 }
 0x5e5   :  { %16500 = vrcp.f32 %v2923_v55 }
 0x5ef   :  { %v16501_v41 = vpop.eup %16500 }
 0x5f0   :  { %v2927_v35 = vmul.f32 %v16501_v41, %v16981_v15 }
 0x61a   :  { %v1930_v23 = vpop.permute.xlu0 %1929 }
 0x61b   :  { %v1932_v33 = vmul.f32 %v16497_v40, %v1930_v23 }
 0x61d   :  { %1934 = vrot.lane.b32.xlu0 %v1932_v33, %s16622_s24 }
 0x646   :  { %v2930_v12 = vpop.permute.xlu1 %2929 }
 0x647   :  { %v2932_v13 = vmul.f32 %v16501_v41, %v2930_v12 }
 0x649   :  { %2934 = vrot.lane.b32.xlu1 %v2932_v13, %s16622_s24 }
 0x68f   :  { %v1935_v17 = vpop.permute.xlu0 %1934 }
 0x690   :  { %v17285_v31 = vadd.f32 %v1935_v17, %v1927_v16 }
 0x692   :  { %16502 = vtanh.f32 %v17285_v31 }
 0x69c   :  { %v16503_v32 = vpop.eup %16502 }
 0x69d   :  { %1940 = vrot.lane.b32.xlu0 %v16503_v32, %s16621_s23 }
 0x6bb   :  { %v2935_v36 = vpop.permute.xlu1 %2934 }
 0x6bc   :  { %v17290_v37 = vadd.f32 %v2935_v36, %v2927_v35 }
 0x6be   :  { %16504 = vtanh.f32 %v17290_v37 }
 0x6c8   :  { %v16505_v38 = vpop.eup %16504 }
 0x6c9   :  { %2940 = vrot.lane.b32.xlu1 %v16505_v38, %s16621_s23 }
 0x70f   :  { %v1941_v58 = vpop.permute.xlu0 %1940 }
 0x710   :  { %v1943_v59 = vmul.f32 %v16497_v40, %v1941_v58 }
 0x712   :  { %2430 = vrot.lane.b32.xlu0 %v1943_v59, %s16622_s24 }
 0x73b   :  { %v2941_v60 = vpop.permute.xlu1 %2940 }
 0x73c   :  { %v2943_v62 = vmul.f32 %v16501_v41, %v2941_v60 }
 0x73e   :  { %2945 = vrot.lane.b32.xlu1 %v2943_v62, %s16622_s24 }
 0x784   :  { %v2431_v63 = vpop.permute.xlu0 %2430 }
 0x785   :  { %v2432_v0 = vsel %vm426_vm1, %v2431_v63, 0 }
 0x786   :  { %v2503_v15 = vand.u32 4294901760, %v2432_v0 }
 0x788   :  { %v2504_v10 = vsub.f32 %v2432_v0, %v2503_v15 }
 0x78a   :  { %v2505_v9 = vand.u32 4294901760, %v2504_v10 }
 0x78c   :  { %v2506_v11 = vsub.f32 %v2504_v10, %v2505_v9 }
 0x78e   :  { %v2507_v18 = vand.u32 4294901760, %v2506_v11 }
 0x790   :  { %14048 = vmatmul.mubr.f32.vlgmr.msra.gmra.mrb[20].mxu1 %v2507_v18 }
 0x791   :  { %15653 = vmatpush3.bf16.msra.mxu1 %v17069_v1  ;;  %14058 = vmatprep.mubr.msk.f32.mxu1 %vm16619_vm0, %v16620_v2 }
 0x792   :  { %15654 = vmatprep.subr.bf16.mxu1 %v16618_v56 }
 0x795   :  { %15656 = vmatpush3.bf16.msra.mxu1 %v17086_v14 }
 0x796   :  { %15657 = vmatprep.subr.bf16.mxu1 %v16618_v56 }
 0x798   :  { %14059 = vmatmul.mubr.f32.vlgmr.msra.gmra.mrb[22].mxu1 %v2503_v15 }
 0x799   :  { %15659 = vmatpush3.bf16.msra.mxu1 %v17106_v22  ;;  %14069 = vmatprep.mubr.msk.f32.mxu1 %vm16619_vm0, %v16620_v2 }
 0x79a   :  { %15660 = vmatprep.subr.bf16.mxu1 %v16618_v56 }
 0x79d   :  { %15662 = vmatpush3.bf16.msra.mxu1 %v17117_v44 }
 0x79e   :  { %15663 = vmatprep.subr.bf16.mxu1 %v16618_v56 }
 0x7a0   :  { %14070 = vmatmul.mubr.f32.vlgmr.msra.gmra.mrb[24].mxu1 %v2504_v10 }
 0x7a1   :  { %15665 = vmatpush3.bf16.msra.mxu1 %v17008_v28  ;;  %14080 = vmatprep.mubr.msk.f32.mxu1 %vm16619_vm0, %v16620_v2 }
 0x7a2   :  { %15666 = vmatprep.subr.bf16.mxu1 %v16618_v56 }
 0x7a5   :  { %15668 = vmatpush3.bf16.msra.mxu1 %v17024_v34 }
 0x7a6   :  { %15669 = vmatprep.subr.bf16.mxu1 %v16618_v56 }
 0x7a8   :  { %14081 = vmatmul.mubr.f32.vlgmr.msra.gmra.mrb[26].mxu1 %v2505_v9 }
 0x7a9   :  { %15671 = vmatpush3.bf16.msra.mxu1 %v17134_v50  ;;  %14091 = vmatprep.mubr.msk.f32.mxu1 %vm16619_vm0, %v16620_v2 }
 0x7aa   :  { %15672 = vmatprep.subr.bf16.mxu1 %v16618_v56 }
 0x7ad   :  { %15674 = vmatpush3.bf16.msra.mxu1 %v17145_v53 }
 0x7ae   :  { %15675 = vmatprep.subr.bf16.mxu1 %v16618_v56 }
 0x7b0   :  { %14092 = vmatmul.mubr.f32.vlgmr.msra.gmra.mrb[28].mxu1 %v2503_v15  ;;  %v2946_v19 = vpop.permute.xlu1 %2945 }
 0x7b1   :  { %15677 = vmatpush3.bf16.msra.mxu1 %v17008_v28  ;;  %v2947_v20 = vsel %vm426_vm1, %v2946_v19, 0  ;;  %14102 = vmatprep.mubr.msk.f32.mxu1 %vm16619_vm0, %v16620_v2 }
 0x7b2   :  { %v17325_v21 = vand.u32 4294901760, %v2947_v20  ;;  %15678 = vmatprep.subr.bf16.mxu1 %v16618_v56 }
 0x7b4   :  { %v3019_v40 = vsub.f32 %v2947_v20, %v17325_v21 }
 0x7b5   :  { %15680 = vmatpush3.bf16.msra.mxu1 %v17024_v34 }
 0x7b6   :  { %v17330_v23 = vand.u32 4294901760, %v3019_v40  ;;  %15687 = vmatprep.subr.bf16.mxu1 %v16618_v56 }
 0x7b8   :  { %14103 = vmatmul.mubr.f32.vlgmr.msra.gmra.mrb[30].mxu1 %v2503_v15  ;;  %v3021_v33 = vsub.f32 %v3019_v40, %v17330_v23 }
 0x7b9   :  { %15689 = vmatpush3.bf16.msra.mxu1 %v17111_v25  ;;  %14124 = vmatprep.mubr.msk.f32.mxu1 %vm16619_vm0, %v16620_v2 }
 0x7ba   :  { %15690 = vmatprep.subr.bf16.mxu1 %v16618_v56  ;;  %v3022_v39 = vand.u32 4294901760, %v3021_v33 }
 0x7bc   :  { %14114 = vmatmul.mubr.f32.vlgmr.msra.gmra.mrb[34].mxu0 %v3022_v39 }
 0x7bd   :  { %15692 = vmatpush3.bf16.msra.mxu1 %v17124_v46  ;;  %15695 = vmatpush3.bf16.msra.mxu0 %v17183_v42 }
 0x7be   :  { %15696 = vmatprep.subr.bf16.mxu0 %v16618_v56  ;;  %15699 = vmatprep.subr.bf16.mxu1 %v16618_v56 }
 0x7bf   :  { %14135 = vmatprep.mubr.msk.f32.mxu0 %vm16619_vm0, %v16620_v2 }
 0x7c0   :  { %14125 = vmatmul.mubr.f32.vlgmr.msra.gmra.mrb[32].mxu1 %v17325_v21 }
 0x7c1   :  { %15698 = vmatpush3.bf16.msra.mxu0 %v17190_v24  ;;  %15701 = vmatpush3.bf16.msra.mxu1 %v17155_v29 }
 0x7c2   :  { %15702 = vmatprep.subr.bf16.mxu1 %v16618_v56  ;;  %15705 = vmatprep.subr.bf16.mxu0 %v16618_v56 }
 0x7c3   :  { %14146 = vmatprep.mubr.msk.f32.mxu1 %vm16619_vm0, %v16620_v2 }
 0x7c4   :  { %14136 = vmatmul.mubr.f32.vlgmr.msra.gmra.mrb[36].mxu0 %v3019_v40 }
 0x7c5   :  { %15704 = vmatpush3.bf16.msra.mxu1 %v17159_v30  ;;  %15707 = vmatpush3.bf16.msra.mxu0 %v17204_v26 }
 0x7c6   :  { %15708 = vmatprep.subr.bf16.mxu0 %v16618_v56  ;;  %15711 = vmatprep.subr.bf16.mxu1 %v16618_v56 }
 0x7c7   :  { %14157 = vmatprep.mubr.msk.f32.mxu0 %vm16619_vm0, %v16620_v2 }
 0x7c8   :  { %14147 = vmatmul.mubr.f32.vlgmr.msra.gmra.mrb[34].mxu1 %v17330_v23 }
 0x7c9   :  { %15710 = vmatpush3.bf16.msra.mxu0 %v17214_v27  ;;  %15713 = vmatpush3.bf16.msra.mxu1 %v17155_v29 }
 0x7ca   :  { %15714 = vmatprep.subr.bf16.mxu1 %v16618_v56  ;;  %15717 = vmatprep.subr.bf16.mxu0 %v16618_v56 }
 0x7cb   :  { %14168 = vmatprep.mubr.msk.f32.mxu1 %vm16619_vm0, %v16620_v2 }
 0x7cc   :  { %14158 = vmatmul.mubr.f32.vlgmr.msra.gmra.mrb[38].mxu0 %v17325_v21 }
 0x7cd   :  { %15716 = vmatpush3.bf16.msra.mxu1 %v17159_v30  ;;  %15719 = vmatpush3.bf16.msra.mxu0 %v16893_v5 }
 0x7ce   :  { %15720 = vmatprep.subr.bf16.mxu0 %v16618_v56  ;;  %14179 = vmatprep.mubr.msk.f32.mxu0 %vm16619_vm0, %v16620_v2 }
 0x7cf   :  { %15753 = vmatprep.subr.bf16.mxu1 %v16618_v56 }
 0x7d0   :  { %14169 = vmatmul.mubr.f32.vlgmr.msra.gmra.mrb[36].mxu1 %v17325_v21 }
 0x7d1   :  { %15722 = vmatpush3.bf16.msra.mxu0 %v16902_v6  ;;  %15755 = vmatpush3.bf16.msra.mxu1 %v17008_v28 }
 0x7d2   :  { %15723 = vmatprep.subr.bf16.mxu0 %v16618_v56  ;;  %15756 = vmatprep.subr.bf16.mxu1 %v16618_v56 }
 0x7d3   :  { %14245 = vmatprep.mubr.msk.f32.mxu1 %vm16619_vm0, %v16620_v2 }
 0x7d4   :  { %14180 = vmatmul.mubr.f32.vlgmr.msra.gmra.mrb[40].mxu0 %v3022_v39 }
 0x7d5   :  { %15725 = vmatpush3.bf16.msra.mxu0 %v16866_v43  ;;  %14190 = vmatprep.mubr.msk.f32.mxu0 %vm16619_vm0, %v16620_v2 }
 0x7d6   :  { %15726 = vmatprep.subr.bf16.mxu0 %v16618_v56  ;;  %15758 = vmatpush3.bf16.msra.mxu1 %v17024_v34 }
 0x7d7   :  { %15759 = vmatprep.subr.bf16.mxu1 %v16618_v56 }
 0x7d9   :  { %15728 = vmatpush3.bf16.msra.mxu0 %v16869_v52 }
 0x7da   :  { %15729 = vmatprep.subr.bf16.mxu0 %v16618_v56 }
 0x7dc   :  { %14191 = vmatmul.mubr.f32.vlgmr.msra.gmra.mrb[40].mxu0 %v17325_v21 }
 0x7dd   :  { %15731 = vmatpush3.bf16.msra.mxu0 %v16878_v3  ;;  %14201 = vmatprep.mubr.msk.f32.mxu0 %vm16619_vm0, %v16620_v2 }
 0x7de   :  { %15732 = vmatprep.subr.bf16.mxu0 %v16618_v56 }
 0x7e1   :  { %15734 = vmatpush3.bf16.msra.mxu0 %v16884_v4 }
 0x7e2   :  { %15735 = vmatprep.subr.bf16.mxu0 %v16618_v56 }
 0x7e4   :  { %14202 = vmatmul.mubr.f32.vlgmr.msra.gmra.mrb[40].mxu0 %v3019_v40 }
 0x7e5   :  { %15737 = vmatpush3.bf16.msra.mxu0 %v16893_v5  ;;  %14212 = vmatprep.mubr.msk.f32.mxu0 %vm16619_vm0, %v16620_v2 }
 0x7e6   :  { %15738 = vmatprep.subr.bf16.mxu0 %v16618_v56 }
 0x7e9   :  { %15740 = vmatpush3.bf16.msra.mxu0 %v16902_v6 }
 0x7ea   :  { %15741 = vmatprep.subr.bf16.mxu0 %v16618_v56 }
 0x7ec   :  { %14213 = vmatmul.mubr.f32.vlgmr.msra.gmra.mrb[40].mxu0 %v17330_v23 }
 0x7ed   :  { %15743 = vmatpush3.bf16.msra.mxu0 %v16913_v7  ;;  %14223 = vmatprep.mubr.msk.f32.mxu0 %vm16619_vm0, %v16620_v2 }
 0x7ee   :  { %15744 = vmatprep.subr.bf16.mxu0 %v16618_v56 }
 0x7f1   :  { %15746 = vmatpush3.bf16.msra.mxu0 %v16922_v8 }
 0x7f2   :  { %15747 = vmatprep.subr.bf16.mxu0 %v16618_v56 }
 0x7f4   :  { %14224 = vmatmul.mubr.f32.vlgmr.msra.gmra.mrb[40].mxu0 %v17325_v21 }
 0x7f5   :  { %15749 = vmatpush3.bf16.msra.mxu0 %v16893_v5  ;;  %14234 = vmatprep.mubr.msk.f32.mxu0 %vm16619_vm0, %v16620_v2 }
 0x7f6   :  { %15750 = vmatprep.subr.bf16.mxu0 %v16618_v56 }
 0x7f9   :  { %15752 = vmatpush3.bf16.msra.mxu0 %v16902_v6 }
 0x7fa   :  { %15789 = vmatprep.subr.bf16.mxu0 %v16618_v56 }
 0x7fc   :  { %14235 = vmatmul.mubr.f32.vlgmr.msra.gmra.mrb[40].mxu0 %v17325_v21 }
 0x7fd   :  { %15791 = vmatpush3.bf16.msra.mxu0 %v17155_v29  ;;  %14311 = vmatprep.mubr.msk.f32.mxu0 %vm16619_vm0, %v16620_v2 }
 0x7fe   :  { %15792 = vmatprep.subr.bf16.mxu0 %v16618_v56 }
 0x801   :  { %15794 = vmatpush3.bf16.msra.mxu0 %v17159_v30 }
 0x802   :  { %15801 = vmatprep.subr.bf16.mxu0 %v16618_v56 }
 0x863   :  { %v2509_v48 = vpop.f32.mrb[20].mxu1 }
 0x864   :  { %v14049_v55 = vpop.f32.mrb[21].mxu1 }
 0x86b   :  { %v2600_v41 = vpop.f32.mrb[22].mxu1 }
 0x86c   :  { %v2601_v12 = vadd.f32 %v2600_v41, %v2509_v48  ;;  %v14060_v13 = vpop.f32.mrb[23].mxu1 }
 0x873   :  { %v2680_v16 = vpop.f32.mrb[24].mxu1 }
 0x874   :  { %v2681_v17 = vadd.f32 %v2680_v16, %v2601_v12  ;;  %v14071_v32 = vpop.f32.mrb[25].mxu1 }
 0x87b   :  { %v2757_v35 = vpop.f32.mrb[26].mxu1 }
 0x87c   :  { %v2758_v36 = vadd.f32 %v2757_v35, %v2681_v17  ;;  %v14082_v38 = vpop.f32.mrb[27].mxu1 }
 0x883   :  { %v2840_v58 = vpop.f32.mrb[28].mxu1 }
 0x884   :  { %v2841_v59 = vadd.f32 %v2840_v58, %v2758_v36  ;;  %v14093_v60 = vpop.f32.mrb[29].mxu1 }
 0x88b   :  { %v2915_v62 = vpop.f32.mrb[30].mxu1 }
 0x88c   :  { %v2916_v63 = vadd.f32 %v2915_v62, %v2841_v59  ;;  %v14104_v0 = vpop.f32.mrb[31].mxu1 }
 0x88f   :  { %v3024_v15 = vpop.f32.mrb[34].mxu0 }
 0x890   :  { %v3025_v10 = vadd.f32 %v3024_v15, %v2916_v63  ;;  %v14115_v9 = vpop.f32.mrb[35].mxu0 }
 0x893   :  { %v3115_v11 = vpop.f32.mrb[32].mxu1 }
 0x894   :  { %v3116_v18 = vadd.f32 %v3115_v11, %v3025_v10  ;;  %v14126_v19 = vpop.f32.mrb[33].mxu1 }
 0x897   :  { %v3195_v20 = vpop.f32.mrb[36].mxu0 }
 0x898   :  { %v3196_v21 = vadd.f32 %v3195_v20, %v3116_v18  ;;  %v14137_v40 = vpop.f32.mrb[37].mxu0 }
 0x89b   :  { %v3272_v23 = vpop.f32.mrb[34].mxu1 }
 0x89c   :  { %v3273_v33 = vadd.f32 %v3272_v23, %v3196_v21  ;;  %v14148_v39 = vpop.f32.mrb[35].mxu1 }
 0x89f   :  { %v3355_v48 = vpop.f32.mrb[38].mxu0 }
 0x8a0   :  { %v3356_v55 = vadd.f32 %v3355_v48, %v3273_v33  ;;  %v14159_v41 = vpop.f32.mrb[39].mxu0 }
 0x8a3   :  { %v3430_v12 = vpop.f32.mrb[36].mxu1 }
 0x8a4   :  { %v3431_v13 = vadd.f32 %v3430_v12, %v3356_v55  ;;  %v14170_v16 = vpop.f32.mrb[37].mxu1 }
 0x8a6   :  { %v3434_v17 = vadd.f32 %v17277_v61, %v3431_v13 }
 0x8a8   :  { %16506 = vtanh.f32 %v3434_v17  ;;  %v12810_v59 = vmul.f32 -1.442695, %v3434_v17 }
 0x8b2   :  { %v16507_v32 = vpop.eup %16506 }
 0x8b3   :  { %3444 = vrot.lane.b32.xlu0 %v16507_v32, %s16621_s23 }
 0x8cf   :  { %v3940_v35 = vpop.f32.mrb[40].mxu0 }
 0x8d0   :  { %v4434_v36 = vadd.f32 %v3940_v35, %v16965_v47  ;;  %v14236_v38 = vpop.f32.mrb[41].mxu0 }
 0x8d2   :  { %16508 = vtanh.f32 %v4434_v36  ;;  %v12811_v10 = vmul.f32 -1.442695, %v4434_v36 }
 0x8d3   :  { %16510 = vpow2.f32 %v12810_v59 }
 0x8dc   :  { %v16509_v58 = vpop.eup %16508 }
 0x8dd   :  { %4444 = vrot.lane.b32.xlu1 %v16509_v58, %s16621_s23  ;;  %v16511_v60 = vpop.eup %16510 }
 0x8de   :  { %v3438_v62 = vadd.f32 1.0, %v16511_v60 }
 0x8e0   :  { %16512 = vrcp.f32 %v3438_v62 }
 0x8e1   :  { %16514 = vpow2.f32 %v12811_v10 }
 0x8ea   :  { %v16513_v63 = vpop.eup %16512 }
 0x8eb   :  { %v16515_v9 = vpop.eup %16514  ;;  %v3442_v20 = vmul.f32 %v16513_v63, %v17285_v31 }
 0x8ec   :  { %v4438_v11 = vadd.f32 1.0, %v16515_v9 }
 0x8ee   :  { %16516 = vrcp.f32 %v4438_v11 }
 0x8f8   :  { %v16517_v47 = vpop.eup %16516 }
 0x8f9   :  { %v4442_v33 = vmul.f32 %v16517_v47, %v17290_v37 }
 0x925   :  { %v3445_v0 = vpop.permute.xlu0 %3444 }
 0x926   :  { %v3447_v15 = vmul.f32 %v16513_v63, %v3445_v0 }
 0x928   :  { %3449 = vrot.lane.b32.xlu0 %v3447_v15, %s16622_s24 }
 0x94f   :  { %v4445_v18 = vpop.permute.xlu1 %4444 }
 0x950   :  { %v4447_v19 = vmul.f32 %v16517_v47, %v4445_v18 }
 0x952   :  { %4449 = vrot.lane.b32.xlu1 %v4447_v19, %s16622_s24 }
 0x99a   :  { %v3450_v21 = vpop.permute.xlu0 %3449 }
 0x99b   :  { %v17427_v40 = vadd.f32 %v3450_v21, %v3442_v20 }
 0x99d   :  { %16518 = vtanh.f32 %v17427_v40 }
 0x9a7   :  { %v16519_v23 = vpop.eup %16518 }
 0x9a8   :  { %3455 = vrot.lane.b32.xlu0 %v16519_v23, %s16621_s23 }
 0x9c4   :  { %v4450_v39 = vpop.permute.xlu1 %4449 }
 0x9c5   :  { %v17432_v48 = vadd.f32 %v4450_v39, %v4442_v33 }
 0x9c7   :  { %16520 = vtanh.f32 %v17432_v48 }
 0x9d1   :  { %v16521_v55 = vpop.eup %16520 }
 0x9d2   :  { %4455 = vrot.lane.b32.xlu1 %v16521_v55, %s16621_s23 }
 0xa1a   :  { %v3456_v41 = vpop.permute.xlu0 %3455 }
 0xa1b   :  { %v3458_v31 = vmul.f32 %v16513_v63, %v3456_v41 }
 0xa1d   :  { %3945 = vrot.lane.b32.xlu0 %v3458_v31, %s16622_s24 }
 0xa44   :  { %v4456_v12 = vpop.permute.xlu1 %4455 }
 0xa45   :  { %v4458_v13 = vmul.f32 %v16517_v47, %v4456_v12 }
 0xa47   :  { %4460 = vrot.lane.b32.xlu1 %v4458_v13, %s16622_s24 }
 0xa8f   :  { %v3946_v16 = vpop.permute.xlu0 %3945 }
 0xa90   :  { %v3947_v17 = vsel %vm426_vm1, %v3946_v16, 0 }
 0xa91   :  { %v4018_v37 = vand.u32 4294901760, %v3947_v17 }
 0xa93   :  { %v4019_v32 = vsub.f32 %v3947_v17, %v4018_v37 }
 0xa95   :  { %v4020_v35 = vand.u32 4294901760, %v4019_v32 }
 0xa97   :  { %v4021_v36 = vsub.f32 %v4019_v32, %v4020_v35 }
 0xa99   :  { %v4022_v38 = vand.u32 4294901760, %v4021_v36 }
 0xa9b   :  { %14246 = vmatmul.mubr.f32.vlgmr.msra.gmra.mrb[38].mxu1 %v4022_v38 }
 0xa9c   :  { %15761 = vmatpush3.bf16.msra.mxu1 %v17069_v1  ;;  %14256 = vmatprep.mubr.msk.f32.mxu1 %vm16619_vm0, %v16620_v2 }
 0xa9d   :  { %15762 = vmatprep.subr.bf16.mxu1 %v16618_v56 }
 0xaa0   :  { %15764 = vmatpush3.bf16.msra.mxu1 %v17086_v14 }
 0xaa1   :  { %15765 = vmatprep.subr.bf16.mxu1 %v16618_v56 }
 0xaa3   :  { %14257 = vmatmul.mubr.f32.vlgmr.msra.gmra.mrb[40].mxu1 %v4018_v37 }
 0xaa4   :  { %15767 = vmatpush3.bf16.msra.mxu1 %v17106_v22  ;;  %14267 = vmatprep.mubr.msk.f32.mxu1 %vm16619_vm0, %v16620_v2 }
 0xaa5   :  { %15768 = vmatprep.subr.bf16.mxu1 %v16618_v56 }
 0xaa8   :  { %15770 = vmatpush3.bf16.msra.mxu1 %v17117_v44 }
 0xaa9   :  { %15771 = vmatprep.subr.bf16.mxu1 %v16618_v56 }
 0xaab   :  { %14268 = vmatmul.mubr.f32.vlgmr.msra.gmra.mrb[42].mxu1 %v4019_v32 }
 0xaac   :  { %15773 = vmatpush3.bf16.msra.mxu1 %v17008_v28  ;;  %14278 = vmatprep.mubr.msk.f32.mxu1 %vm16619_vm0, %v16620_v2 }
 0xaad   :  { %15774 = vmatprep.subr.bf16.mxu1 %v16618_v56 }
 0xab0   :  { %15776 = vmatpush3.bf16.msra.mxu1 %v17024_v34 }
 0xab1   :  { %15777 = vmatprep.subr.bf16.mxu1 %v16618_v56 }
 0xab3   :  { %14279 = vmatmul.mubr.f32.vlgmr.msra.gmra.mrb[44].mxu1 %v4020_v35 }
 0xab4   :  { %15779 = vmatpush3.bf16.msra.mxu1 %v17134_v50  ;;  %14289 = vmatprep.mubr.msk.f32.mxu1 %vm16619_vm0, %v16620_v2 }
 0xab5   :  { %15780 = vmatprep.subr.bf16.mxu1 %v16618_v56 }
 0xab8   :  { %15782 = vmatpush3.bf16.msra.mxu1 %v17145_v53 }
 0xab9   :  { %v4461_v58 = vpop.permute.xlu1 %4460  ;;  %15783 = vmatprep.subr.bf16.mxu1 %v16618_v56 }
 0xaba   :  { %v4462_v59 = vsel %vm426_vm1, %v4461_v58, 0 }
 0xabb   :  { %v17464_v60 = vand.u32 4294901760, %v4462_v59  ;;  %14290 = vmatmul.mubr.f32.vlgmr.msra.gmra.mrb[46].mxu1 %v4018_v37 }
 0xabc   :  { %15785 = vmatpush3.bf16.msra.mxu1 %v17008_v28  ;;  %14300 = vmatprep.mubr.msk.f32.mxu1 %vm16619_vm0, %v16620_v2 }
 0xabd   :  { %v4534_v62 = vsub.f32 %v4462_v59, %v17464_v60  ;;  %15786 = vmatprep.subr.bf16.mxu1 %v16618_v56 }
 0xabf   :  { %v17471_v63 = vand.u32 4294901760, %v4534_v62 }
 0xac0   :  { %15788 = vmatpush3.bf16.msra.mxu1 %v17024_v34 }
 0xac1   :  { %15795 = vmatprep.subr.bf16.mxu1 %v16618_v56  ;;  %v4536_v0 = vsub.f32 %v4534_v62, %v17471_v63 }
 0xac3   :  { %14301 = vmatmul.mubr.f32.vlgmr.msra.gmra.mrb[48].mxu1 %v4018_v37  ;;  %v4537_v15 = vand.u32 4294901760, %v4536_v0 }
 0xac4   :  { %15797 = vmatpush3.bf16.msra.mxu1 %v17111_v25  ;;  %14322 = vmatprep.mubr.msk.f32.mxu1 %vm16619_vm0, %v16620_v2 }
 0xac5   :  { %14312 = vmatmul.mubr.f32.vlgmr.msra.gmra.mrb[42].mxu0 %v4537_v15  ;;  %15798 = vmatprep.subr.bf16.mxu1 %v16618_v56 }
 0xac6   :  { %15803 = vmatpush3.bf16.msra.mxu0 %v17183_v42  ;;  %14333 = vmatprep.mubr.msk.f32.mxu0 %vm16619_vm0, %v16620_v2 }
 0xac7   :  { %15804 = vmatprep.subr.bf16.mxu0 %v16618_v56 }
 0xac8   :  { %15800 = vmatpush3.bf16.msra.mxu1 %v17124_v46 }
 0xac9   :  { %15807 = vmatprep.subr.bf16.mxu1 %v16618_v56 }
 0xaca   :  { %15806 = vmatpush3.bf16.msra.mxu0 %v17190_v24 }
 0xacb   :  { %14323 = vmatmul.mubr.f32.vlgmr.msra.gmra.mrb[50].mxu1 %v17464_v60  ;;  %15813 = vmatprep.subr.bf16.mxu0 %v16618_v56 }
 0xacc   :  { %15809 = vmatpush3.bf16.msra.mxu1 %v17155_v29  ;;  %14344 = vmatprep.mubr.msk.f32.mxu1 %vm16619_vm0, %v16620_v2 }
 0xacd   :  { %14334 = vmatmul.mubr.f32.vlgmr.msra.gmra.mrb[44].mxu0 %v4534_v62  ;;  %15810 = vmatprep.subr.bf16.mxu1 %v16618_v56 }
 0xace   :  { %15815 = vmatpush3.bf16.msra.mxu0 %v17204_v26  ;;  %14355 = vmatprep.mubr.msk.f32.mxu0 %vm16619_vm0, %v16620_v2 }
 0xacf   :  { %15816 = vmatprep.subr.bf16.mxu0 %v16618_v56 }
 0xad0   :  { %15812 = vmatpush3.bf16.msra.mxu1 %v17159_v30 }
 0xad1   :  { %15819 = vmatprep.subr.bf16.mxu1 %v16618_v56 }
 0xad2   :  { %15818 = vmatpush3.bf16.msra.mxu0 %v17214_v27 }
 0xad3   :  { %14345 = vmatmul.mubr.f32.vlgmr.msra.gmra.mrb[52].mxu1 %v17471_v63  ;;  %15825 = vmatprep.subr.bf16.mxu0 %v16618_v56 }
 0xad4   :  { %15821 = vmatpush3.bf16.msra.mxu1 %v17155_v29  ;;  %14366 = vmatprep.mubr.msk.f32.mxu1 %vm16619_vm0, %v16620_v2 }
 0xad5   :  { %14356 = vmatmul.mubr.f32.vlgmr.msra.gmra.mrb[46].mxu0 %v17464_v60  ;;  %15822 = vmatprep.subr.bf16.mxu1 %v16618_v56 }
 0xad6   :  { %15827 = vmatpush3.bf16.msra.mxu0 %v16893_v5  ;;  %14377 = vmatprep.mubr.msk.f32.mxu0 %vm16619_vm0, %v16620_v2 }
 0xad7   :  { %15828 = vmatprep.subr.bf16.mxu0 %v16618_v56 }
 0xad8   :  { %15824 = vmatpush3.bf16.msra.mxu1 %v17159_v30 }
 0xad9   :  { %15861 = vmatprep.subr.bf16.mxu1 %v16618_v56 }
 0xada   :  { %15830 = vmatpush3.bf16.msra.mxu0 %v16902_v6 }
 0xadb   :  { %14367 = vmatmul.mubr.f32.vlgmr.msra.gmra.mrb[54].mxu1 %v17464_v60  ;;  %15831 = vmatprep.subr.bf16.mxu0 %v16618_v56 }
 0xadc   :  { %15863 = vmatpush3.bf16.msra.mxu1 %v17008_v28  ;;  %14443 = vmatprep.mubr.msk.f32.mxu1 %vm16619_vm0, %v16620_v2 }
 0xadd   :  { %14378 = vmatmul.mubr.f32.vlgmr.msra.gmra.mrb[48].mxu0 %v4537_v15  ;;  %15864 = vmatprep.subr.bf16.mxu1 %v16618_v56 }
 0xade   :  { %15833 = vmatpush3.bf16.msra.mxu0 %v16866_v43  ;;  %14388 = vmatprep.mubr.msk.f32.mxu0 %vm16619_vm0, %v16620_v2 }
 0xadf   :  { %15834 = vmatprep.subr.bf16.mxu0 %v16618_v56 }
 0xae0   :  { %15866 = vmatpush3.bf16.msra.mxu1 %v17024_v34 }
 0xae1   :  { %15867 = vmatprep.subr.bf16.mxu1 %v16618_v56 }
 0xae2   :  { %15836 = vmatpush3.bf16.msra.mxu0 %v16869_v52 }
 0xae3   :  { %15837 = vmatprep.subr.bf16.mxu0 %v16618_v56 }
 0xae5   :  { %14389 = vmatmul.mubr.f32.vlgmr.msra.gmra.mrb[48].mxu0 %v17464_v60 }
 0xae6   :  { %15839 = vmatpush3.bf16.msra.mxu0 %v16878_v3  ;;  %14399 = vmatprep.mubr.msk.f32.mxu0 %vm16619_vm0, %v16620_v2 }
 0xae7   :  { %15840 = vmatprep.subr.bf16.mxu0 %v16618_v56 }
 0xaea   :  { %15842 = vmatpush3.bf16.msra.mxu0 %v16884_v4 }
 0xaeb   :  { %15843 = vmatprep.subr.bf16.mxu0 %v16618_v56 }
 0xaed   :  { %14400 = vmatmul.mubr.f32.vlgmr.msra.gmra.mrb[48].mxu0 %v4534_v62 }
 0xaee   :  { %15845 = vmatpush3.bf16.msra.mxu0 %v16893_v5  ;;  %14410 = vmatprep.mubr.msk.f32.mxu0 %vm16619_vm0, %v16620_v2 }
 0xaef   :  { %15846 = vmatprep.subr.bf16.mxu0 %v16618_v56 }
 0xaf2   :  { %15848 = vmatpush3.bf16.msra.mxu0 %v16902_v6 }
 0xaf3   :  { %15849 = vmatprep.subr.bf16.mxu0 %v16618_v56 }
 0xaf5   :  { %14411 = vmatmul.mubr.f32.vlgmr.msra.gmra.mrb[48].mxu0 %v17471_v63 }
 0xaf6   :  { %15851 = vmatpush3.bf16.msra.mxu0 %v16913_v7  ;;  %14421 = vmatprep.mubr.msk.f32.mxu0 %vm16619_vm0, %v16620_v2 }
 0xaf7   :  { %15852 = vmatprep.subr.bf16.mxu0 %v16618_v56 }
 0xafa   :  { %15854 = vmatpush3.bf16.msra.mxu0 %v16922_v8 }
 0xafb   :  { %15855 = vmatprep.subr.bf16.mxu0 %v16618_v56 }
 0xafd   :  { %14422 = vmatmul.mubr.f32.vlgmr.msra.gmra.mrb[48].mxu0 %v17464_v60 }
 0xafe   :  { %15857 = vmatpush3.bf16.msra.mxu0 %v16893_v5  ;;  %14432 = vmatprep.mubr.msk.f32.mxu0 %vm16619_vm0, %v16620_v2 }
 0xaff   :  { %15858 = vmatprep.subr.bf16.mxu0 %v16618_v56 }
 0xb02   :  { %15860 = vmatpush3.bf16.msra.mxu0 %v16902_v6 }
 0xb03   :  { %15897 = vmatprep.subr.bf16.mxu0 %v16618_v56 }
 0xb05   :  { %14433 = vmatmul.mubr.f32.vlgmr.msra.gmra.mrb[48].mxu0 %v17464_v60 }
 0xb06   :  { %15899 = vmatpush3.bf16.msra.mxu0 %v17155_v29  ;;  %14509 = vmatprep.mubr.msk.f32.mxu0 %vm16619_vm0, %v16620_v2 }
 0xb07   :  { %15900 = vmatprep.subr.bf16.mxu0 %v16618_v56 }
 0xb0a   :  { %15902 = vmatpush3.bf16.msra.mxu0 %v17159_v30 }
 0xb0b   :  { %15909 = vmatprep.subr.bf16.mxu0 %v16618_v56 }
 0xb6e   :  { %v4024_v10 = vpop.f32.mrb[38].mxu1 }
 0xb6f   :  { %v14247_v9 = vpop.f32.mrb[39].mxu1 }
 0xb76   :  { %v4115_v11 = vpop.f32.mrb[40].mxu1 }
 0xb77   :  { %v4116_v47 = vadd.f32 %v4115_v11, %v4024_v10  ;;  %v14258_v18 = vpop.f32.mrb[41].mxu1 }
 0xb7e   :  { %v4195_v19 = vpop.f32.mrb[42].mxu1 }
 0xb7f   :  { %v4196_v20 = vadd.f32 %v4195_v19, %v4116_v47  ;;  %v14269_v21 = vpop.f32.mrb[43].mxu1 }
 0xb86   :  { %v4272_v23 = vpop.f32.mrb[44].mxu1 }
 0xb87   :  { %v4273_v33 = vadd.f32 %v4272_v23, %v4196_v20  ;;  %v14280_v39 = vpop.f32.mrb[45].mxu1 }
 0xb8e   :  { %v4355_v55 = vpop.f32.mrb[46].mxu1 }
 0xb8f   :  { %v4356_v41 = vadd.f32 %v4355_v55, %v4273_v33  ;;  %v14291_v31 = vpop.f32.mrb[47].mxu1 }
 0xb96   :  { %v4430_v12 = vpop.f32.mrb[48].mxu1 }
 0xb97   :  { %v4431_v13 = vadd.f32 %v4430_v12, %v4356_v41  ;;  %v14302_v16 = vpop.f32.mrb[49].mxu1 }
 0xb98   :  { %v4539_v17 = vpop.f32.mrb[42].mxu0 }
 0xb99   :  { %v4540_v37 = vadd.f32 %v4539_v17, %v4431_v13  ;;  %v14313_v32 = vpop.f32.mrb[43].mxu0 }
 0xb9e   :  { %v4630_v35 = vpop.f32.mrb[50].mxu1 }
 0xb9f   :  { %v4631_v36 = vadd.f32 %v4630_v35, %v4540_v37  ;;  %v14324_v38 = vpop.f32.mrb[51].mxu1 }
 0xba0   :  { %v4710_v58 = vpop.f32.mrb[44].mxu0 }
 0xba1   :  { %v4711_v59 = vadd.f32 %v4710_v58, %v4631_v36  ;;  %v14335_v60 = vpop.f32.mrb[45].mxu0 }
 0xba6   :  { %v4787_v62 = vpop.f32.mrb[52].mxu1 }
 0xba7   :  { %v4788_v63 = vadd.f32 %v4787_v62, %v4711_v59  ;;  %v14346_v0 = vpop.f32.mrb[53].mxu1 }
 0xba8   :  { %v4870_v15 = vpop.f32.mrb[46].mxu0 }
 0xba9   :  { %v4871_v10 = vadd.f32 %v4870_v15, %v4788_v63  ;;  %v14357_v9 = vpop.f32.mrb[47].mxu0 }
 0xbae   :  { %v4945_v11 = vpop.f32.mrb[54].mxu1 }
 0xbaf   :  { %v4946_v47 = vadd.f32 %v4945_v11, %v4871_v10  ;;  %v14368_v18 = vpop.f32.mrb[55].mxu1 }
 0xbb1   :  { %v4949_v19 = vadd.f32 %v17277_v61, %v4946_v47 }
 0xbb3   :  { %16522 = vtanh.f32 %v4949_v19  ;;  %v12812_v55 = vmul.f32 -1.442695, %v4949_v19 }
 0xbbd   :  { %v16523_v20 = vpop.eup %16522 }
 0xbbe   :  { %4959 = vrot.lane.b32.xlu0 %v16523_v20, %s16621_s23 }
 0xbd8   :  { %v5455_v21 = vpop.f32.mrb[48].mxu0 }
 0xbd9   :  { %v5949_v23 = vadd.f32 %v5455_v21, %v16963_v45  ;;  %v14434_v33 = vpop.f32.mrb[49].mxu0 }
 0xbdb   :  { %16524 = vtanh.f32 %v5949_v23  ;;  %v12813_v16 = vmul.f32 -1.442695, %v5949_v23 }
 0xbdc   :  { %16526 = vpow2.f32 %v12812_v55 }
 0xbe5   :  { %v16525_v39 = vpop.eup %16524 }
 0xbe6   :  { %5959 = vrot.lane.b32.xlu1 %v16525_v39, %s16621_s23  ;;  %v16527_v41 = vpop.eup %16526 }
 0xbe7   :  { %v4953_v31 = vadd.f32 1.0, %v16527_v41 }
 0xbe9   :  { %16528 = vrcp.f32 %v4953_v31 }
 0xbea   :  { %16530 = vpow2.f32 %v12813_v16 }
 0xbf3   :  { %v16529_v12 = vpop.eup %16528 }
 0xbf4   :  { %v16531_v17 = vpop.eup %16530  ;;  %v4957_v36 = vmul.f32 %v16529_v12, %v17427_v40 }
 0xbf5   :  { %v5953_v37 = vadd.f32 1.0, %v16531_v17 }
 0xbf7   :  { %16532 = vrcp.f32 %v5953_v37 }
 0xc01   :  { %v16533_v45 = vpop.eup %16532 }
 0xc02   :  { %v5957_v60 = vmul.f32 %v16533_v45, %v17432_v48 }
 0xc30   :  { %v4960_v13 = vpop.permute.xlu0 %4959 }
 0xc31   :  { %v4962_v61 = vmul.f32 %v16529_v12, %v4960_v13 }
 0xc33   :  { %4964 = vrot.lane.b32.xlu0 %v4962_v61, %s16622_s24 }
 0xc58   :  { %v5960_v32 = vpop.permute.xlu1 %5959 }
 0xc59   :  { %v5962_v35 = vmul.f32 %v16533_v45, %v5960_v32 }
 0xc5b   :  { %5964 = vrot.lane.b32.xlu1 %v5962_v35, %s16622_s24 }
 0xca5   :  { %v4965_v38 = vpop.permute.xlu0 %4964 }
 0xca6   :  { %v17569_v58 = vadd.f32 %v4965_v38, %v4957_v36 }
 0xca8   :  { %16534 = vtanh.f32 %v17569_v58 }
 0xcb2   :  { %v16535_v59 = vpop.eup %16534 }
 0xcb3   :  { %4970 = vrot.lane.b32.xlu0 %v16535_v59, %s16621_s23 }
 0xccd   :  { %v5965_v62 = vpop.permute.xlu1 %5964 }
 0xcce   :  { %v17574_v63 = vadd.f32 %v5965_v62, %v5957_v60 }
 0xcd0   :  { %16536 = vtanh.f32 %v17574_v63 }
 0xcda   :  { %v16537_v0 = vpop.eup %16536 }
 0xcdb   :  { %5970 = vrot.lane.b32.xlu1 %v16537_v0, %s16621_s23 }
 0xd25   :  { %v4971_v15 = vpop.permute.xlu0 %4970 }
 0xd26   :  { %v4973_v40 = vmul.f32 %v16529_v12, %v4971_v15 }
 0xd28   :  { %5460 = vrot.lane.b32.xlu0 %v4973_v40, %s16622_s24 }
 0xd4d   :  { %v5971_v10 = vpop.permute.xlu1 %5970 }
 0xd4e   :  { %v5973_v9 = vmul.f32 %v16533_v45, %v5971_v10 }
 0xd50   :  { %5975 = vrot.lane.b32.xlu1 %v5973_v9, %s16622_s24 }
 0xd9a   :  { %v5461_v11 = vpop.permute.xlu0 %5460 }
 0xd9b   :  { %v5462_v47 = vsel %vm426_vm1, %v5461_v11, 0 }
 0xd9c   :  { %v5533_v48 = vand.u32 4294901760, %v5462_v47 }
 0xd9e   :  { %v5534_v18 = vsub.f32 %v5462_v47, %v5533_v48 }
 0xda0   :  { %v5535_v19 = vand.u32 4294901760, %v5534_v18 }
 0xda2   :  { %v5536_v20 = vsub.f32 %v5534_v18, %v5535_v19 }
 0xda4   :  { %v5537_v21 = vand.u32 4294901760, %v5536_v20 }
 0xda6   :  { %14444 = vmatmul.mubr.f32.vlgmr.msra.gmra.mrb[56].mxu1 %v5537_v21 }
 0xda7   :  { %15869 = vmatpush3.bf16.msra.mxu1 %v17069_v1  ;;  %14454 = vmatprep.mubr.msk.f32.mxu1 %vm16619_vm0, %v16620_v2 }
 0xda8   :  { %15870 = vmatprep.subr.bf16.mxu1 %v16618_v56 }
 0xdab   :  { %15872 = vmatpush3.bf16.msra.mxu1 %v17086_v14 }
 0xdac   :  { %15873 = vmatprep.subr.bf16.mxu1 %v16618_v56 }
 0xdae   :  { %14455 = vmatmul.mubr.f32.vlgmr.msra.gmra.mrb[58].mxu1 %v5533_v48 }
 0xdaf   :  { %15875 = vmatpush3.bf16.msra.mxu1 %v17106_v22  ;;  %14465 = vmatprep.mubr.msk.f32.mxu1 %vm16619_vm0, %v16620_v2 }
 0xdb0   :  { %15876 = vmatprep.subr.bf16.mxu1 %v16618_v56 }
 0xdb3   :  { %15878 = vmatpush3.bf16.msra.mxu1 %v17117_v44 }
 0xdb4   :  { %15879 = vmatprep.subr.bf16.mxu1 %v16618_v56 }
 0xdb6   :  { %14466 = vmatmul.mubr.f32.vlgmr.msra.gmra.mrb[60].mxu1 %v5534_v18 }
 0xdb7   :  { %15881 = vmatpush3.bf16.msra.mxu1 %v17008_v28  ;;  %14476 = vmatprep.mubr.msk.f32.mxu1 %vm16619_vm0, %v16620_v2 }
 0xdb8   :  { %15882 = vmatprep.subr.bf16.mxu1 %v16618_v56 }
 0xdbb   :  { %15884 = vmatpush3.bf16.msra.mxu1 %v17024_v34 }
 0xdbc   :  { %15885 = vmatprep.subr.bf16.mxu1 %v16618_v56 }
 0xdbe   :  { %14477 = vmatmul.mubr.f32.vlgmr.msra.gmra.mrb[62].mxu1 %v5535_v19 }
 0xdbf   :  { %15887 = vmatpush3.bf16.msra.mxu1 %v17134_v50  ;;  %14487 = vmatprep.mubr.msk.f32.mxu1 %vm16619_vm0, %v16620_v2 }
 0xdc0   :  { %15888 = vmatprep.subr.bf16.mxu1 %v16618_v56 }
 0xdc2   :  { %v5976_v23 = vpop.permute.xlu1 %5975 }
 0xdc3   :  { %15890 = vmatpush3.bf16.msra.mxu1 %v17145_v53  ;;  %v5977_v33 = vsel %vm426_vm1, %v5976_v23, 0 }
 0xdc4   :  { %v17605_v39 = vand.u32 4294901760, %v5977_v33  ;;  %15891 = vmatprep.subr.bf16.mxu1 %v16618_v56 }
 0xdc6   :  { %v17609_v55 = vsub.f32 %v5977_v33, %v17605_v39  ;;  %14488 = vmatmul.mubr.f32.vlgmr.msra.gmra.mrb[64].mxu1 %v5533_v48 }
 0xdc7   :  { %15893 = vmatpush3.bf16.msra.mxu1 %v17008_v28  ;;  %14498 = vmatprep.mubr.msk.f32.mxu1 %vm16619_vm0, %v16620_v2 }
 0xdc8   :  { %v17615_v41 = vand.u32 4294901760, %v17609_v55  ;;  %15894 = vmatprep.subr.bf16.mxu1 %v16618_v56 }
 0xdca   :  { %v6051_v31 = vsub.f32 %v17609_v55, %v17615_v41 }
 0xdcb   :  { %15896 = vmatpush3.bf16.msra.mxu1 %v17024_v34 }
 0xdcc   :  { %15903 = vmatprep.subr.bf16.mxu1 %v16618_v56  ;;  %v6052_v12 = vand.u32 4294901760, %v6051_v31 }
 0xdce   :  { %14499 = vmatmul.mubr.f32.vlgmr.msra.gmra.mrb[66].mxu1 %v5533_v48  ;;  %14510 = vmatmul.mubr.f32.vlgmr.msra.gmra.mrb[50].mxu0 %v6052_v12 }
 0xdcf   :  { %15905 = vmatpush3.bf16.msra.mxu1 %v17111_v25  ;;  %15911 = vmatpush3.bf16.msra.mxu0 %v17183_v42 }
 0xdd0   :  { %15906 = vmatprep.subr.bf16.mxu1 %v16618_v56  ;;  %15912 = vmatprep.subr.bf16.mxu0 %v16618_v56 }
 0xdd1   :  { %14520 = vmatprep.mubr.msk.f32.mxu1 %vm16619_vm0, %v16620_v2  ;;  %14531 = vmatprep.mubr.msk.f32.mxu0 %vm16619_vm0, %v16620_v2 }
 0xdd3   :  { %15908 = vmatpush3.bf16.msra.mxu1 %v17124_v46  ;;  %15914 = vmatpush3.bf16.msra.mxu0 %v17190_v24 }
 0xdd4   :  { %15915 = vmatprep.subr.bf16.mxu1 %v16618_v56  ;;  %15921 = vmatprep.subr.bf16.mxu0 %v16618_v56 }
 0xdd6   :  { %14521 = vmatmul.mubr.f32.vlgmr.msra.gmra.mrb[68].mxu1 %v17605_v39  ;;  %14532 = vmatmul.mubr.f32.vlgmr.msra.gmra.mrb[52].mxu0 %v17609_v55 }
 0xdd7   :  { %15917 = vmatpush3.bf16.msra.mxu1 %v17155_v29  ;;  %15923 = vmatpush3.bf16.msra.mxu0 %v17204_v26 }
 0xdd8   :  { %15918 = vmatprep.subr.bf16.mxu1 %v16618_v56  ;;  %15924 = vmatprep.subr.bf16.mxu0 %v16618_v56 }
 0xdd9   :  { %14542 = vmatprep.mubr.msk.f32.mxu1 %vm16619_vm0, %v16620_v2  ;;  %14553 = vmatprep.mubr.msk.f32.mxu0 %vm16619_vm0, %v16620_v2 }
 0xddb   :  { %15920 = vmatpush3.bf16.msra.mxu1 %v17159_v30  ;;  %15926 = vmatpush3.bf16.msra.mxu0 %v17214_v27 }
 0xddc   :  { %15927 = vmatprep.subr.bf16.mxu1 %v16618_v56  ;;  %15933 = vmatprep.subr.bf16.mxu0 %v16618_v56 }
 0xdde   :  { %14543 = vmatmul.mubr.f32.vlgmr.msra.gmra.mrb[70].mxu1 %v17615_v41  ;;  %14554 = vmatmul.mubr.f32.vlgmr.msra.gmra.mrb[54].mxu0 %v17605_v39 }
 0xddf   :  { %15929 = vmatpush3.bf16.msra.mxu1 %v17155_v29  ;;  %15935 = vmatpush3.bf16.msra.mxu0 %v16893_v5 }
 0xde0   :  { %15930 = vmatprep.subr.bf16.mxu1 %v16618_v56  ;;  %15936 = vmatprep.subr.bf16.mxu0 %v16618_v56 }
 0xde1   :  { %14564 = vmatprep.mubr.msk.f32.mxu1 %vm16619_vm0, %v16620_v2  ;;  %14575 = vmatprep.mubr.msk.f32.mxu0 %vm16619_vm0, %v16620_v2 }
 0xde3   :  { %15932 = vmatpush3.bf16.msra.mxu1 %v17159_v30  ;;  %15938 = vmatpush3.bf16.msra.mxu0 %v16902_v6 }
 0xde4   :  { %15939 = vmatprep.subr.bf16.mxu0 %v16618_v56  ;;  %15969 = vmatprep.subr.bf16.mxu1 %v16618_v56 }
 0xde6   :  { %14565 = vmatmul.mubr.f32.vlgmr.msra.gmra.mrb[72].mxu1 %v17605_v39  ;;  %14576 = vmatmul.mubr.f32.vlgmr.msra.gmra.mrb[56].mxu0 %v6052_v12 }
 0xde7   :  { %15941 = vmatpush3.bf16.msra.mxu0 %v16866_v43  ;;  %14586 = vmatprep.mubr.msk.f32.mxu0 %vm16619_vm0, %v16620_v2 }
 0xde8   :  { %15942 = vmatprep.subr.bf16.mxu0 %v16618_v56  ;;  %15971 = vmatpush3.bf16.msra.mxu1 %v17008_v28 }
 0xde9   :  { %15972 = vmatprep.subr.bf16.mxu1 %v16618_v56  ;;  %14641 = vmatprep.mubr.msk.f32.mxu1 %vm16619_vm0, %v16620_v2 }
 0xdeb   :  { %15944 = vmatpush3.bf16.msra.mxu0 %v16869_v52 }
 0xdec   :  { %15945 = vmatprep.subr.bf16.mxu0 %v16618_v56  ;;  %15974 = vmatpush3.bf16.msra.mxu1 %v17024_v34 }
 0xded   :  { %15975 = vmatprep.subr.bf16.mxu1 %v16618_v56 }
 0xdee   :  { %14587 = vmatmul.mubr.f32.vlgmr.msra.gmra.mrb[56].mxu0 %v17605_v39 }
 0xdef   :  { %15947 = vmatpush3.bf16.msra.mxu0 %v16878_v3  ;;  %14597 = vmatprep.mubr.msk.f32.mxu0 %vm16619_vm0, %v16620_v2 }
 0xdf0   :  { %15948 = vmatprep.subr.bf16.mxu0 %v16618_v56 }
 0xdf3   :  { %15950 = vmatpush3.bf16.msra.mxu0 %v16884_v4 }
 0xdf4   :  { %15951 = vmatprep.subr.bf16.mxu0 %v16618_v56 }
 0xdf6   :  { %14598 = vmatmul.mubr.f32.vlgmr.msra.gmra.mrb[56].mxu0 %v17609_v55 }
 0xdf7   :  { %15953 = vmatpush3.bf16.msra.mxu0 %v16893_v5  ;;  %14608 = vmatprep.mubr.msk.f32.mxu0 %vm16619_vm0, %v16620_v2 }
 0xdf8   :  { %15954 = vmatprep.subr.bf16.mxu0 %v16618_v56 }
 0xdfb   :  { %15956 = vmatpush3.bf16.msra.mxu0 %v16902_v6 }
 0xdfc   :  { %15957 = vmatprep.subr.bf16.mxu0 %v16618_v56 }
 0xdfe   :  { %14609 = vmatmul.mubr.f32.vlgmr.msra.gmra.mrb[56].mxu0 %v17615_v41 }
 0xdff   :  { %15959 = vmatpush3.bf16.msra.mxu0 %v16913_v7  ;;  %14619 = vmatprep.mubr.msk.f32.mxu0 %vm16619_vm0, %v16620_v2 }
 0xe00   :  { %15960 = vmatprep.subr.bf16.mxu0 %v16618_v56 }
 0xe03   :  { %15962 = vmatpush3.bf16.msra.mxu0 %v16922_v8 }
 0xe04   :  { %15963 = vmatprep.subr.bf16.mxu0 %v16618_v56 }
 0xe06   :  { %14620 = vmatmul.mubr.f32.vlgmr.msra.gmra.mrb[56].mxu0 %v17605_v39 }
 0xe07   :  { %15965 = vmatpush3.bf16.msra.mxu0 %v16893_v5  ;;  %14630 = vmatprep.mubr.msk.f32.mxu0 %vm16619_vm0, %v16620_v2 }
 0xe08   :  { %15966 = vmatprep.subr.bf16.mxu0 %v16618_v56 }
 0xe0b   :  { %15968 = vmatpush3.bf16.msra.mxu0 %v16902_v6 }
 0xe0c   :  { %16005 = vmatprep.subr.bf16.mxu0 %v16618_v56 }
 0xe0e   :  { %14631 = vmatmul.mubr.f32.vlgmr.msra.gmra.mrb[56].mxu0 %v17605_v39 }
 0xe0f   :  { %16007 = vmatpush3.bf16.msra.mxu0 %v17155_v29  ;;  %14707 = vmatprep.mubr.msk.f32.mxu0 %vm16619_vm0, %v16620_v2 }
 0xe10   :  { %16008 = vmatprep.subr.bf16.mxu0 %v16618_v56 }
 0xe13   :  { %16010 = vmatpush3.bf16.msra.mxu0 %v17159_v30 }
 0xe14   :  { %16017 = vmatprep.subr.bf16.mxu0 %v16618_v56 }
 0xe79   :  { %v5539_v13 = vpop.f32.mrb[56].mxu1 }
 0xe7a   :  { %v14445_v61 = vpop.f32.mrb[57].mxu1 }
 0xe81   :  { %v5630_v16 = vpop.f32.mrb[58].mxu1 }
 0xe82   :  { %v5631_v17 = vadd.f32 %v5630_v16, %v5539_v13  ;;  %v14456_v37 = vpop.f32.mrb[59].mxu1 }
 0xe89   :  { %v5710_v45 = vpop.f32.mrb[60].mxu1 }
 0xe8a   :  { %v5711_v32 = vadd.f32 %v5710_v45, %v5631_v17  ;;  %v14467_v35 = vpop.f32.mrb[61].mxu1  ;;  %v17713_v17 = vld [vmem:[%s18364_s0 + $0x1f8] ss:$0 sm:$0xff] }
 0xe91   :  { %v5787_v36 = vpop.f32.mrb[62].mxu1 }
 0xe92   :  { %v5788_v38 = vadd.f32 %v5787_v36, %v5711_v32  ;;  %v14478_v59 = vpop.f32.mrb[63].mxu1 }
 0xe99   :  { %v5870_v60 = vpop.f32.mrb[64].mxu1 }
 0xe9a   :  { %v5871_v62 = vadd.f32 %v5870_v60, %v5788_v38  ;;  %v14489_v0 = vpop.f32.mrb[65].mxu1 }
 0xea1   :  { %v5945_v15 = vpop.f32.mrb[66].mxu1  ;;  %v6054_v40 = vpop.f32.mrb[50].mxu0 }
 0xea2   :  { %v5946_v10 = vadd.f32 %v5945_v15, %v5871_v62  ;;  %v14500_v9 = vpop.f32.mrb[67].mxu1  ;;  %v14511_v11 = vpop.f32.mrb[51].mxu0 }
 0xea4   :  { %v6055_v47 = vadd.f32 %v6054_v40, %v5946_v10 }
 0xea9   :  { %v6145_v48 = vpop.f32.mrb[68].mxu1  ;;  %v6225_v18 = vpop.f32.mrb[52].mxu0 }
 0xeaa   :  { %v6146_v19 = vadd.f32 %v6145_v48, %v6055_v47  ;;  %v14522_v20 = vpop.f32.mrb[69].mxu1  ;;  %v14533_v21 = vpop.f32.mrb[53].mxu0 }
 0xeac   :  { %v6226_v23 = vadd.f32 %v6225_v18, %v6146_v19 }
 0xeb1   :  { %v6302_v33 = vpop.f32.mrb[70].mxu1  ;;  %v6385_v39 = vpop.f32.mrb[54].mxu0 }
 0xeb2   :  { %v6303_v55 = vadd.f32 %v6302_v33, %v6226_v23  ;;  %v14544_v41 = vpop.f32.mrb[71].mxu1  ;;  %v14555_v31 = vpop.f32.mrb[55].mxu0 }
 0xeb4   :  { %v6386_v12 = vadd.f32 %v6385_v39, %v6303_v55 }
 0xeb9   :  { %v6460_v13 = vpop.f32.mrb[72].mxu1 }
 0xeba   :  { %v6461_v61 = vadd.f32 %v6460_v13, %v6386_v12  ;;  %v14566_v16 = vpop.f32.mrb[73].mxu1 }
 0xebc   :  { %v6464_v37 = vadd.f32 %v17713_v17, %v6461_v61 }
 0xebe   :  { %16538 = vtanh.f32 %v6464_v37  ;;  %v12814_v59 = vmul.f32 -1.442695, %v6464_v37 }
 0xec8   :  { %v16539_v45 = vpop.eup %16538 }
 0xec9   :  { %6474 = vrot.lane.b32.xlu0 %v16539_v45, %s16621_s23 }
 0xee1   :  { %v6970_v32 = vpop.f32.mrb[56].mxu0 }
 0xee2   :  { %v7464_v35 = vadd.f32 %v6970_v32, %v16969_v51  ;;  %v14632_v36 = vpop.f32.mrb[57].mxu0 }
 0xee4   :  { %16540 = vtanh.f32 %v7464_v35  ;;  %v12815_v10 = vmul.f32 -1.442695, %v7464_v35 }
 0xee5   :  { %16542 = vpow2.f32 %v12814_v59 }
 0xeee   :  { %v16541_v38 = vpop.eup %16540 }
 0xeef   :  { %7474 = vrot.lane.b32.xlu1 %v16541_v38, %s16621_s23  ;;  %v16543_v60 = vpop.eup %16542 }
 0xef0   :  { %v6468_v62 = vadd.f32 1.0, %v16543_v60 }
 0xef2   :  { %16544 = vrcp.f32 %v6468_v62 }
 0xef3   :  { %16546 = vpow2.f32 %v12815_v10 }
 0xefc   :  { %v16545_v0 = vpop.eup %16544 }
 0xefd   :  { %v16547_v9 = vpop.eup %16546  ;;  %v6472_v18 = vmul.f32 %v16545_v0, %v17569_v58 }
 0xefe   :  { %v7468_v11 = vadd.f32 1.0, %v16547_v9 }
 0xf00   :  { %16548 = vrcp.f32 %v7468_v11 }
 0xf0a   :  { %v16549_v51 = vpop.eup %16548 }
 0xf0b   :  { %v7472_v23 = vmul.f32 %v16549_v51, %v17574_v63 }
 0xf3b   :  { %v6475_v15 = vpop.permute.xlu0 %6474 }
 0xf3c   :  { %v6477_v40 = vmul.f32 %v16545_v0, %v6475_v15 }
 0xf3e   :  { %6479 = vrot.lane.b32.xlu0 %v6477_v40, %s16622_s24 }
 0xf61   :  { %v7475_v47 = vpop.permute.xlu1 %7474 }
 0xf62   :  { %v7477_v48 = vmul.f32 %v16549_v51, %v7475_v47 }
 0xf64   :  { %7479 = vrot.lane.b32.xlu1 %v7477_v48, %s16622_s24 }
 0xfb0   :  { %v6480_v19 = vpop.permute.xlu0 %6479 }
 0xfb1   :  { %v17722_v20 = vadd.f32 %v6480_v19, %v6472_v18 }
 0xfb3   :  { %16550 = vtanh.f32 %v17722_v20 }
 0xfbd   :  { %v16551_v21 = vpop.eup %16550 }
 0xfbe   :  { %6485 = vrot.lane.b32.xlu0 %v16551_v21, %s16621_s23 }
 0xfd6   :  { %v7480_v33 = vpop.permute.xlu1 %7479 }
 0xfd7   :  { %v17727_v39 = vadd.f32 %v7480_v33, %v7472_v23 }
 0xfd9   :  { %16552 = vtanh.f32 %v17727_v39 }
 0xfe3   :  { %v16553_v55 = vpop.eup %16552 }
 0xfe4   :  { %7485 = vrot.lane.b32.xlu1 %v16553_v55, %s16621_s23 }
0x1030   :  { %v6486_v41 = vpop.permute.xlu0 %6485 }
0x1031   :  { %v6488_v58 = vmul.f32 %v16545_v0, %v6486_v41 }
0x1033   :  { %6975 = vrot.lane.b32.xlu0 %v6488_v58, %s16622_s24 }
0x1056   :  { %v7486_v31 = vpop.permute.xlu1 %7485 }
0x1057   :  { %v7488_v12 = vmul.f32 %v16549_v51, %v7486_v31 }
0x1059   :  { %7490 = vrot.lane.b32.xlu1 %v7488_v12, %s16622_s24 }
0x10a5   :  { %v6976_v13 = vpop.permute.xlu0 %6975 }
0x10a6   :  { %v6977_v61 = vsel %vm426_vm1, %v6976_v13, 0 }
0x10a7   :  { %v7048_v63 = vand.u32 4294901760, %v6977_v61 }
0x10a9   :  { %v7049_v16 = vsub.f32 %v6977_v61, %v7048_v63 }
0x10ab   :  { %v7050_v37 = vand.u32 4294901760, %v7049_v16 }
0x10ad   :  { %v7051_v45 = vsub.f32 %v7049_v16, %v7050_v37 }
0x10af   :  { %v7052_v32 = vand.u32 4294901760, %v7051_v45 }
0x10b1   :  { %14642 = vmatmul.mubr.f32.vlgmr.msra.gmra.mrb[74].mxu1 %v7052_v32 }
0x10b2   :  { %15977 = vmatpush3.bf16.msra.mxu1 %v17069_v1  ;;  %14652 = vmatprep.mubr.msk.f32.mxu1 %vm16619_vm0, %v16620_v2 }
0x10b3   :  { %15978 = vmatprep.subr.bf16.mxu1 %v16618_v56 }
0x10b6   :  { %15980 = vmatpush3.bf16.msra.mxu1 %v17086_v14 }
0x10b7   :  { %15981 = vmatprep.subr.bf16.mxu1 %v16618_v56 }
0x10b9   :  { %14653 = vmatmul.mubr.f32.vlgmr.msra.gmra.mrb[76].mxu1 %v7048_v63 }
0x10ba   :  { %15983 = vmatpush3.bf16.msra.mxu1 %v17106_v22  ;;  %14663 = vmatprep.mubr.msk.f32.mxu1 %vm16619_vm0, %v16620_v2 }
0x10bb   :  { %15984 = vmatprep.subr.bf16.mxu1 %v16618_v56 }
0x10be   :  { %15986 = vmatpush3.bf16.msra.mxu1 %v17117_v44 }
0x10bf   :  { %15987 = vmatprep.subr.bf16.mxu1 %v16618_v56 }
0x10c1   :  { %14664 = vmatmul.mubr.f32.vlgmr.msra.gmra.mrb[78].mxu1 %v7049_v16 }
0x10c2   :  { %15989 = vmatpush3.bf16.msra.mxu1 %v17008_v28  ;;  %14674 = vmatprep.mubr.msk.f32.mxu1 %vm16619_vm0, %v16620_v2 }
0x10c3   :  { %15990 = vmatprep.subr.bf16.mxu1 %v16618_v56 }
0x10c6   :  { %15992 = vmatpush3.bf16.msra.mxu1 %v17024_v34 }
0x10c7   :  { %15993 = vmatprep.subr.bf16.mxu1 %v16618_v56 }
0x10c9   :  { %14675 = vmatmul.mubr.f32.vlgmr.msra.gmra.mrb[80].mxu1 %v7050_v37 }
0x10ca   :  { %15995 = vmatpush3.bf16.msra.mxu1 %v17134_v50  ;;  %14685 = vmatprep.mubr.msk.f32.mxu1 %vm16619_vm0, %v16620_v2 }
0x10cb   :  { %v7491_v35 = vpop.permute.xlu1 %7490  ;;  %15996 = vmatprep.subr.bf16.mxu1 %v16618_v56 }
0x10cc   :  { %v7492_v36 = vsel %vm426_vm1, %v7491_v35, 0 }
0x10cd   :  { %v17757_v38 = vand.u32 4294901760, %v7492_v36 }
0x10ce   :  { %15998 = vmatpush3.bf16.msra.mxu1 %v17145_v53 }
0x10cf   :  { %v17761_v59 = vsub.f32 %v7492_v36, %v17757_v38  ;;  %15999 = vmatprep.subr.bf16.mxu1 %v16618_v56 }
0x10d1   :  { %v17765_v60 = vand.u32 4294901760, %v17761_v59  ;;  %14686 = vmatmul.mubr.f32.vlgmr.msra.gmra.mrb[82].mxu1 %v7048_v63 }
0x10d2   :  { %16001 = vmatpush3.bf16.msra.mxu1 %v17008_v28  ;;  %14696 = vmatprep.mubr.msk.f32.mxu1 %vm16619_vm0, %v16620_v2 }
0x10d3   :  { %16002 = vmatprep.subr.bf16.mxu1 %v16618_v56  ;;  %v7566_v62 = vsub.f32 %v17761_v59, %v17765_v60 }
0x10d5   :  { %v7567_v0 = vand.u32 4294901760, %v7566_v62 }
0x10d6   :  { %16004 = vmatpush3.bf16.msra.mxu1 %v17024_v34 }
0x10d7   :  { %14708 = vmatmul.mubr.f32.vlgmr.msra.gmra.mrb[58].mxu0 %v7567_v0  ;;  %16011 = vmatprep.subr.bf16.mxu1 %v16618_v56 }
0x10d8   :  { %16019 = vmatpush3.bf16.msra.mxu0 %v17183_v42  ;;  %14729 = vmatprep.mubr.msk.f32.mxu0 %vm16619_vm0, %v16620_v2 }
0x10d9   :  { %14697 = vmatmul.mubr.f32.vlgmr.msra.gmra.mrb[84].mxu1 %v7048_v63  ;;  %16020 = vmatprep.subr.bf16.mxu0 %v16618_v56 }
0x10da   :  { %16013 = vmatpush3.bf16.msra.mxu1 %v17111_v25  ;;  %14718 = vmatprep.mubr.msk.f32.mxu1 %vm16619_vm0, %v16620_v2 }
0x10db   :  { %16014 = vmatprep.subr.bf16.mxu1 %v16618_v56 }
0x10dc   :  { %16022 = vmatpush3.bf16.msra.mxu0 %v17190_v24 }
0x10dd   :  { %16029 = vmatprep.subr.bf16.mxu0 %v16618_v56 }
0x10de   :  { %16016 = vmatpush3.bf16.msra.mxu1 %v17124_v46 }
0x10df   :  { %14730 = vmatmul.mubr.f32.vlgmr.msra.gmra.mrb[60].mxu0 %v17761_v59  ;;  %16023 = vmatprep.subr.bf16.mxu1 %v16618_v56 }
0x10e0   :  { %16031 = vmatpush3.bf16.msra.mxu0 %v17204_v26  ;;  %14751 = vmatprep.mubr.msk.f32.mxu0 %vm16619_vm0, %v16620_v2 }
0x10e1   :  { %14719 = vmatmul.mubr.f32.vlgmr.msra.gmra.mrb[86].mxu1 %v17757_v38  ;;  %16032 = vmatprep.subr.bf16.mxu0 %v16618_v56 }
0x10e2   :  { %16025 = vmatpush3.bf16.msra.mxu1 %v17155_v29  ;;  %14740 = vmatprep.mubr.msk.f32.mxu1 %vm16619_vm0, %v16620_v2 }
0x10e3   :  { %16026 = vmatprep.subr.bf16.mxu1 %v16618_v56 }
0x10e4   :  { %16034 = vmatpush3.bf16.msra.mxu0 %v17214_v27 }
0x10e5   :  { %16041 = vmatprep.subr.bf16.mxu0 %v16618_v56 }
0x10e6   :  { %16028 = vmatpush3.bf16.msra.mxu1 %v17159_v30 }
0x10e7   :  { %14752 = vmatmul.mubr.f32.vlgmr.msra.gmra.mrb[62].mxu0 %v17757_v38  ;;  %16035 = vmatprep.subr.bf16.mxu1 %v16618_v56 }
0x10e8   :  { %16043 = vmatpush3.bf16.msra.mxu0 %v16893_v5  ;;  %14773 = vmatprep.mubr.msk.f32.mxu0 %vm16619_vm0, %v16620_v2 }
0x10e9   :  { %14741 = vmatmul.mubr.f32.vlgmr.msra.gmra.mrb[88].mxu1 %v17765_v60  ;;  %16044 = vmatprep.subr.bf16.mxu0 %v16618_v56 }
0x10ea   :  { %16037 = vmatpush3.bf16.msra.mxu1 %v17155_v29  ;;  %14762 = vmatprep.mubr.msk.f32.mxu1 %vm16619_vm0, %v16620_v2 }
0x10eb   :  { %16038 = vmatprep.subr.bf16.mxu1 %v16618_v56 }
0x10ec   :  { %16046 = vmatpush3.bf16.msra.mxu0 %v16902_v6 }
0x10ed   :  { %16047 = vmatprep.subr.bf16.mxu0 %v16618_v56 }
0x10ee   :  { %16040 = vmatpush3.bf16.msra.mxu1 %v17159_v30 }
0x10ef   :  { %14774 = vmatmul.mubr.f32.vlgmr.msra.gmra.mrb[64].mxu0 %v7567_v0  ;;  %16077 = vmatprep.subr.bf16.mxu1 %v16618_v56 }
0x10f0   :  { %16049 = vmatpush3.bf16.msra.mxu0 %v16866_v43  ;;  %14784 = vmatprep.mubr.msk.f32.mxu0 %vm16619_vm0, %v16620_v2 }
0x10f1   :  { %14763 = vmatmul.mubr.f32.vlgmr.msra.gmra.mrb[90].mxu1 %v17757_v38  ;;  %16050 = vmatprep.subr.bf16.mxu0 %v16618_v56 }
0x10f2   :  { %16079 = vmatpush3.bf16.msra.mxu1 %v17008_v28  ;;  %14839 = vmatprep.mubr.msk.f32.mxu1 %vm16619_vm0, %v16620_v2 }
0x10f3   :  { %16080 = vmatprep.subr.bf16.mxu1 %v16618_v56 }
0x10f4   :  { %16052 = vmatpush3.bf16.msra.mxu0 %v16869_v52 }
0x10f5   :  { %16053 = vmatprep.subr.bf16.mxu0 %v16618_v56 }
0x10f6   :  { %16082 = vmatpush3.bf16.msra.mxu1 %v17024_v34 }
0x10f7   :  { %14785 = vmatmul.mubr.f32.vlgmr.msra.gmra.mrb[64].mxu0 %v17757_v38  ;;  %16083 = vmatprep.subr.bf16.mxu1 %v16618_v56 }
0x10f8   :  { %16055 = vmatpush3.bf16.msra.mxu0 %v16878_v3  ;;  %14795 = vmatprep.mubr.msk.f32.mxu0 %vm16619_vm0, %v16620_v2 }
0x10f9   :  { %16056 = vmatprep.subr.bf16.mxu0 %v16618_v56 }
0x10fc   :  { %16058 = vmatpush3.bf16.msra.mxu0 %v16884_v4 }
0x10fd   :  { %16059 = vmatprep.subr.bf16.mxu0 %v16618_v56 }
0x10ff   :  { %14796 = vmatmul.mubr.f32.vlgmr.msra.gmra.mrb[64].mxu0 %v17761_v59 }
0x1100   :  { %16061 = vmatpush3.bf16.msra.mxu0 %v16893_v5  ;;  %14806 = vmatprep.mubr.msk.f32.mxu0 %vm16619_vm0, %v16620_v2 }
0x1101   :  { %16062 = vmatprep.subr.bf16.mxu0 %v16618_v56 }
0x1104   :  { %16064 = vmatpush3.bf16.msra.mxu0 %v16902_v6 }
0x1105   :  { %16065 = vmatprep.subr.bf16.mxu0 %v16618_v56 }
0x1107   :  { %14807 = vmatmul.mubr.f32.vlgmr.msra.gmra.mrb[64].mxu0 %v17765_v60 }
0x1108   :  { %16067 = vmatpush3.bf16.msra.mxu0 %v16913_v7  ;;  %14817 = vmatprep.mubr.msk.f32.mxu0 %vm16619_vm0, %v16620_v2 }
0x1109   :  { %16068 = vmatprep.subr.bf16.mxu0 %v16618_v56 }
0x110c   :  { %16070 = vmatpush3.bf16.msra.mxu0 %v16922_v8 }
0x110d   :  { %16071 = vmatprep.subr.bf16.mxu0 %v16618_v56 }
0x110f   :  { %14818 = vmatmul.mubr.f32.vlgmr.msra.gmra.mrb[64].mxu0 %v17757_v38 }
0x1110   :  { %16073 = vmatpush3.bf16.msra.mxu0 %v16893_v5  ;;  %14828 = vmatprep.mubr.msk.f32.mxu0 %vm16619_vm0, %v16620_v2 }
0x1111   :  { %16074 = vmatprep.subr.bf16.mxu0 %v16618_v56 }
0x1114   :  { %16076 = vmatpush3.bf16.msra.mxu0 %v16902_v6 }
0x1115   :  { %16113 = vmatprep.subr.bf16.mxu0 %v16618_v56 }
0x1117   :  { %14829 = vmatmul.mubr.f32.vlgmr.msra.gmra.mrb[64].mxu0 %v17757_v38 }
0x1118   :  { %16115 = vmatpush3.bf16.msra.mxu0 %v17155_v29  ;;  %14905 = vmatprep.mubr.msk.f32.mxu0 %vm16619_vm0, %v16620_v2 }
0x1119   :  { %16116 = vmatprep.subr.bf16.mxu0 %v16618_v56 }
0x111c   :  { %16118 = vmatpush3.bf16.msra.mxu0 %v17159_v30 }
0x111d   :  { %16125 = vmatprep.subr.bf16.mxu0 %v16618_v56 }
0x1184   :  { %v7054_v15 = vpop.f32.mrb[74].mxu1 }
0x1185   :  { %v14643_v40 = vpop.f32.mrb[75].mxu1 }
0x118c   :  { %v7145_v10 = vpop.f32.mrb[76].mxu1 }
0x118d   :  { %v7146_v9 = vadd.f32 %v7145_v10, %v7054_v15  ;;  %v14654_v11 = vpop.f32.mrb[77].mxu1 }
0x1194   :  { %v7225_v51 = vpop.f32.mrb[78].mxu1 }
0x1195   :  { %v7226_v47 = vadd.f32 %v7225_v51, %v7146_v9  ;;  %v14665_v48 = vpop.f32.mrb[79].mxu1 }
0x119c   :  { %v7302_v18 = vpop.f32.mrb[80].mxu1 }
0x119d   :  { %v7303_v19 = vadd.f32 %v7302_v18, %v7226_v47  ;;  %v14676_v21 = vpop.f32.mrb[81].mxu1 }
0x11a4   :  { %v7385_v23 = vpop.f32.mrb[82].mxu1 }
0x11a5   :  { %v7386_v33 = vadd.f32 %v7385_v23, %v7303_v19  ;;  %v14687_v55 = vpop.f32.mrb[83].mxu1 }
0x11aa   :  { %v7569_v41 = vpop.f32.mrb[58].mxu0 }
0x11ab   :  { %v14709_v58 = vpop.f32.mrb[59].mxu0 }
0x11ac   :  { %v7460_v31 = vpop.f32.mrb[84].mxu1 }
0x11ad   :  { %v7461_v12 = vadd.f32 %v7460_v31, %v7386_v33  ;;  %v14698_v13 = vpop.f32.mrb[85].mxu1 }
0x11af   :  { %v7570_v61 = vadd.f32 %v7569_v41, %v7461_v12 }
0x11b2   :  { %v7740_v63 = vpop.f32.mrb[60].mxu0 }
0x11b3   :  { %v14731_v16 = vpop.f32.mrb[61].mxu0 }
0x11b4   :  { %v7660_v37 = vpop.f32.mrb[86].mxu1 }
0x11b5   :  { %v7661_v45 = vadd.f32 %v7660_v37, %v7570_v61  ;;  %v14720_v32 = vpop.f32.mrb[87].mxu1 }
0x11b7   :  { %v7741_v35 = vadd.f32 %v7740_v63, %v7661_v45 }
0x11ba   :  { %v7900_v36 = vpop.f32.mrb[62].mxu0 }
0x11bb   :  { %v14753_v38 = vpop.f32.mrb[63].mxu0 }
0x11bc   :  { %v7817_v59 = vpop.f32.mrb[88].mxu1 }
0x11bd   :  { %v7818_v60 = vadd.f32 %v7817_v59, %v7741_v35  ;;  %v14742_v62 = vpop.f32.mrb[89].mxu1 }
0x11bf   :  { %v7901_v0 = vadd.f32 %v7900_v36, %v7818_v60 }
0x11c4   :  { %v7975_v15 = vpop.f32.mrb[90].mxu1 }
0x11c5   :  { %v7976_v40 = vadd.f32 %v7975_v15, %v7901_v0  ;;  %v14764_v10 = vpop.f32.mrb[91].mxu1 }
0x11c7   :  { %v7979_v9 = vadd.f32 %v17713_v17, %v7976_v40 }
0x11c9   :  { %16554 = vtanh.f32 %v7979_v9  ;;  %v12816_v19 = vmul.f32 -1.442695, %v7979_v9 }
0x11d3   :  { %v16555_v11 = vpop.eup %16554 }
0x11d4   :  { %7989 = vrot.lane.b32.xlu0 %v16555_v11, %s16621_s23 }
0x11ea   :  { %v8485_v51 = vpop.f32.mrb[64].mxu0 }
0x11eb   :  { %v8979_v47 = vadd.f32 %v8485_v51, %v16967_v49  ;;  %v14830_v48 = vpop.f32.mrb[65].mxu0 }
0x11ed   :  { %16556 = vtanh.f32 %v8979_v47  ;;  %v12817_v58 = vmul.f32 -1.442695, %v8979_v47 }
0x11ee   :  { %16558 = vpow2.f32 %v12816_v19 }
0x11f7   :  { %v16557_v18 = vpop.eup %16556 }
0x11f8   :  { %8989 = vrot.lane.b32.xlu1 %v16557_v18, %s16621_s23  ;;  %v16559_v21 = vpop.eup %16558 }
0x11f9   :  { %v7983_v23 = vadd.f32 1.0, %v16559_v21 }
0x11fb   :  { %16560 = vrcp.f32 %v7983_v23 }
0x11fc   :  { %16562 = vpow2.f32 %v12817_v58 }
0x1205   :  { %v16561_v33 = vpop.eup %16560 }
0x1206   :  { %v16563_v31 = vpop.eup %16562  ;;  %v7987_v63 = vmul.f32 %v16561_v33, %v17722_v20 }
0x1207   :  { %v8983_v12 = vadd.f32 1.0, %v16563_v31 }
0x1209   :  { %16564 = vrcp.f32 %v8983_v12 }
0x1213   :  { %v16565_v49 = vpop.eup %16564 }
0x1214   :  { %v8987_v32 = vmul.f32 %v16565_v49, %v17727_v39 }
0x1246   :  { %v7990_v55 = vpop.permute.xlu0 %7989 }
0x1247   :  { %v7992_v41 = vmul.f32 %v16561_v33, %v7990_v55 }
0x1249   :  { %7994 = vrot.lane.b32.xlu0 %v7992_v41, %s16622_s24 }
0x126a   :  { %v8990_v13 = vpop.permute.xlu1 %8989 }
0x126b   :  { %v8992_v61 = vmul.f32 %v16565_v49, %v8990_v13 }
0x126d   :  { %8994 = vrot.lane.b32.xlu1 %v8992_v61, %s16622_s24 }
0x12bb   :  { %v7995_v16 = vpop.permute.xlu0 %7994 }
0x12bc   :  { %v17870_v37 = vadd.f32 %v7995_v16, %v7987_v63 }
0x12be   :  { %16566 = vtanh.f32 %v17870_v37 }
0x12c8   :  { %v16567_v45 = vpop.eup %16566 }
0x12c9   :  { %8000 = vrot.lane.b32.xlu0 %v16567_v45, %s16621_s23 }
0x12df   :  { %v8995_v35 = vpop.permute.xlu1 %8994 }
0x12e0   :  { %v17875_v36 = vadd.f32 %v8995_v35, %v8987_v32 }
0x12e2   :  { %16568 = vtanh.f32 %v17875_v36 }
0x12ec   :  { %v16569_v38 = vpop.eup %16568 }
0x12ed   :  { %9000 = vrot.lane.b32.xlu1 %v16569_v38, %s16621_s23 }
0x133b   :  { %v8001_v59 = vpop.permute.xlu0 %8000 }
0x133c   :  { %v8003_v20 = vmul.f32 %v16561_v33, %v8001_v59 }
0x133e   :  { %8490 = vrot.lane.b32.xlu0 %v8003_v20, %s16622_s24 }
0x135f   :  { %v9001_v60 = vpop.permute.xlu1 %9000 }
0x1360   :  { %v9003_v62 = vmul.f32 %v16565_v49, %v9001_v60 }
0x1362   :  { %9005 = vrot.lane.b32.xlu1 %v9003_v62, %s16622_s24 }
0x13b0   :  { %v8491_v0 = vpop.permute.xlu0 %8490 }
0x13b1   :  { %v8492_v15 = vsel %vm426_vm1, %v8491_v0, 0 }
0x13b2   :  { %v8563_v39 = vand.u32 4294901760, %v8492_v15 }
0x13b4   :  { %v8564_v40 = vsub.f32 %v8492_v15, %v8563_v39 }
0x13b6   :  { %v8565_v10 = vand.u32 4294901760, %v8564_v40 }
0x13b8   :  { %v8566_v9 = vsub.f32 %v8564_v40, %v8565_v10 }
0x13ba   :  { %v8567_v11 = vand.u32 4294901760, %v8566_v9 }
0x13bc   :  { %14840 = vmatmul.mubr.f32.vlgmr.msra.gmra.mrb[92].mxu1 %v8567_v11 }
0x13bd   :  { %16085 = vmatpush3.bf16.msra.mxu1 %v17069_v1  ;;  %14850 = vmatprep.mubr.msk.f32.mxu1 %vm16619_vm0, %v16620_v2 }
0x13be   :  { %16086 = vmatprep.subr.bf16.mxu1 %v16618_v56 }
0x13c1   :  { %16088 = vmatpush3.bf16.msra.mxu1 %v17086_v14 }
0x13c2   :  { %16089 = vmatprep.subr.bf16.mxu1 %v16618_v56 }
0x13c4   :  { %14851 = vmatmul.mubr.f32.vlgmr.msra.gmra.mrb[94].mxu1 %v8563_v39 }
0x13c5   :  { %16091 = vmatpush3.bf16.msra.mxu1 %v17106_v22  ;;  %14861 = vmatprep.mubr.msk.f32.mxu1 %vm16619_vm0, %v16620_v2 }
0x13c6   :  { %16092 = vmatprep.subr.bf16.mxu1 %v16618_v56 }
0x13c9   :  { %16094 = vmatpush3.bf16.msra.mxu1 %v17117_v44 }
0x13ca   :  { %16095 = vmatprep.subr.bf16.mxu1 %v16618_v56 }
0x13cc   :  { %14862 = vmatmul.mubr.f32.vlgmr.msra.gmra.mrb[96].mxu1 %v8564_v40 }
0x13cd   :  { %16097 = vmatpush3.bf16.msra.mxu1 %v17008_v28  ;;  %14872 = vmatprep.mubr.msk.f32.mxu1 %vm16619_vm0, %v16620_v2 }
0x13ce   :  { %16098 = vmatprep.subr.bf16.mxu1 %v16618_v56 }
0x13d1   :  { %16100 = vmatpush3.bf16.msra.mxu1 %v17024_v34 }
0x13d2   :  { %16101 = vmatprep.subr.bf16.mxu1 %v16618_v56 }
0x13d4   :  { %14873 = vmatmul.mubr.f32.vlgmr.msra.gmra.mrb[98].mxu1 %v8565_v10  ;;  %v9006_v51 = vpop.permute.xlu1 %9005 }
0x13d5   :  { %16103 = vmatpush3.bf16.msra.mxu1 %v17134_v50  ;;  %v9007_v47 = vsel %vm426_vm1, %v9006_v51, 0  ;;  %14883 = vmatprep.mubr.msk.f32.mxu1 %vm16619_vm0, %v16620_v2 }
0x13d6   :  { %v17904_v48 = vand.u32 4294901760, %v9007_v47  ;;  %16104 = vmatprep.subr.bf16.mxu1 %v16618_v56 }
0x13d8   :  { %v17908_v18 = vsub.f32 %v9007_v47, %v17904_v48 }
0x13d9   :  { %16106 = vmatpush3.bf16.msra.mxu1 %v17145_v53 }
0x13da   :  { %v17912_v19 = vand.u32 4294901760, %v17908_v18  ;;  %16107 = vmatprep.subr.bf16.mxu1 %v16618_v56 }
0x13dc   :  { %14884 = vmatmul.mubr.f32.vlgmr.msra.gmra.mrb[100].mxu1 %v8563_v39  ;;  %v9081_v21 = vsub.f32 %v17908_v18, %v17912_v19 }
0x13dd   :  { %16109 = vmatpush3.bf16.msra.mxu1 %v17008_v28  ;;  %14894 = vmatprep.mubr.msk.f32.mxu1 %vm16619_vm0, %v16620_v2 }
0x13de   :  { %16110 = vmatprep.subr.bf16.mxu1 %v16618_v56  ;;  %v9082_v23 = vand.u32 4294901760, %v9081_v21 }
0x13e0   :  { %14906 = vmatmul.mubr.f32.vlgmr.msra.gmra.mrb[66].mxu0 %v9082_v23 }
0x13e1   :  { %16112 = vmatpush3.bf16.msra.mxu1 %v17024_v34  ;;  %16127 = vmatpush3.bf16.msra.mxu0 %v17183_v42 }
0x13e2   :  { %16119 = vmatprep.subr.bf16.mxu1 %v16618_v56  ;;  %16128 = vmatprep.subr.bf16.mxu0 %v16618_v56 }
0x13e3   :  { %14927 = vmatprep.mubr.msk.f32.mxu0 %vm16619_vm0, %v16620_v2 }
0x13e4   :  { %14895 = vmatmul.mubr.f32.vlgmr.msra.gmra.mrb[102].mxu1 %v8563_v39 }
0x13e5   :  { %16121 = vmatpush3.bf16.msra.mxu1 %v17111_v25  ;;  %16130 = vmatpush3.bf16.msra.mxu0 %v17190_v24 }
0x13e6   :  { %16122 = vmatprep.subr.bf16.mxu1 %v16618_v56  ;;  %16137 = vmatprep.subr.bf16.mxu0 %v16618_v56 }
0x13e7   :  { %14916 = vmatprep.mubr.msk.f32.mxu1 %vm16619_vm0, %v16620_v2 }
0x13e8   :  { %14928 = vmatmul.mubr.f32.vlgmr.msra.gmra.mrb[68].mxu0 %v17908_v18 }
0x13e9   :  { %16124 = vmatpush3.bf16.msra.mxu1 %v17124_v46  ;;  %16139 = vmatpush3.bf16.msra.mxu0 %v17204_v26 }
0x13ea   :  { %16131 = vmatprep.subr.bf16.mxu1 %v16618_v56  ;;  %16140 = vmatprep.subr.bf16.mxu0 %v16618_v56 }
0x13eb   :  { %14949 = vmatprep.mubr.msk.f32.mxu0 %vm16619_vm0, %v16620_v2 }
0x13ec   :  { %14917 = vmatmul.mubr.f32.vlgmr.msra.gmra.mrb[104].mxu1 %v17904_v48 }
0x13ed   :  { %16133 = vmatpush3.bf16.msra.mxu1 %v17155_v29  ;;  %16142 = vmatpush3.bf16.msra.mxu0 %v17214_v27 }
0x13ee   :  { %16134 = vmatprep.subr.bf16.mxu1 %v16618_v56  ;;  %16149 = vmatprep.subr.bf16.mxu0 %v16618_v56 }
0x13ef   :  { %14938 = vmatprep.mubr.msk.f32.mxu1 %vm16619_vm0, %v16620_v2 }
0x13f0   :  { %14950 = vmatmul.mubr.f32.vlgmr.msra.gmra.mrb[70].mxu0 %v17904_v48 }
0x13f1   :  { %16136 = vmatpush3.bf16.msra.mxu1 %v17159_v30  ;;  %16151 = vmatpush3.bf16.msra.mxu0 %v16893_v5 }
0x13f2   :  { %16143 = vmatprep.subr.bf16.mxu1 %v16618_v56  ;;  %16152 = vmatprep.subr.bf16.mxu0 %v16618_v56 }
0x13f3   :  { %14971 = vmatprep.mubr.msk.f32.mxu0 %vm16619_vm0, %v16620_v2 }
0x13f4   :  { %14939 = vmatmul.mubr.f32.vlgmr.msra.gmra.mrb[106].mxu1 %v17912_v19 }
0x13f5   :  { %16145 = vmatpush3.bf16.msra.mxu1 %v17155_v29  ;;  %16154 = vmatpush3.bf16.msra.mxu0 %v16902_v6 }
0x13f6   :  { %16146 = vmatprep.subr.bf16.mxu1 %v16618_v56  ;;  %16155 = vmatprep.subr.bf16.mxu0 %v16618_v56 }
0x13f7   :  { %14960 = vmatprep.mubr.msk.f32.mxu1 %vm16619_vm0, %v16620_v2 }
0x13f8   :  { %14972 = vmatmul.mubr.f32.vlgmr.msra.gmra.mrb[72].mxu0 %v9082_v23 }
0x13f9   :  { %16148 = vmatpush3.bf16.msra.mxu1 %v17159_v30  ;;  %16157 = vmatpush3.bf16.msra.mxu0 %v16866_v43 }
0x13fa   :  { %16158 = vmatprep.subr.bf16.mxu0 %v16618_v56  ;;  %14982 = vmatprep.mubr.msk.f32.mxu0 %vm16619_vm0, %v16620_v2 }
0x13fb   :  { %16185 = vmatprep.subr.bf16.mxu1 %v16618_v56 }
0x13fc   :  { %14961 = vmatmul.mubr.f32.vlgmr.msra.gmra.mrb[108].mxu1 %v17904_v48 }
0x13fd   :  { %16160 = vmatpush3.bf16.msra.mxu0 %v16869_v52  ;;  %16187 = vmatpush3.bf16.msra.mxu1 %v17008_v28 }
0x13fe   :  { %16161 = vmatprep.subr.bf16.mxu0 %v16618_v56  ;;  %16188 = vmatprep.subr.bf16.mxu1 %v16618_v56 }
0x13ff   :  { %15037 = vmatprep.mubr.msk.f32.mxu1 %vm16619_vm0, %v16620_v2 }
0x1400   :  { %14983 = vmatmul.mubr.f32.vlgmr.msra.gmra.mrb[72].mxu0 %v17904_v48 }
0x1401   :  { %16163 = vmatpush3.bf16.msra.mxu0 %v16878_v3  ;;  %14993 = vmatprep.mubr.msk.f32.mxu0 %vm16619_vm0, %v16620_v2 }
0x1402   :  { %16164 = vmatprep.subr.bf16.mxu0 %v16618_v56  ;;  %16190 = vmatpush3.bf16.msra.mxu1 %v17024_v34 }
0x1403   :  { %16191 = vmatprep.subr.bf16.mxu1 %v16618_v56 }
0x1405   :  { %16166 = vmatpush3.bf16.msra.mxu0 %v16884_v4 }
0x1406   :  { %16167 = vmatprep.subr.bf16.mxu0 %v16618_v56 }
0x1408   :  { %14994 = vmatmul.mubr.f32.vlgmr.msra.gmra.mrb[72].mxu0 %v17908_v18 }
0x1409   :  { %16169 = vmatpush3.bf16.msra.mxu0 %v16893_v5  ;;  %15004 = vmatprep.mubr.msk.f32.mxu0 %vm16619_vm0, %v16620_v2 }
0x140a   :  { %16170 = vmatprep.subr.bf16.mxu0 %v16618_v56 }
0x140d   :  { %16172 = vmatpush3.bf16.msra.mxu0 %v16902_v6 }
0x140e   :  { %16173 = vmatprep.subr.bf16.mxu0 %v16618_v56 }
0x1410   :  { %15005 = vmatmul.mubr.f32.vlgmr.msra.gmra.mrb[72].mxu0 %v17912_v19 }
0x1411   :  { %16175 = vmatpush3.bf16.msra.mxu0 %v16913_v7  ;;  %15015 = vmatprep.mubr.msk.f32.mxu0 %vm16619_vm0, %v16620_v2 }
0x1412   :  { %16176 = vmatprep.subr.bf16.mxu0 %v16618_v56 }
0x1415   :  { %16178 = vmatpush3.bf16.msra.mxu0 %v16922_v8 }
0x1416   :  { %16179 = vmatprep.subr.bf16.mxu0 %v16618_v56 }
0x1418   :  { %15016 = vmatmul.mubr.f32.vlgmr.msra.gmra.mrb[72].mxu0 %v17904_v48 }
0x1419   :  { %16181 = vmatpush3.bf16.msra.mxu0 %v16893_v5  ;;  %15026 = vmatprep.mubr.msk.f32.mxu0 %vm16619_vm0, %v16620_v2 }
0x141a   :  { %16182 = vmatprep.subr.bf16.mxu0 %v16618_v56 }
0x141d   :  { %16184 = vmatpush3.bf16.msra.mxu0 %v16902_v6 }
0x141e   :  { %16221 = vmatprep.subr.bf16.mxu0 %v16618_v56 }
0x1420   :  { %15027 = vmatmul.mubr.f32.vlgmr.msra.gmra.mrb[72].mxu0 %v17904_v48 }
0x1421   :  { %16223 = vmatpush3.bf16.msra.mxu0 %v17155_v29  ;;  %15103 = vmatprep.mubr.msk.f32.mxu0 %vm16619_vm0, %v16620_v2 }
0x1422   :  { %16224 = vmatprep.subr.bf16.mxu0 %v16618_v56 }
0x1425   :  { %16226 = vmatpush3.bf16.msra.mxu0 %v17159_v30 }
0x1426   :  { %16233 = vmatprep.subr.bf16.mxu0 %v16618_v56 }
0x148f   :  { %v8569_v33 = vpop.f32.mrb[92].mxu1 }
0x1490   :  { %v14841_v55 = vpop.f32.mrb[93].mxu1 }
0x1497   :  { %v8660_v41 = vpop.f32.mrb[94].mxu1 }
0x1498   :  { %v8661_v58 = vadd.f32 %v8660_v41, %v8569_v33  ;;  %v14852_v31 = vpop.f32.mrb[95].mxu1 }
0x149f   :  { %v8740_v12 = vpop.f32.mrb[96].mxu1 }
0x14a0   :  { %v8741_v49 = vadd.f32 %v8740_v12, %v8661_v58  ;;  %v14863_v13 = vpop.f32.mrb[97].mxu1 }
0x14a7   :  { %v8817_v61 = vpop.f32.mrb[98].mxu1 }
0x14a8   :  { %v8818_v63 = vadd.f32 %v8817_v61, %v8741_v49  ;;  %v14874_v16 = vpop.f32.mrb[99].mxu1 }
0x14af   :  { %v8900_v45 = vpop.f32.mrb[100].mxu1 }
0x14b0   :  { %v8901_v32 = vadd.f32 %v8900_v45, %v8818_v63  ;;  %v14885_v35 = vpop.f32.mrb[101].mxu1 }
0x14b3   :  { %v9084_v38 = vpop.f32.mrb[66].mxu0 }
0x14b4   :  { %v14907_v59 = vpop.f32.mrb[67].mxu0 }
0x14b7   :  { %v8975_v20 = vpop.f32.mrb[102].mxu1 }
0x14b8   :  { %v8976_v60 = vadd.f32 %v8975_v20, %v8901_v32  ;;  %v14896_v62 = vpop.f32.mrb[103].mxu1 }
0x14ba   :  { %v9085_v0 = vadd.f32 %v9084_v38, %v8976_v60 }
0x14bb   :  { %v9255_v15 = vpop.f32.mrb[68].mxu0 }
0x14bc   :  { %v14929_v39 = vpop.f32.mrb[69].mxu0 }
0x14bf   :  { %v9175_v40 = vpop.f32.mrb[104].mxu1 }
0x14c0   :  { %v9176_v10 = vadd.f32 %v9175_v40, %v9085_v0  ;;  %v14918_v9 = vpop.f32.mrb[105].mxu1 }
0x14c2   :  { %v9256_v11 = vadd.f32 %v9255_v15, %v9176_v10 }
0x14c3   :  { %v9415_v51 = vpop.f32.mrb[70].mxu0 }
0x14c4   :  { %v14951_v47 = vpop.f32.mrb[71].mxu0 }
0x14c7   :  { %v9332_v48 = vpop.f32.mrb[106].mxu1 }
0x14c8   :  { %v9333_v18 = vadd.f32 %v9332_v48, %v9256_v11  ;;  %v14940_v19 = vpop.f32.mrb[107].mxu1 }
0x14ca   :  { %v9416_v21 = vadd.f32 %v9415_v51, %v9333_v18 }
0x14cf   :  { %v9490_v23 = vpop.f32.mrb[108].mxu1 }
0x14d0   :  { %v9491_v33 = vadd.f32 %v9490_v23, %v9416_v21  ;;  %v14962_v55 = vpop.f32.mrb[109].mxu1 }
0x14d2   :  { %v9494_v41 = vadd.f32 %v17713_v17, %v9491_v33 }
0x14d4   :  { %16570 = vtanh.f32 %v9494_v41  ;;  %v12818_v61 = vmul.f32 -1.442695, %v9494_v41 }
0x14de   :  { %v16571_v58 = vpop.eup %16570 }
0x14df   :  { %9504 = vrot.lane.b32.xlu0 %v16571_v58, %s16621_s23 }
0x14f3   :  { %v10000_v31 = vpop.f32.mrb[72].mxu0 }
0x14f4   :  { %v10494_v12 = vadd.f32 %v10000_v31, %v16973_v57  ;;  %v15028_v49 = vpop.f32.mrb[73].mxu0 }
0x14f6   :  { %16572 = vtanh.f32 %v10494_v12  ;;  %v12819_v35 = vmul.f32 -1.442695, %v10494_v12 }
0x14f7   :  { %16574 = vpow2.f32 %v12818_v61 }
0x1500   :  { %v16573_v13 = vpop.eup %16572 }
0x1501   :  { %10504 = vrot.lane.b32.xlu1 %v16573_v13, %s16621_s23  ;;  %v16575_v63 = vpop.eup %16574 }
0x1502   :  { %v9498_v16 = vadd.f32 1.0, %v16575_v63 }
0x1504   :  { %16576 = vrcp.f32 %v9498_v16 }
0x1505   :  { %16578 = vpow2.f32 %v12819_v35 }
0x150e   :  { %v16577_v45 = vpop.eup %16576 }
0x150f   :  { %v16579_v38 = vpop.eup %16578  ;;  %v9502_v62 = vmul.f32 %v16577_v45, %v17870_v37 }
0x1510   :  { %v10498_v59 = vadd.f32 1.0, %v16579_v38 }
0x1512   :  { %16580 = vrcp.f32 %v10498_v59 }
0x151c   :  { %v16581_v57 = vpop.eup %16580 }
0x151d   :  { %v10502_v40 = vmul.f32 %v16581_v57, %v17875_v36 }
0x1551   :  { %v9505_v32 = vpop.permute.xlu0 %9504 }
0x1552   :  { %v9507_v17 = vmul.f32 %v16577_v45, %v9505_v32 }
0x1554   :  { %9509 = vrot.lane.b32.xlu0 %v9507_v17, %s16622_s24 }
0x1573   :  { %v10505_v20 = vpop.permute.xlu1 %10504 }
0x1574   :  { %v10507_v60 = vmul.f32 %v16581_v57, %v10505_v20 }
0x1576   :  { %10509 = vrot.lane.b32.xlu1 %v10507_v60, %s16622_s24 }
0x15c6   :  { %v9510_v0 = vpop.permute.xlu0 %9509 }
0x15c7   :  { %v18018_v15 = vadd.f32 %v9510_v0, %v9502_v62 }
0x15c9   :  { %16582 = vtanh.f32 %v18018_v15 }
0x15d3   :  { %v16583_v39 = vpop.eup %16582 }
0x15d4   :  { %9515 = vrot.lane.b32.xlu0 %v16583_v39, %s16621_s23 }
0x15e8   :  { %v10510_v10 = vpop.permute.xlu1 %10509 }
0x15e9   :  { %v18023_v9 = vadd.f32 %v10510_v10, %v10502_v40 }
0x15eb   :  { %16584 = vtanh.f32 %v18023_v9 }
0x15f5   :  { %v16585_v11 = vpop.eup %16584 }
0x15f6   :  { %10515 = vrot.lane.b32.xlu1 %v16585_v11, %s16621_s23 }
0x1646   :  { %v9516_v51 = vpop.permute.xlu0 %9515 }
0x1647   :  { %v9518_v37 = vmul.f32 %v16577_v45, %v9516_v51 }
0x1649   :  { %10005 = vrot.lane.b32.xlu0 %v9518_v37, %s16622_s24 }
0x1668   :  { %v10516_v47 = vpop.permute.xlu1 %10515 }
0x1669   :  { %v10518_v48 = vmul.f32 %v16581_v57, %v10516_v47 }
0x166b   :  { %10520 = vrot.lane.b32.xlu1 %v10518_v48, %s16622_s24 }
0x16bb   :  { %v10006_v18 = vpop.permute.xlu0 %10005 }
0x16bc   :  { %v10007_v19 = vsel %vm426_vm1, %v10006_v18, 0 }
0x16bd   :  { %v10078_v36 = vand.u32 4294901760, %v10007_v19 }
0x16bf   :  { %v10079_v21 = vsub.f32 %v10007_v19, %v10078_v36 }
0x16c1   :  { %v10080_v23 = vand.u32 4294901760, %v10079_v21 }
0x16c3   :  { %v10081_v33 = vsub.f32 %v10079_v21, %v10080_v23 }
0x16c5   :  { %v10082_v55 = vand.u32 4294901760, %v10081_v33 }
0x16c7   :  { %15038 = vmatmul.mubr.f32.vlgmr.msra.gmra.mrb[110].mxu1 %v10082_v55  ;;  %v18162_v55 = vld [vmem:[%s18364_s0 + $0x1f8] ss:$0 sm:$0xff] }
0x16c8   :  { %16193 = vmatpush3.bf16.msra.mxu1 %v17069_v1  ;;  %15048 = vmatprep.mubr.msk.f32.mxu1 %vm16619_vm0, %v16620_v2 }
0x16c9   :  { %16194 = vmatprep.subr.bf16.mxu1 %v16618_v56 }
0x16cc   :  { %16196 = vmatpush3.bf16.msra.mxu1 %v17086_v14 }
0x16cd   :  { %16197 = vmatprep.subr.bf16.mxu1 %v16618_v56 }
0x16cf   :  { %15049 = vmatmul.mubr.f32.vlgmr.msra.gmra.mrb[112].mxu1 %v10078_v36 }
0x16d0   :  { %16199 = vmatpush3.bf16.msra.mxu1 %v17106_v22  ;;  %15059 = vmatprep.mubr.msk.f32.mxu1 %vm16619_vm0, %v16620_v2 }
0x16d1   :  { %16200 = vmatprep.subr.bf16.mxu1 %v16618_v56 }
0x16d4   :  { %16202 = vmatpush3.bf16.msra.mxu1 %v17117_v44 }
0x16d5   :  { %16203 = vmatprep.subr.bf16.mxu1 %v16618_v56 }
0x16d7   :  { %15060 = vmatmul.mubr.f32.vlgmr.msra.gmra.mrb[114].mxu1 %v10079_v21 }
0x16d8   :  { %16205 = vmatpush3.bf16.msra.mxu1 %v17008_v28  ;;  %15070 = vmatprep.mubr.msk.f32.mxu1 %vm16619_vm0, %v16620_v2 }
0x16d9   :  { %16206 = vmatprep.subr.bf16.mxu1 %v16618_v56 }
0x16dc   :  { %16208 = vmatpush3.bf16.msra.mxu1 %v17024_v34 }
0x16dd   :  { %v10521_v41 = vpop.permute.xlu1 %10520  ;;  %16209 = vmatprep.subr.bf16.mxu1 %v16618_v56 }
0x16de   :  { %v10522_v58 = vsel %vm426_vm1, %v10521_v41, 0 }
0x16df   :  { %v18049_v31 = vand.u32 4294901760, %v10522_v58  ;;  %15071 = vmatmul.mubr.f32.vlgmr.msra.gmra.mrb[116].mxu1 %v10080_v23 }
0x16e0   :  { %16211 = vmatpush3.bf16.msra.mxu1 %v17134_v50  ;;  %15081 = vmatprep.mubr.msk.f32.mxu1 %vm16619_vm0, %v16620_v2 }
0x16e1   :  { %v18055_v12 = vsub.f32 %v10522_v58, %v18049_v31  ;;  %16212 = vmatprep.subr.bf16.mxu1 %v16618_v56 }
0x16e3   :  { %v18059_v49 = vand.u32 4294901760, %v18055_v12 }
0x16e4   :  { %16214 = vmatpush3.bf16.msra.mxu1 %v17145_v53 }
0x16e5   :  { %16215 = vmatprep.subr.bf16.mxu1 %v16618_v56  ;;  %v10596_v13 = vsub.f32 %v18055_v12, %v18059_v49 }
0x16e7   :  { %15082 = vmatmul.mubr.f32.vlgmr.msra.gmra.mrb[118].mxu1 %v10078_v36  ;;  %v10597_v61 = vand.u32 4294901760, %v10596_v13 }
0x16e8   :  { %16217 = vmatpush3.bf16.msra.mxu1 %v17008_v28  ;;  %15092 = vmatprep.mubr.msk.f32.mxu1 %vm16619_vm0, %v16620_v2 }
0x16e9   :  { %15104 = vmatmul.mubr.f32.vlgmr.msra.gmra.mrb[74].mxu0 %v10597_v61  ;;  %16218 = vmatprep.subr.bf16.mxu1 %v16618_v56 }
0x16ea   :  { %16235 = vmatpush3.bf16.msra.mxu0 %v17183_v42  ;;  %15125 = vmatprep.mubr.msk.f32.mxu0 %vm16619_vm0, %v16620_v2 }
0x16eb   :  { %16236 = vmatprep.subr.bf16.mxu0 %v16618_v56 }
0x16ec   :  { %16220 = vmatpush3.bf16.msra.mxu1 %v17024_v34 }
0x16ed   :  { %16227 = vmatprep.subr.bf16.mxu1 %v16618_v56 }
0x16ee   :  { %16238 = vmatpush3.bf16.msra.mxu0 %v17190_v24 }
0x16ef   :  { %15093 = vmatmul.mubr.f32.vlgmr.msra.gmra.mrb[120].mxu1 %v10078_v36  ;;  %16245 = vmatprep.subr.bf16.mxu0 %v16618_v56 }
0x16f0   :  { %16229 = vmatpush3.bf16.msra.mxu1 %v17111_v25  ;;  %15114 = vmatprep.mubr.msk.f32.mxu1 %vm16619_vm0, %v16620_v2 }
0x16f1   :  { %15126 = vmatmul.mubr.f32.vlgmr.msra.gmra.mrb[76].mxu0 %v18055_v12  ;;  %16230 = vmatprep.subr.bf16.mxu1 %v16618_v56 }
0x16f2   :  { %16247 = vmatpush3.bf16.msra.mxu0 %v17204_v26  ;;  %15147 = vmatprep.mubr.msk.f32.mxu0 %vm16619_vm0, %v16620_v2 }
0x16f3   :  { %16248 = vmatprep.subr.bf16.mxu0 %v16618_v56 }
0x16f4   :  { %16232 = vmatpush3.bf16.msra.mxu1 %v17124_v46 }
0x16f5   :  { %16239 = vmatprep.subr.bf16.mxu1 %v16618_v56 }
0x16f6   :  { %16250 = vmatpush3.bf16.msra.mxu0 %v17214_v27 }
0x16f7   :  { %15115 = vmatmul.mubr.f32.vlgmr.msra.gmra.mrb[122].mxu1 %v18049_v31  ;;  %16257 = vmatprep.subr.bf16.mxu0 %v16618_v56 }
0x16f8   :  { %16241 = vmatpush3.bf16.msra.mxu1 %v17155_v29  ;;  %15136 = vmatprep.mubr.msk.f32.mxu1 %vm16619_vm0, %v16620_v2 }
0x16f9   :  { %15148 = vmatmul.mubr.f32.vlgmr.msra.gmra.mrb[78].mxu0 %v18049_v31  ;;  %16242 = vmatprep.subr.bf16.mxu1 %v16618_v56 }
0x16fa   :  { %16259 = vmatpush3.bf16.msra.mxu0 %v16893_v5  ;;  %15169 = vmatprep.mubr.msk.f32.mxu0 %vm16619_vm0, %v16620_v2 }
0x16fb   :  { %16260 = vmatprep.subr.bf16.mxu0 %v16618_v56 }
0x16fc   :  { %16244 = vmatpush3.bf16.msra.mxu1 %v17159_v30 }
0x16fd   :  { %16251 = vmatprep.subr.bf16.mxu1 %v16618_v56 }
0x16fe   :  { %16262 = vmatpush3.bf16.msra.mxu0 %v16902_v6 }
0x16ff   :  { %15137 = vmatmul.mubr.f32.vlgmr.msra.gmra.mrb[124].mxu1 %v18059_v49  ;;  %16263 = vmatprep.subr.bf16.mxu0 %v16618_v56 }
0x1700   :  { %16253 = vmatpush3.bf16.msra.mxu1 %v17155_v29  ;;  %15158 = vmatprep.mubr.msk.f32.mxu1 %vm16619_vm0, %v16620_v2 }
0x1701   :  { %15170 = vmatmul.mubr.f32.vlgmr.msra.gmra.mrb[80].mxu0 %v10597_v61  ;;  %16254 = vmatprep.subr.bf16.mxu1 %v16618_v56 }
0x1702   :  { %16265 = vmatpush3.bf16.msra.mxu0 %v16866_v43  ;;  %15180 = vmatprep.mubr.msk.f32.mxu0 %vm16619_vm0, %v16620_v2 }
0x1703   :  { %16266 = vmatprep.subr.bf16.mxu0 %v16618_v56 }
0x1704   :  { %16256 = vmatpush3.bf16.msra.mxu1 %v17159_v30 }
0x1705   :  { %16293 = vmatprep.subr.bf16.mxu1 %v16618_v56 }
0x1706   :  { %16268 = vmatpush3.bf16.msra.mxu0 %v16869_v52 }
0x1707   :  { %15159 = vmatmul.mubr.f32.vlgmr.msra.gmra.mrb[126].mxu1 %v18049_v31  ;;  %16269 = vmatprep.subr.bf16.mxu0 %v16618_v56 }
0x1708   :  { %16295 = vmatpush3.bf16.msra.mxu1 %v17008_v28  ;;  %15235 = vmatprep.mubr.msk.f32.mxu1 %vm16619_vm0, %v16620_v2 }
0x1709   :  { %15181 = vmatmul.mubr.f32.vlgmr.msra.gmra.mrb[80].mxu0 %v18049_v31  ;;  %16296 = vmatprep.subr.bf16.mxu1 %v16618_v56 }
0x170a   :  { %16271 = vmatpush3.bf16.msra.mxu0 %v16878_v3  ;;  %15191 = vmatprep.mubr.msk.f32.mxu0 %vm16619_vm0, %v16620_v2 }
0x170b   :  { %16272 = vmatprep.subr.bf16.mxu0 %v16618_v56 }
0x170c   :  { %16298 = vmatpush3.bf16.msra.mxu1 %v17024_v34 }
0x170d   :  { %16299 = vmatprep.subr.bf16.mxu1 %v16618_v56 }
0x170e   :  { %16274 = vmatpush3.bf16.msra.mxu0 %v16884_v4 }
0x170f   :  { %16275 = vmatprep.subr.bf16.mxu0 %v16618_v56 }
0x1711   :  { %15192 = vmatmul.mubr.f32.vlgmr.msra.gmra.mrb[80].mxu0 %v18055_v12 }
0x1712   :  { %16277 = vmatpush3.bf16.msra.mxu0 %v16893_v5  ;;  %15202 = vmatprep.mubr.msk.f32.mxu0 %vm16619_vm0, %v16620_v2 }
0x1713   :  { %16278 = vmatprep.subr.bf16.mxu0 %v16618_v56 }
0x1716   :  { %16280 = vmatpush3.bf16.msra.mxu0 %v16902_v6 }
0x1717   :  { %16281 = vmatprep.subr.bf16.mxu0 %v16618_v56 }
0x1719   :  { %15203 = vmatmul.mubr.f32.vlgmr.msra.gmra.mrb[80].mxu0 %v18059_v49 }
0x171a   :  { %16283 = vmatpush3.bf16.msra.mxu0 %v16913_v7  ;;  %15213 = vmatprep.mubr.msk.f32.mxu0 %vm16619_vm0, %v16620_v2 }
0x171b   :  { %16284 = vmatprep.subr.bf16.mxu0 %v16618_v56 }
0x171e   :  { %16286 = vmatpush3.bf16.msra.mxu0 %v16922_v8 }
0x171f   :  { %16287 = vmatprep.subr.bf16.mxu0 %v16618_v56 }
0x1721   :  { %15214 = vmatmul.mubr.f32.vlgmr.msra.gmra.mrb[80].mxu0 %v18049_v31 }
0x1722   :  { %16289 = vmatpush3.bf16.msra.mxu0 %v16893_v5  ;;  %15224 = vmatprep.mubr.msk.f32.mxu0 %vm16619_vm0, %v16620_v2 }
0x1723   :  { %16290 = vmatprep.subr.bf16.mxu0 %v16618_v56 }
0x1726   :  { %16292 = vmatpush3.bf16.msra.mxu0 %v16902_v6 }
0x1727   :  { %16329 = vmatprep.subr.bf16.mxu0 %v16618_v56 }
0x1729   :  { %15225 = vmatmul.mubr.f32.vlgmr.msra.gmra.mrb[80].mxu0 %v18049_v31 }
0x172a   :  { %16331 = vmatpush3.bf16.msra.mxu0 %v17155_v29  ;;  %15301 = vmatprep.mubr.msk.f32.mxu0 %vm16619_vm0, %v16620_v2 }
0x172b   :  { %16332 = vmatprep.subr.bf16.mxu0 %v16618_v56 }
0x172e   :  { %16334 = vmatpush3.bf16.msra.mxu0 %v17159_v30 }
0x172f   :  { %16341 = vmatprep.subr.bf16.mxu0 %v16618_v56 }
0x179a   :  { %v10084_v43 = vpop.f32.mrb[110].mxu1 }
0x179b   :  { %v15039_v52 = vpop.f32.mrb[111].mxu1 }
0x17a2   :  { %v10175_v3 = vpop.f32.mrb[112].mxu1 }
0x17a3   :  { %v10176_v4 = vadd.f32 %v10175_v3, %v10084_v43  ;;  %v15050_v5 = vpop.f32.mrb[113].mxu1 }
0x17aa   :  { %v10255_v6 = vpop.f32.mrb[114].mxu1 }
0x17ab   :  { %v10256_v7 = vadd.f32 %v10255_v6, %v10176_v4  ;;  %v15061_v8 = vpop.f32.mrb[115].mxu1 }
0x17b2   :  { %v10332_v63 = vpop.f32.mrb[116].mxu1 }
0x17b3   :  { %v10333_v16 = vadd.f32 %v10332_v63, %v10256_v7  ;;  %v15072_v45 = vpop.f32.mrb[117].mxu1 }
0x17ba   :  { %v10415_v32 = vpop.f32.mrb[118].mxu1 }
0x17bb   :  { %v10416_v17 = vadd.f32 %v10415_v32, %v10333_v16  ;;  %v15083_v35 = vpop.f32.mrb[119].mxu1 }
0x17bc   :  { %v10599_v38 = vpop.f32.mrb[74].mxu0 }
0x17bd   :  { %v15105_v59 = vpop.f32.mrb[75].mxu0 }
0x17c2   :  { %v10490_v57 = vpop.f32.mrb[120].mxu1 }
0x17c3   :  { %v10491_v20 = vadd.f32 %v10490_v57, %v10416_v17  ;;  %v15094_v60 = vpop.f32.mrb[121].mxu1 }
0x17c4   :  { %v10770_v62 = vpop.f32.mrb[76].mxu0 }
0x17c5   :  { %v15127_v0 = vpop.f32.mrb[77].mxu0  ;;  %v10600_v39 = vadd.f32 %v10599_v38, %v10491_v20 }
0x17ca   :  { %v10690_v40 = vpop.f32.mrb[122].mxu1 }
0x17cb   :  { %v10691_v10 = vadd.f32 %v10690_v40, %v10600_v39  ;;  %v15116_v11 = vpop.f32.mrb[123].mxu1 }
0x17cc   :  { %v10930_v51 = vpop.f32.mrb[78].mxu0 }
0x17cd   :  { %v15149_v37 = vpop.f32.mrb[79].mxu0  ;;  %v10771_v47 = vadd.f32 %v10770_v62, %v10691_v10 }
0x17d2   :  { %v10847_v48 = vpop.f32.mrb[124].mxu1 }
0x17d3   :  { %v10848_v18 = vadd.f32 %v10847_v48, %v10771_v47  ;;  %v15138_v19 = vpop.f32.mrb[125].mxu1 }
0x17d5   :  { %v10931_v36 = vadd.f32 %v10930_v51, %v10848_v18 }
0x17da   :  { %v11005_v21 = vpop.f32.mrb[126].mxu1 }
0x17db   :  { %v11006_v23 = vadd.f32 %v11005_v21, %v10931_v36  ;;  %v15160_v33 = vpop.f32.mrb[127].mxu1 }
0x17dd   :  { %v11009_v41 = vadd.f32 %v18162_v55, %v11006_v23 }
0x17df   :  { %16586 = vtanh.f32 %v11009_v41  ;;  %v12820_v61 = vmul.f32 -1.442695, %v11009_v41 }
0x17e9   :  { %v16587_v58 = vpop.eup %16586 }
0x17ea   :  { %11019 = vrot.lane.b32.xlu0 %v16587_v58, %s16621_s23 }
0x17fc   :  { %v11515_v31 = vpop.f32.mrb[80].mxu0 }
0x17fd   :  { %v12009_v12 = vadd.f32 %v11515_v31, %v16971_v54  ;;  %v15226_v49 = vpop.f32.mrb[81].mxu0 }
0x17ff   :  { %16588 = vtanh.f32 %v12009_v12  ;;  %v12821_v5 = vmul.f32 -1.442695, %v12009_v12 }
0x1800   :  { %16590 = vpow2.f32 %v12820_v61 }
0x1809   :  { %v16589_v13 = vpop.eup %16588 }
0x180a   :  { %12019 = vrot.lane.b32.xlu1 %v16589_v13, %s16621_s23  ;;  %v16591_v43 = vpop.eup %16590 }
0x180b   :  { %v11013_v52 = vadd.f32 1.0, %v16591_v43 }
0x180d   :  { %16592 = vrcp.f32 %v11013_v52 }
0x180e   :  { %16594 = vpow2.f32 %v12821_v5 }
0x1817   :  { %v16593_v3 = vpop.eup %16592 }
0x1818   :  { %v16595_v7 = vpop.eup %16594  ;;  %v11017_v45 = vmul.f32 %v16593_v3, %v18018_v15 }
0x1819   :  { %v12013_v8 = vadd.f32 1.0, %v16595_v7 }
0x181b   :  { %16596 = vrcp.f32 %v12013_v8 }
0x1825   :  { %v16597_v54 = vpop.eup %16596 }
0x1826   :  { %v12017_v38 = vmul.f32 %v16597_v54, %v18023_v9 }
0x185c   :  { %v11020_v4 = vpop.permute.xlu0 %11019 }
0x185d   :  { %v11022_v6 = vmul.f32 %v16593_v3, %v11020_v4 }
0x185f   :  { %11024 = vrot.lane.b32.xlu0 %v11022_v6, %s16622_s24 }
0x187c   :  { %v12020_v63 = vpop.permute.xlu1 %12019 }
0x187d   :  { %v12022_v16 = vmul.f32 %v16597_v54, %v12020_v63 }
0x187f   :  { %12024 = vrot.lane.b32.xlu1 %v12022_v16, %s16622_s24 }
0x18d1   :  { %v11025_v32 = vpop.permute.xlu0 %11024 }
0x18d2   :  { %v18171_v17 = vadd.f32 %v11025_v32, %v11017_v45 }
0x18d4   :  { %16598 = vtanh.f32 %v18171_v17 }
0x18de   :  { %v16599_v35 = vpop.eup %16598 }
0x18df   :  { %11030 = vrot.lane.b32.xlu0 %v16599_v35, %s16621_s23 }
0x18f1   :  { %v12025_v59 = vpop.permute.xlu1 %12024 }
0x18f2   :  { %v18176_v57 = vadd.f32 %v12025_v59, %v12017_v38 }
0x18f4   :  { %16600 = vtanh.f32 %v18176_v57 }
0x18fe   :  { %v16601_v20 = vpop.eup %16600 }
0x18ff   :  { %12030 = vrot.lane.b32.xlu1 %v16601_v20, %s16621_s23 }
0x1951   :  { %v11031_v60 = vpop.permute.xlu0 %11030 }
0x1952   :  { %v11033_v15 = vmul.f32 %v16593_v3, %v11031_v60 }
0x1954   :  { %11520 = vrot.lane.b32.xlu0 %v11033_v15, %s16622_s24 }
0x1971   :  { %v12031_v62 = vpop.permute.xlu1 %12030 }
0x1972   :  { %v12033_v0 = vmul.f32 %v16597_v54, %v12031_v62 }
0x1974   :  { %12035 = vrot.lane.b32.xlu1 %v12033_v0, %s16622_s24 }
0x19c6   :  { %v11521_v39 = vpop.permute.xlu0 %11520 }
0x19c7   :  { %v11522_v40 = vsel %vm426_vm1, %v11521_v39, 0 }
0x19c8   :  { %v11593_v9 = vand.u32 4294901760, %v11522_v40 }
0x19ca   :  { %v11594_v10 = vsub.f32 %v11522_v40, %v11593_v9 }
0x19cc   :  { %v11595_v11 = vand.u32 4294901760, %v11594_v10 }
0x19ce   :  { %v11596_v51 = vsub.f32 %v11594_v10, %v11595_v11 }
0x19d0   :  { %v11597_v37 = vand.u32 4294901760, %v11596_v51 }
0x19d2   :  { %15236 = vmatmul.mubr.f32.vlgmr.msra.gmra.mrb[128].mxu1 %v11597_v37 }
0x19d3   :  { %16301 = vmatpush3.bf16.msra.mxu1 %v17069_v1  ;;  %15246 = vmatprep.mubr.msk.f32.mxu1 %vm16619_vm0, %v16620_v2 }
0x19d4   :  { %16302 = vmatprep.subr.bf16.mxu1 %v16618_v56 }
0x19d7   :  { %16304 = vmatpush3.bf16.msra.mxu1 %v17086_v14 }
0x19d8   :  { %16305 = vmatprep.subr.bf16.mxu1 %v16618_v56 }
0x19da   :  { %15247 = vmatmul.mubr.f32.vlgmr.msra.gmra.mrb[130].mxu1 %v11593_v9 }
0x19db   :  { %16307 = vmatpush3.bf16.msra.mxu1 %v17106_v22  ;;  %15257 = vmatprep.mubr.msk.f32.mxu1 %vm16619_vm0, %v16620_v2 }
0x19dc   :  { %16308 = vmatprep.subr.bf16.mxu1 %v16618_v56 }
0x19df   :  { %16310 = vmatpush3.bf16.msra.mxu1 %v17117_v44 }
0x19e0   :  { %16311 = vmatprep.subr.bf16.mxu1 %v16618_v56 }
0x19e2   :  { %15258 = vmatmul.mubr.f32.vlgmr.msra.gmra.mrb[132].mxu1 %v11594_v10 }
0x19e3   :  { %16313 = vmatpush3.bf16.msra.mxu1 %v17008_v28  ;;  %15268 = vmatprep.mubr.msk.f32.mxu1 %vm16619_vm0, %v16620_v2 }
0x19e4   :  { %16314 = vmatprep.subr.bf16.mxu1 %v16618_v56 }
0x19e6   :  { %v12036_v1 = vpop.permute.xlu1 %12035 }
0x19e7   :  { %16316 = vmatpush3.bf16.msra.mxu1 %v17024_v34  ;;  %v12037_v14 = vsel %vm426_vm1, %v12036_v1, 0  ;;  %v12783_v22 = vsel %vm426_vm1, %v12036_v1, 0.0 }
0x19e8   :  { %v12108_v47 = vand.u32 4294901760, %v12037_v14  ;;  %12795 = vst [vmem:[%s18366_s2 + $0x8] sm:$0xff] %v12783_v22  ;;  %16317 = vmatprep.subr.bf16.mxu1 %v16618_v56 }
0x19ea   :  { %v12109_v44 = vsub.f32 %v12037_v14, %v12108_v47  ;;  %15269 = vmatmul.mubr.f32.vlgmr.msra.gmra.mrb[134].mxu1 %v11595_v11  ;;  %v12823_v14 = vld [vmem:[%s18364_s0 + $0x200] ss:$0 sm:$0xff] }
0x19eb   :  { %16319 = vmatpush3.bf16.msra.mxu1 %v17134_v50  ;;  %15279 = vmatprep.mubr.msk.f32.mxu1 %vm16619_vm0, %v16620_v2 }
0x19ec   :  { %v12110_v48 = vand.u32 4294901760, %v12109_v44  ;;  %16320 = vmatprep.subr.bf16.mxu1 %v16618_v56 }
0x19ee   :  { %v12111_v18 = vsub.f32 %v12109_v44, %v12110_v48 }
0x19ef   :  { %16322 = vmatpush3.bf16.msra.mxu1 %v17145_v53 }
0x19f0   :  { %16323 = vmatprep.subr.bf16.mxu1 %v16618_v56  ;;  %v12112_v19 = vand.u32 4294901760, %v12111_v18  ;;  %v12592_v18 = vld [vmem:[%s18364_s0 + $0x218] sm:$0xff] }
0x19f2   :  { %15280 = vmatmul.mubr.f32.vlgmr.msra.gmra.mrb[136].mxu1 %v11593_v9  ;;  %15302 = vmatmul.mubr.f32.vlgmr.msra.gmra.mrb[82].mxu0 %v12112_v19  ;;  %v12593_v19 = vld [vmem:[%s18364_s0 + $0x220] sm:$0xff] }
0x19f3   :  { %16325 = vmatpush3.bf16.msra.mxu1 %v17008_v28  ;;  %16343 = vmatpush3.bf16.msra.mxu0 %v17183_v42 }
0x19f4   :  { %16326 = vmatprep.subr.bf16.mxu1 %v16618_v56  ;;  %16344 = vmatprep.subr.bf16.mxu0 %v16618_v56 }
0x19f5   :  { %15290 = vmatprep.mubr.msk.f32.mxu1 %vm16619_vm0, %v16620_v2  ;;  %15323 = vmatprep.mubr.msk.f32.mxu0 %vm16619_vm0, %v16620_v2 }
0x19f7   :  { %16328 = vmatpush3.bf16.msra.mxu1 %v17024_v34  ;;  %16346 = vmatpush3.bf16.msra.mxu0 %v17190_v24 }
0x19f8   :  { %16335 = vmatprep.subr.bf16.mxu1 %v16618_v56  ;;  %16353 = vmatprep.subr.bf16.mxu0 %v16618_v56 }
0x19fa   :  { %15291 = vmatmul.mubr.f32.vlgmr.msra.gmra.mrb[138].mxu1 %v11593_v9  ;;  %15324 = vmatmul.mubr.f32.vlgmr.msra.gmra.mrb[84].mxu0 %v12109_v44  ;;  %v12824_v44 = vld [vmem:[%s18364_s0 + $0x208] ss:$0 sm:$0xff] }
0x19fb   :  { %16337 = vmatpush3.bf16.msra.mxu1 %v17111_v25  ;;  %16355 = vmatpush3.bf16.msra.mxu0 %v17204_v26 }
0x19fc   :  { %16338 = vmatprep.subr.bf16.mxu1 %v16618_v56  ;;  %16356 = vmatprep.subr.bf16.mxu0 %v16618_v56 }
0x19fd   :  { %15312 = vmatprep.mubr.msk.f32.mxu1 %vm16619_vm0, %v16620_v2  ;;  %15345 = vmatprep.mubr.msk.f32.mxu0 %vm16619_vm0, %v16620_v2 }
0x19ff   :  { %16340 = vmatpush3.bf16.msra.mxu1 %v17124_v46  ;;  %16358 = vmatpush3.bf16.msra.mxu0 %v17214_v27 }
0x1a00   :  { %16347 = vmatprep.subr.bf16.mxu1 %v16618_v56  ;;  %16365 = vmatprep.subr.bf16.mxu0 %v16618_v56 }
0x1a02   :  { %15313 = vmatmul.mubr.f32.vlgmr.msra.gmra.mrb[140].mxu1 %v12108_v47  ;;  %15346 = vmatmul.mubr.f32.vlgmr.msra.gmra.mrb[86].mxu0 %v12108_v47 }
0x1a03   :  { %16349 = vmatpush3.bf16.msra.mxu1 %v17155_v29  ;;  %15334 = vmatprep.mubr.msk.f32.mxu1 %vm16619_vm0, %v16620_v2 }
0x1a04   :  { %16350 = vmatprep.subr.bf16.mxu1 %v16618_v56  ;;  %15367 = vmatprep.mubr.msk.f32.mxu0 %vm16619_vm0, %v16620_v2 }
0x1a07   :  { %16352 = vmatpush3.bf16.msra.mxu1 %v17159_v30 }
0x1a08   :  { %16359 = vmatprep.subr.bf16.mxu1 %v16618_v56 }
0x1a0a   :  { %15335 = vmatmul.mubr.f32.vlgmr.msra.gmra.mrb[142].mxu1 %v12110_v48  ;;  %v12591_v48 = vld [vmem:[%s18364_s0 + $0x210] sm:$0xff] }
0x1a0b   :  { %16361 = vmatpush3.bf16.msra.mxu1 %v17155_v29  ;;  %15356 = vmatprep.mubr.msk.f32.mxu1 %vm16619_vm0, %v16620_v2 }
0x1a0c   :  { %16362 = vmatprep.subr.bf16.mxu1 %v16618_v56 }
0x1a0f   :  { %16364 = vmatpush3.bf16.msra.mxu1 %v17159_v30 }
0x1a10   :  { %16371 = vmatprep.subr.bf16.mxu1 %v16618_v56 }
0x1a12   :  { %15357 = vmatmul.mubr.f32.vlgmr.msra.gmra.mrb[144].mxu1 %v12108_v47 }
0x1a13   :  { %15402 = vmatprep.mubr.msk.f32.mxu1 %vm16619_vm0, %v16620_v2 }
0x1aa5   :  { %v11599_v28 = vpop.f32.mrb[128].mxu1 }
0x1aa6   :  { %v15237_v34 = vpop.f32.mrb[129].mxu1 }
0x1aa7   :  { %v12594_v34 = vld [vmem:[%s18364_s0 + $0x228] sm:$0xff] }
0x1aad   :  { %v11690_v25 = vpop.f32.mrb[130].mxu1 }
0x1aae   :  { %v11691_v46 = vadd.f32 %v11690_v25, %v11599_v28  ;;  %v15248_v50 = vpop.f32.mrb[131].mxu1  ;;  %v16366_v28 = vpack.c.bf16 %v12592_v18, %v12591_v48 }
0x1ab0   :  { %16367 = vmatpush3.bf16.msra.mxu0 %v16366_v28 }
0x1ab1   :  { %16368 = vmatprep.subr.bf16.mxu0 %v16618_v56 }
0x1ab5   :  { %v11770_v53 = vpop.f32.mrb[132].mxu1 }
0x1ab6   :  { %v11771_v29 = vadd.f32 %v11770_v53, %v11691_v46  ;;  %v15259_v42 = vpop.f32.mrb[133].mxu1 }
0x1abd   :  { %v11847_v24 = vpop.f32.mrb[134].mxu1 }
0x1abe   :  { %v11848_v26 = vadd.f32 %v11847_v24, %v11771_v29  ;;  %v15270_v27 = vpop.f32.mrb[135].mxu1  ;;  %v12676_v24 = vld [vmem:[%s18364_s0 + $0x238] sm:$0xff] }
0x1abf   :  { %v12678_v27 = vld [vmem:[%s18364_s0 + $0x248] sm:$0xff] }
0x1ac5   :  { %v11930_v36 = vpop.f32.mrb[136].mxu1  ;;  %v12114_v21 = vpop.f32.mrb[82].mxu0 }
0x1ac6   :  { %v11931_v30 = vadd.f32 %v11930_v36, %v11848_v26  ;;  %v15281_v23 = vpop.f32.mrb[137].mxu1  ;;  %v15303_v33 = vpop.f32.mrb[83].mxu0  ;;  %v12677_v26 = vld [vmem:[%s18364_s0 + $0x240] sm:$0xff] }
0x1ac7   :  { %v16372_v36 = vpack.c.bf16 %v12677_v26, %v12676_v24 }
0x1ac9   :  { %16373 = vmatpush3.bf16.msra.mxu1 %v16372_v36 }
0x1aca   :  { %16374 = vmatprep.subr.bf16.mxu1 %v16618_v56 }
0x1acd   :  { %v12005_v41 = vpop.f32.mrb[138].mxu1  ;;  %v12285_v58 = vpop.f32.mrb[84].mxu0 }
0x1ace   :  { %v12006_v31 = vadd.f32 %v12005_v41, %v11931_v30  ;;  %v15292_v2 = vpop.f32.mrb[139].mxu1  ;;  %v15325_v12 = vpop.f32.mrb[85].mxu0  ;;  %v12680_v41 = vld [vmem:[%s18364_s0 + $0x258] sm:$0xff] }
0x1ad0   :  { %v12115_v49 = vadd.f32 %v12114_v21, %v12006_v31  ;;  %v12679_v21 = vld [vmem:[%s18364_s0 + $0x250] sm:$0xff] }
0x1ad1   :  { %v16375_v23 = vpack.c.bf16 %v12679_v21, %v12678_v27 }
0x1ad3   :  { %16376 = vmatpush3.bf16.msra.mxu1 %v16375_v23 }
0x1ad4   :  { %16377 = vmatprep.subr.bf16.mxu1 %v16618_v56 }
0x1ad5   :  { %v12205_v13 = vpop.f32.mrb[140].mxu1  ;;  %v12445_v61 = vpop.f32.mrb[86].mxu0 }
0x1ad6   :  { %v12206_v43 = vadd.f32 %v12205_v13, %v12115_v49  ;;  %v15314_v52 = vpop.f32.mrb[141].mxu1  ;;  %v15347_v3 = vpop.f32.mrb[87].mxu0  ;;  %v12682_v13 = vld [vmem:[%s18364_s0 + $0x268] sm:$0xff] }
0x1ad8   :  { %v12286_v4 = vadd.f32 %v12285_v58, %v12206_v43  ;;  %v12681_v58 = vld [vmem:[%s18364_s0 + $0x260] sm:$0xff] }
0x1ad9   :  { %v16378_v49 = vpack.c.bf16 %v12681_v58, %v12680_v41 }
0x1adb   :  { %16379 = vmatpush3.bf16.msra.mxu1 %v16378_v49 }
0x1adc   :  { %16380 = vmatprep.subr.bf16.mxu1 %v16618_v56 }
0x1add   :  { %v12362_v5 = vpop.f32.mrb[142].mxu1 }
0x1ade   :  { %v12363_v6 = vadd.f32 %v12362_v5, %v12286_v4  ;;  %v15336_v7 = vpop.f32.mrb[143].mxu1  ;;  %v12684_v4 = vld [vmem:[%s18364_s0 + $0x278] sm:$0xff]  ;;  %v12685_v5 = vld [vmem:[%s18364_s0 + $0x280] sm:$0xff] }
0x1ae0   :  { %v12446_v8 = vadd.f32 %v12445_v61, %v12363_v6  ;;  %v12683_v61 = vld [vmem:[%s18364_s0 + $0x270] sm:$0xff]  ;;  %v16384_v6 = vpack.c.bf16 %v12685_v5, %v12684_v4 }
0x1ae1   :  { %v16381_v3 = vpack.c.bf16 %v12683_v61, %v12682_v13 }
0x1ae3   :  { %16382 = vmatpush3.bf16.msra.mxu1 %v16381_v3 }
0x1ae4   :  { %16383 = vmatprep.subr.bf16.mxu1 %v16618_v56 }
0x1ae5   :  { %v12520_v54 = vpop.f32.mrb[144].mxu1 }
0x1ae6   :  { %v12521_v63 = vadd.f32 %v12520_v54, %v12446_v8  ;;  %v15358_v16 = vpop.f32.mrb[145].mxu1  ;;  %v12686_v8 = vld [vmem:[%s18364_s0 + $0x288] sm:$0xff]  ;;  %v12687_v54 = vld [vmem:[%s18364_s0 + $0x290] sm:$0xff] }
0x1ae7   :  { %16385 = vmatpush3.bf16.msra.mxu1 %v16384_v6  ;;  %v12688_v16 = vld [vmem:[%s18364_s0 + $0x298] sm:$0xff] }
0x1ae8   :  { %v12524_v45 = vadd.f32 %v18162_v55, %v12521_v63  ;;  %16386 = vmatprep.subr.bf16.mxu1 %v16618_v56  ;;  %v16387_v63 = vpack.c.bf16 %v12687_v54, %v12686_v8 }
0x1aea   :  { %16602 = vtanh.f32 %v12524_v45  ;;  %v12822_v35 = vmul.f32 -1.442695, %v12524_v45  ;;  %v12689_v45 = vld [vmem:[%s18364_s0 + $0x2a0] sm:$0xff] }
0x1aeb   :  { %16388 = vmatpush3.bf16.msra.mxu1 %v16387_v63 }
0x1aec   :  { %16604 = vpow2.f32 %v12822_v35  ;;  %16389 = vmatprep.subr.bf16.mxu1 %v16618_v56  ;;  %v12690_v35 = vld [vmem:[%s18364_s0 + $0x2a8] sm:$0xff] }
0x1af4   :  { %v16603_v32 = vpop.eup %16602 }
0x1af5   :  { %12534 = vrot.lane.b32.xlu0 %v16603_v32, %s16621_s23  ;;  %v16390_v32 = vpack.c.bf16 %v12689_v45, %v12688_v16 }
0x1af6   :  { %v16605_v38 = vpop.eup %16604 }
0x1af7   :  { %v12528_v59 = vadd.f32 1.0, %v16605_v38  ;;  %v12691_v38 = vld [vmem:[%s18364_s0 + $0x2b0] sm:$0xff]  ;;  %16391 = vmatpush3.bf16.msra.mxu1 %v16390_v32 }
0x1af8   :  { %16392 = vmatprep.subr.bf16.mxu1 %v16618_v56  ;;  %v12827_v56 = vld [vmem:[%s18364_s0 + $0x2b8] ss:$0 sm:$0xff] }
0x1af9   :  { %16606 = vrcp.f32 %v12528_v59  ;;  %v16393_v59 = vpack.c.bf16 %v12691_v38, %v12690_v35 }
0x1afb   :  { %16394 = vmatpush3.bf16.msra.mxu1 %v16393_v59 }
0x1b03   :  { %v16607_v20 = vpop.eup %16606 }
0x1b04   :  { %v12532_v62 = vmul.f32 %v16607_v20, %v18171_v17 }
0x1b67   :  { %v12535_v60 = vpop.permute.xlu0 %12534 }
0x1b68   :  { %v12537_v15 = vmul.f32 %v16607_v20, %v12535_v60  ;;  %v16624_v60 = vmov 0  }
0x1b69   :  { %16481 = vset.pattern.permute.xlu0 %v16624_v60 }
0x1b6a   :  { %12539 = vrot.lane.b32.xlu1 %v12537_v15, %s16622_s24 }
0x1bdc   :  { %v12540_v0 = vpop.permute.xlu1 %12539 }
0x1bdd   :  { %v12542_v39 = vadd.f32 %v12540_v0, %v12532_v62  ;;  %v12825_v62 = vld [vmem:[%s18364_s0 + $0x230] ss:$0 sm:$0xff] }
0x1bdf   :  { %16608 = vtanh.f32 %v12542_v39 }
0x1be9   :  { %v16609_v55 = vpop.eup %16608 }
0x1bea   :  { %12545 = vrot.lane.b32.xlu0 %v16609_v55, %s16621_s23 }
0x1c5c   :  { %v12546_v40 = vpop.permute.xlu0 %12545 }
0x1c5d   :  { %v12548_v9 = vmul.f32 %v16607_v20, %v12546_v40  ;;  %v12774_v20 = vld [vmem:[%s18365_s1 + $0x40] sm:$0xff] }
0x1c5e   :  { %vm12775_vm2 = vcmp.lt.f32.partialorder %v12774_v20, 1e-06 }
0x1c5f   :  { %12552 = vrot.lane.b32.xlu1 %v12548_v9, %s16622_s24  ;;  %v12776_v15 = vsel %vm12775_vm2, 1, %v16624_v60 }
0x1cd1   :  { %v12553_v10 = vpop.permute.xlu1 %12552 }
0x1cd2   :  { %v12555_v11 = vsel %vm426_vm1, %v12553_v10, 0.0 }
0x1cd3   :  { %12556 = vadd.xlane.f32.xlu0 %v12555_v11  ;;  %12796 = vst [vmem:[%s18366_s2 + $0x10] sm:$0xff] %v12555_v11 }
0x1ce9   :  { %12578 = vrot.lane.b32.xlu0 %v12823_v14, %s16623_s26 }
0x1d60   :  { %v12557_v51 = vpop.xlane.xlu0 %12556 }
0x1d61   :  { %v12559_v17 = vmul.f32 0.03125, %v12557_v51 }
0x1d63   :  { %v12560_v37 = vsub.f32 %v12548_v9, %v12559_v17  ;;  %v12828_v17 = vld [vmem:[%s18364_s0 + $0x2c0] ss:$0 sm:$0xff] }
0x1d64   :  { %v12579_v2 = vpop.permute.xlu0 %12578 }
0x1d65   :  { %v12561_v1 = vmul.f32 %v12560_v37, %v12560_v37 }
0x1d67   :  { %12563 = vrot.lane.b32.xlu1 %v12561_v1, %s16622_s24 }
0x1dd9   :  { %v12564_v22 = vpop.permute.xlu1 %12563 }
0x1dda   :  { %v12566_v47 = vsel %vm426_vm1, %v12564_v22, 0.0 }
0x1ddb   :  { %12567 = vadd.xlane.f32.xlu1 %v12566_v47 }
0x1dec   :  { %12587 = vrot.lane.b32.xlu1 %v12824_v44, %s16623_s26 }
0x1df0   :  { %12785 = vrot.lane.b32.xlu1 %v18176_v57, %s16623_s26  ;;  %v16369_v57 = vpack.c.bf16 %v12594_v34, %v12593_v19 }
0x1df2   :  { %16370 = vmatpush3.bf16.msra.mxu0 %v16369_v57 }
0x1df4   :  { %12790 = vrot.lane.b32.xlu1 %v12542_v39, %s16623_s26 }
0x1e68   :  { %v12568_v25 = vpop.xlane.xlu1 %12567 }
0x1e69   :  { %v12569_v46 = vmul.f32 0.03125, %v12568_v25 }
0x1e6b   :  { %v12570_v50 = vadd.f32 1e-05, %v12569_v46 }
0x1e6c   :  { %v12588_v53 = vpop.permute.xlu1 %12587 }
0x1e6d   :  { %16610 = vrsqrt.f32 %v12570_v50 }
0x1e70   :  { %v12786_v29 = vpop.permute.xlu1 %12785 }
0x1e71   :  { %v12788_v42 = vsel %vm426_vm1, %v12786_v29, 0.0 }
0x1e72   :  { %12797 = vst [vmem:[%s18366_s2 + $0x18] sm:$0xff] %v12788_v42 }
0x1e74   :  { %v12791_v30 = vpop.permute.xlu1 %12790 }
0x1e75   :  { %v12793_v33 = vsel %vm426_vm1, %v12791_v30, 0.0 }
0x1e76   :  { %12798 = vst [vmem:[%s18366_s2 + $0x20] sm:$0xff] %v12793_v33 }
0x1e77   :  { %v16611_v31 = vpop.eup %16610 }
0x1e78   :  { %v12572_v12 = vmul.f32 %v16611_v31, %v12560_v37 }
0x1e7a   :  { %v12581_v43 = vmul.f32 %v12579_v2, %v12572_v12 }
0x1e7c   :  { %v12590_v52 = vadd.f32 %v12588_v53, %v12581_v43 }
0x1e7e   :  { %12601 = vrot.lane.b32.xlu0 %v12590_v52, %s16622_s24 }
0x1e82   :  { %12778 = vperm.xlu0 %16481, %v12776_v15  }
0x1ef0   :  { %v12602_v7 = vpop.permute.xlu0 %12601 }
0x1ef1   :  { %15368 = vmatmul.mubr.msk.f32.vlgmr.msra.gmra.mrb[88].mxu0 %vm426_vm1, %v12602_v7 }
0x1f01   :  { %v12779_v51 = vpop.permute.xlu0 %12778 }
0x1f02   :  { %vm12780_vm3 = vcmp.eq.s32.totalorder %v12779_v51, 1 }
0x1fc4   :  { %v12671_v0 = vpop.f32.mrb[88].mxu0 }
0x1fc5   :  { %v12672_v39 = vadd.f32 %v12825_v62, %v12671_v0  ;;  %v15369_v55 = vpop.f32.mrb[89].mxu0 }
0x1fc7   :  { %16612 = vtanh.f32 %v12672_v39 }
0x1fd1   :  { %v16613_v40 = vpop.eup %16612 }
0x1fd2   :  { %15403 = vmatmul.mubr.f32.vlgmr.msra.gmra.mrb[146].mxu1 %v16613_v40 }
0x20a5   :  { %v12763_v9 = vpop.f32.mrb[146].mxu1 }
0x20a6   :  { %v12764_v10 = vadd.f32 %v12827_v56, %v12763_v9  ;;  %v15404_v11 = vpop.f32.mrb[147].mxu1 }
0x20a8   :  { %16614 = vtanh.f32 %v12764_v10 }
0x20b2   :  { %v16615_v37 = vpop.eup %16614 }
0x20b3   :  { %v12773_v1 = vmul.f32 %v16615_v37, %v12828_v17 }
0x20b5   :  { %v12781_v14 = vsel %vm12780_vm3, 0.0, %v12773_v1 }
0x20b6   :  { %12794 = vst [vmem:[%s18366_s2] sm:$0xff] %v12781_v14 }

</bundles_post_ra>
